<compile_context>
chip_gen: v7x
topology: tpu7x:2x2x1
jax: 0.10.0
libtpu: 0.0.40
codegen_flags: <defaults>
</compile_context>

<pallas_src>
import math

import jax
import jax.numpy as jnp
import numpy as np
from jax.experimental import pallas as pl
from jax.experimental.pallas import tpu as pltpu


# ---------------------------------------------------------------------------
# Fused kernel
# ---------------------------------------------------------------------------
def _make_fused_kernel(num_layers, num_context, hidden, nt, nb):
    L, C, H, NT = num_layers, num_context, hidden, nt

    def kernel(*refs):
        (x_ref, w_in_ref, b_in_ref, a_ref, wb_ref, bb_ref, we_ref, be_ref,
         g_ref, beta_ref, w_end_ref, b_end_ref) = refs[:12]
        pred_ref = refs[12]
        w_out_refs = refs[13:13 + L]

        a_mat = a_ref[...]                                   # (NT, NT) kron(adj, I_T)

        # ---- input embed + in-kernel broadcast over contexts (layer-0 state) --
        h = jnp.dot(x_ref[...], w_in_ref[...],
                    preferred_element_type=jnp.float32) + b_in_ref[...]   # (R, H)
        x_flat = jnp.concatenate([h] * C, axis=1)                         # (R, C*H)

        for l in range(L):
            is_last = l == L - 1
            c_out = 1 if is_last else C

            # ---- BranchingLayer: single lane-dense matmul (block-diag W) -----
            logits = jnp.dot(x_flat, wb_ref[l],
                             preferred_element_type=jnp.float32) + bb_ref[l]  # (R, C*C)
            w_groups = []
            for c in range(C):
                grp = logits[:, c * C:(c + 1) * C]                        # (R, C)
                m = jnp.max(grp, axis=-1, keepdims=True)
                eg = jnp.exp(grp - m)
                s = jnp.sum(eg, axis=-1, keepdims=True)
                w_groups.append(eg * pl.reciprocal(s, approx=True))       # softmax

            if is_last:
                w_mean = w_groups[0]
                for c in range(1, C):
                    w_mean = w_mean + w_groups[c]
                w_rows = [w_mean * (1.0 / C)]            # mean over contexts, (R, C)
            else:
                w_rows = w_groups                         # C rows of (R, C)

            # weight_list output: lane-dense (R, c_out*C), (co, k)-major.
            # The transpose(-1, -2) is done in the JAX wrapper.
            if c_out == 1:
                w_out_refs[l][...] = w_rows[0]
            else:
                w_out_refs[l][...] = jnp.concatenate(w_rows, axis=1)

            # ---- graph mix over nodes (expert layer), in-kernel --------------
            xm_parts = []
            for b in range(nb):
                xb = x_flat[b * NT:(b + 1) * NT, :]
                xm_parts.append(
                    jnp.dot(a_mat, xb, preferred_element_type=jnp.float32))
            xm = xm_parts[0] if nb == 1 else jnp.concatenate(xm_parts, axis=0)

            # ---- experts: block-diagonal Linear(H->H) per context + ReLU -----
            e = jnp.maximum(
                jnp.dot(xm, we_ref[l], preferred_element_type=jnp.float32)
                + be_ref[l], 0.0)                                          # (R, C*H)

            # ---- mixture: x_out[:, co*H:(co+1)*H] = sum_k w[:, co, k] * e_k --
            outs = []
            for co in range(c_out):
                w_co = w_rows[co]                                          # (R, C)
                acc = w_co[:, 0:1] * e[:, 0:H]
                for k in range(1, C):
                    acc = acc + w_co[:, k:k + 1] * e[:, k * H:(k + 1) * H]
                outs.append(acc)
            x_new = outs[0] if c_out == 1 else jnp.concatenate(outs, axis=1)

            if is_last:
                # ---- LayerNorm(eps=1e-8) + end_mlp (Linear(H,128) + ReLU) ----
                mu = jnp.mean(x_new, axis=-1, keepdims=True)
                xc = x_new - mu
                var = jnp.mean(xc * xc, axis=-1, keepdims=True)
                y = xc * jax.lax.rsqrt(var + 1e-8) * g_ref[...] + beta_ref[...]
                z = jnp.dot(y, w_end_ref[...],
                            preferred_element_type=jnp.float32) + b_end_ref[...]
                pred_ref[...] = jnp.maximum(z, 0.0)   # dropout = identity (inference)
            else:
                x_flat = x_new

    return kernel


# ---------------------------------------------------------------------------
# Wrapper-side parameter packing & glue (plain JAX, runs once)
# ---------------------------------------------------------------------------
def _block_diag(w_stack):
    """(L, C, A, B) -> (L, C*A, C*B) per-layer block-diagonal."""
    Lw, Cw, Aw, Bw = w_stack.shape
    eye = jnp.eye(Cw, dtype=w_stack.dtype)
    out = jnp.einsum("lcab,cd->lcadb", w_stack, eye)
    return out.reshape(Lw, Cw * Aw, Cw * Bw)


def weights_product(weight_list, C):
    # Mirrors High_Encoder.weights_product (exercised here at num_layers == 2).
    result = weight_list[0]
    for i in range(len(weight_list) - 1):
        new = weight_list[i + 1]
        for _ in range(i):
            new = jnp.expand_dims(new, 2)
            shape = list(new.shape)
            shape[2] = C
            new = jnp.broadcast_to(new, tuple(shape))
        letters = "abcdefg"[: i + 2]
        result = jnp.einsum(f"{letters}ij,{letters}jk->{letters}ijk", result, new)
    return result


def high_encoder_forward(x, params, adj, num_layers, num_context, batch_block=None):
    B, T, N, D = x.shape
    H = params["W_in"].shape[1]
    F = params["W_end"].shape[1]
    C, L = num_context, num_layers
    NT = N * T
    rows = B * NT
    CH = C * H

    # Blocks always cover whole batch elements so the in-kernel graph mix sees
    # every node of a batch; target ~1024 rows/step to amortize per-step cost.
    if batch_block is not None:
        nb = batch_block
    elif NT % 8 == 0:
        nb = max(1, min(B, max(1, 1024 // NT)))
        while B % nb != 0:
            nb -= 1
    else:
        nb = B            # single block: block shape == full array dims
    grid = (B // nb,)
    R_tile = nb * NT

    # rows ordered (batch, node, time); feature dim last (lane dim)
    x_rows = jnp.transpose(x, (0, 2, 1, 3)).reshape(rows, D).astype(jnp.float32)
    a_exp = jnp.kron(adj.astype(jnp.float32), jnp.eye(T, dtype=jnp.float32))   # (NT, NT)
    # TODO(synk): for large N*T, replace kron(adj, I_T) with an (N, T*C*H)
    # reshape + (N x N) matmul inside the kernel to avoid the (NT)^2 operand.

    wb_bd = _block_diag(jnp.broadcast_to(params["Wb"][:, None], (L, C, H, C)))  # (L,CH,C*C)
    bb_flat = jnp.tile(params["bb"], (1, C)).reshape(L, 1, C * C)
    we_bd = _block_diag(params["We"])                                           # (L,CH,CH)
    be_flat = params["be"].reshape(L, 1, CH)

    w_widths = [(1 if l == L - 1 else C) * C for l in range(L)]

    # Explicit VMEM budget (generous; capped for v7x's 64 MiB per TensorCore).
    blocks = [
        (R_tile, D), (D, H), (1, H), (NT, NT),
        (L, CH, C * C), (L, 1, C * C), (L, CH, CH), (L, 1, CH),
        (1, H), (1, H), (H, F), (1, F), (R_tile, F),
    ] + [(R_tile, w) for w in w_widths]
    est = 2 * sum(4 * math.prod(b) for b in blocks)     # double-buffered blocks
    est += 16 * 4 * R_tile * CH                         # in-kernel live values
    vmem_limit = int(min(max(est, 32 << 20), 64 << 20))

    kernel = _make_fused_kernel(L, C, H, NT, nb)

    out_shape = tuple(
        [jax.ShapeDtypeStruct((rows, F), jnp.float32)]
        + [jax.ShapeDtypeStruct((rows, w), jnp.float32) for w in w_widths]
    )
    out_specs = tuple(
        [pl.BlockSpec((R_tile, F), lambda i: (i, 0))]
        + [pl.BlockSpec((R_tile, w), lambda i: (i, 0)) for w in w_widths]
    )
    in_specs = [
        pl.BlockSpec((R_tile, D), lambda i: (i, 0)),        # x rows (batch,node,time)
        pl.BlockSpec((D, H), lambda i: (0, 0)),             # W_in
        pl.BlockSpec((1, H), lambda i: (0, 0)),             # b_in
        pl.BlockSpec((NT, NT), lambda i: (0, 0)),           # kron(adj, I_T)
        pl.BlockSpec((L, CH, C * C), lambda i: (0, 0, 0)),  # branching block-diag W
        pl.BlockSpec((L, 1, C * C), lambda i: (0, 0, 0)),   # branching bias
        pl.BlockSpec((L, CH, CH), lambda i: (0, 0, 0)),     # expert block-diag W
        pl.BlockSpec((L, 1, CH), lambda i: (0, 0, 0)),      # expert bias
        pl.BlockSpec((1, H), lambda i: (0, 0)),             # layernorm gamma
        pl.BlockSpec((1, H), lambda i: (0, 0)),             # layernorm beta
        pl.BlockSpec((H, F), lambda i: (0, 0)),             # end-MLP W
        pl.BlockSpec((1, F), lambda i: (0, 0)),             # end-MLP b
    ]

    outs = pl.pallas_call(
        kernel,
        out_shape=out_shape,
        grid=grid,
        in_specs=in_specs,
        out_specs=out_specs,
        compiler_params=pltpu.CompilerParams(
            dimension_semantics=("parallel",),
            vmem_limit_bytes=vmem_limit,
        ),
    )(
        x_rows, params["W_in"], params["b_in"].reshape(1, H), a_exp,
        wb_bd, bb_flat, we_bd, be_flat,
        params["ln_g"].reshape(1, H), params["ln_b"].reshape(1, H),
        params["W_end"], params["b_end"].reshape(1, F),
    )

    pred = outs[0]
    predict_out = pred.reshape(B, N, T, F).transpose(0, 2, 1, 3)       # (B, T, N, F)

    weight_list = []
    for l in range(L):
        c_out = 1 if l == L - 1 else C
        w_l = outs[1 + l].reshape(B * N, T, c_out, C)
        weight_list.append(jnp.swapaxes(w_l, -1, -2))                  # (B*N, T, C, c_out)

    probs = weights_product(weight_list, C)
    context_probs = probs.reshape(probs.shape[0], probs.shape[1], -1)  # (B*N, T, ...)
    return predict_out, context_probs


# ---------------------------------------------------------------------------
# Pure-JAX reference of the same (synthesized) module, for correctness check
# ---------------------------------------------------------------------------
def high_encoder_reference(x, params, adj, num_layers, num_context):
    B, T, N, D = x.shape
    H = params["W_in"].shape[1]
    C, L = num_context, num_layers
    xr = jnp.transpose(x, (0, 2, 1, 3)).reshape(B * N, T, D)
    h = xr @ params["W_in"] + params["b_in"]
    xc = jnp.broadcast_to(h[:, :, None, :], (B * N, T, C, H))
    weight_list = []
    for l in range(L):
        is_last = l == L - 1
        logits = jnp.einsum("btch,hk->btck", xc, params["Wb"][l]) + params["bb"][l]
        w = jax.nn.softmax(logits, axis=-1)
        w_used = jnp.mean(w, axis=2, keepdims=True) if is_last else w
        weight_list.append(jnp.swapaxes(w_used, -1, -2))
        xg = xc.reshape(B, N, T, C, H)
        xm = jnp.einsum("mn,bntch->bmtch", adj, xg).reshape(B * N, T, C, H)
        e = jax.nn.relu(jnp.einsum("btkh,khj->btkj", xm, params["We"][l]) + params["be"][l])
        xc = jnp.einsum("btok,btkh->btoh", w_used, e)
    xsq = xc[:, :, 0, :]
    mu = xsq.mean(-1, keepdims=True)
    var = ((xsq - mu) ** 2).mean(-1, keepdims=True)
    y = (xsq - mu) / jnp.sqrt(var + 1e-8) * params["ln_g"] + params["ln_b"]
    pred = jax.nn.relu(y @ params["W_end"] + params["b_end"])
    predict_out = pred.reshape(B, N, T, -1).transpose(0, 2, 1, 3)
    probs = weights_product(weight_list, C)
    return predict_out, probs.reshape(probs.shape[0], probs.shape[1], -1)


def init_params(key, D, H, C, L, N):
    ks = jax.random.split(key, 10)
    s = 0.1
    params = {
        "W_in": s * jax.random.normal(ks[0], (D, H), jnp.float32),
        "b_in": s * jax.random.normal(ks[1], (H,), jnp.float32),
        "Wb": s * jax.random.normal(ks[2], (L, H, C), jnp.float32),
        "bb": s * jax.random.normal(ks[3], (L, C), jnp.float32),
        "We": s * jax.random.normal(ks[4], (L, C, H, H), jnp.float32),
        "be": s * jax.random.normal(ks[5], (L, C, H), jnp.float32),
        "ln_g": jnp.ones((H,), jnp.float32),
        "ln_b": jnp.zeros((H,), jnp.float32),
        "W_end": s * jax.random.normal(ks[6], (H, 128), jnp.float32),
        "b_end": s * jax.random.normal(ks[7], (128,), jnp.float32),
    }
    a = jnp.abs(jax.random.normal(ks[8], (N, N), jnp.float32)) + 0.1
    adj = a / a.sum(axis=-1, keepdims=True)
    return params, adj


if __name__ == "__main__":
    # small shapes: batch=2, his_ts=8, num_node=4, input_dim=4,
    # hidden_dim=32, num_context=3, num_layers=2
    B, T, N, D = 2, 8, 4, 4
    H, C, L = 32, 3, 2

    key = jax.random.PRNGKey(0)
    kx, kp = jax.random.split(key)
    x = jax.random.normal(kx, (B, T, N, D), jnp.float32)
    params, adj = init_params(kp, D, H, C, L, N)

    predict_out, context_probs = high_encoder_forward(x, params, adj, L, C)
    jax.block_until_ready((predict_out, context_probs))

    assert predict_out.shape == (B, T, N, 128), predict_out.shape
    assert context_probs.shape == (B * N, T, C * C), context_probs.shape

    # correctness vs. pure-JAX reference (loose tol: approx EUP reciprocal)
    ref_pred, ref_probs = high_encoder_reference(x, params, adj, L, C)
    np.testing.assert_allclose(np.asarray(predict_out), np.asarray(ref_pred),
                               rtol=3e-2, atol=3e-2)
    np.testing.assert_allclose(np.asarray(context_probs), np.asarray(ref_probs),
                               rtol=3e-2, atol=3e-2)

    print("KERNEL_OK")
</pallas_src>

<mosaic_0001>
module attributes {stable_mosaic.version = 11 : i64} {
  func.func @kernel(%arg0: i32, %arg1: memref<64x4xf32, #tpu.memory_space<vmem>>, %arg2: memref<4x32xf32, #tpu.memory_space<vmem>>, %arg3: memref<1x32xf32, #tpu.memory_space<vmem>>, %arg4: memref<32x32xf32, #tpu.memory_space<vmem>>, %arg5: memref<2x96x9xf32, #tpu.memory_space<vmem>>, %arg6: memref<2x1x9xf32, #tpu.memory_space<vmem>>, %arg7: memref<2x96x96xf32, #tpu.memory_space<vmem>>, %arg8: memref<2x1x96xf32, #tpu.memory_space<vmem>>, %arg9: memref<1x32xf32, #tpu.memory_space<vmem>>, %arg10: memref<1x32xf32, #tpu.memory_space<vmem>>, %arg11: memref<32x128xf32, #tpu.memory_space<vmem>>, %arg12: memref<1x128xf32, #tpu.memory_space<vmem>>, %arg13: memref<64x128xf32, #tpu.memory_space<vmem>>, %arg14: memref<64x9xf32, #tpu.memory_space<vmem>>, %arg15: memref<64x3xf32, #tpu.memory_space<vmem>>) attributes {dimension_semantics = [#tpu.dimension_semantics<parallel>], iteration_bounds = array<i64: 1>, scalar_prefetch = 0 : i64, scratch_operands = 0 : i64, tpu.core_type = #tpu.core_type<tc>, window_params = [{transform_indices = @transform_0, window_bounds = array<i64: 64, 4>}, {pipeline_mode = #tpu.pipeline_mode<synchronous>, transform_indices = @transform_1, window_bounds = array<i64: 4, 32>}, {pipeline_mode = #tpu.pipeline_mode<synchronous>, transform_indices = @transform_2, window_bounds = array<i64: 1, 32>}, {pipeline_mode = #tpu.pipeline_mode<synchronous>, transform_indices = @transform_3, window_bounds = array<i64: 32, 32>}, {pipeline_mode = #tpu.pipeline_mode<synchronous>, transform_indices = @transform_4, window_bounds = array<i64: 2, 96, 9>}, {pipeline_mode = #tpu.pipeline_mode<synchronous>, transform_indices = @transform_5, window_bounds = array<i64: 2, 1, 9>}, {pipeline_mode = #tpu.pipeline_mode<synchronous>, transform_indices = @transform_6, window_bounds = array<i64: 2, 96, 96>}, {pipeline_mode = #tpu.pipeline_mode<synchronous>, transform_indices = @transform_7, window_bounds = array<i64: 2, 1, 96>}, {pipeline_mode = #tpu.pipeline_mode<synchronous>, transform_indices = @transform_8, window_bounds = array<i64: 1, 32>}, {pipeline_mode = #tpu.pipeline_mode<synchronous>, transform_indices = @transform_9, window_bounds = array<i64: 1, 32>}, {pipeline_mode = #tpu.pipeline_mode<synchronous>, transform_indices = @transform_10, window_bounds = array<i64: 32, 128>}, {pipeline_mode = #tpu.pipeline_mode<synchronous>, transform_indices = @transform_11, window_bounds = array<i64: 1, 128>}, {transform_indices = @transform_12, window_bounds = array<i64: 64, 128>}, {transform_indices = @transform_13, window_bounds = array<i64: 64, 9>}, {transform_indices = @transform_14, window_bounds = array<i64: 64, 3>}]} {
    %c0 = arith.constant 0 : index
    %c0_0 = arith.constant 0 : index
    %0 = vector.load %arg4[%c0, %c0_0] : memref<32x32xf32, #tpu.memory_space<vmem>>, vector<32x32xf32>
    %c0_1 = arith.constant 0 : index
    %c0_2 = arith.constant 0 : index
    %1 = vector.load %arg1[%c0_1, %c0_2] : memref<64x4xf32, #tpu.memory_space<vmem>>, vector<64x4xf32>
    %c0_3 = arith.constant 0 : index
    %c0_4 = arith.constant 0 : index
    %2 = vector.load %arg2[%c0_3, %c0_4] : memref<4x32xf32, #tpu.memory_space<vmem>>, vector<4x32xf32>
    %cst = arith.constant dense<0.000000e+00> : vector<64x32xf32>
    %3 = tpu.matmul %1, %2, %cst {dimension_numbers = #tpu.dot_dimension_numbers<[1], [0], [0], [1], [0, 0, 1, 1], [], []>} : vector<64x4xf32>, vector<4x32xf32>, vector<64x32xf32> -> vector<64x32xf32>
    %c0_5 = arith.constant 0 : index
    %c0_6 = arith.constant 0 : index
    %4 = vector.load %arg3[%c0_5, %c0_6] : memref<1x32xf32, #tpu.memory_space<vmem>>, vector<1x32xf32>
    %5 = vector.broadcast %4 : vector<1x32xf32> to vector<64x32xf32>
    %6 = arith.addf %3, %5 : vector<64x32xf32>
    %7 = tpu.concatenate %6, %6, %6 in 1 : vector<64x32xf32>, vector<64x32xf32>, vector<64x32xf32> -> vector<64x96xf32>
    %c0_7 = arith.constant 0 : index
    %c0_8 = arith.constant 0 : index
    %c0_9 = arith.constant 0 : index
    %8 = vector.load %arg5[%c0_7, %c0_8, %c0_9] : memref<2x96x9xf32, #tpu.memory_space<vmem>>, vector<1x96x9xf32>
    %9 = vector.shape_cast %8 : vector<1x96x9xf32> to vector<96x9xf32>
    %cst_10 = arith.constant dense<0.000000e+00> : vector<64x9xf32>
    %10 = tpu.matmul %7, %9, %cst_10 {dimension_numbers = #tpu.dot_dimension_numbers<[1], [0], [0], [1], [0, 0, 1, 1], [], []>} : vector<64x96xf32>, vector<96x9xf32>, vector<64x9xf32> -> vector<64x9xf32>
    %c0_11 = arith.constant 0 : index
    %c0_12 = arith.constant 0 : index
    %c0_13 = arith.constant 0 : index
    %11 = vector.load %arg6[%c0_11, %c0_12, %c0_13] : memref<2x1x9xf32, #tpu.memory_space<vmem>>, vector<1x1x9xf32>
    %12 = vector.shape_cast %11 : vector<1x1x9xf32> to vector<1x9xf32>
    %13 = vector.broadcast %12 : vector<1x9xf32> to vector<64x9xf32>
    %14 = arith.addf %10, %13 : vector<64x9xf32>
    %15 = vector.extract_strided_slice %14 {offsets = [0, 0], sizes = [64, 3], strides = [1, 1]} : vector<64x9xf32> to vector<64x3xf32>
    %cst_14 = arith.constant dense<0xFF800000> : vector<64xf32>
    %16 = vector.multi_reduction <maximumf>, %15, %cst_14 [1] : vector<64x3xf32> to vector<64xf32>
    %17 = vector.shape_cast %16 : vector<64xf32> to vector<64x1xf32>
    %18 = vector.broadcast %17 : vector<64x1xf32> to vector<64x3xf32>
    %19 = arith.subf %15, %18 : vector<64x3xf32>
    %20 = math.exp %19 : vector<64x3xf32>
    %cst_15 = arith.constant dense<0.000000e+00> : vector<64xf32>
    %21 = vector.multi_reduction <add>, %20, %cst_15 [1] : vector<64x3xf32> to vector<64xf32>
    %22 = vector.shape_cast %21 : vector<64xf32> to vector<64x1xf32>
    %23 = tpu.reciprocal %22 {approx = true} : vector<64x1xf32> -> vector<64x1xf32>
    %24 = vector.broadcast %23 : vector<64x1xf32> to vector<64x3xf32>
    %25 = arith.mulf %20, %24 : vector<64x3xf32>
    %26 = vector.extract_strided_slice %14 {offsets = [0, 3], sizes = [64, 3], strides = [1, 1]} : vector<64x9xf32> to vector<64x3xf32>
    %cst_16 = arith.constant dense<0xFF800000> : vector<64xf32>
    %27 = vector.multi_reduction <maximumf>, %26, %cst_16 [1] : vector<64x3xf32> to vector<64xf32>
    %28 = vector.shape_cast %27 : vector<64xf32> to vector<64x1xf32>
    %29 = vector.broadcast %28 : vector<64x1xf32> to vector<64x3xf32>
    %30 = arith.subf %26, %29 : vector<64x3xf32>
    %31 = math.exp %30 : vector<64x3xf32>
    %cst_17 = arith.constant dense<0.000000e+00> : vector<64xf32>
    %32 = vector.multi_reduction <add>, %31, %cst_17 [1] : vector<64x3xf32> to vector<64xf32>
    %33 = vector.shape_cast %32 : vector<64xf32> to vector<64x1xf32>
    %34 = tpu.reciprocal %33 {approx = true} : vector<64x1xf32> -> vector<64x1xf32>
    %35 = vector.broadcast %34 : vector<64x1xf32> to vector<64x3xf32>
    %36 = arith.mulf %31, %35 : vector<64x3xf32>
    %37 = vector.extract_strided_slice %14 {offsets = [0, 6], sizes = [64, 3], strides = [1, 1]} : vector<64x9xf32> to vector<64x3xf32>
    %cst_18 = arith.constant dense<0xFF800000> : vector<64xf32>
    %38 = vector.multi_reduction <maximumf>, %37, %cst_18 [1] : vector<64x3xf32> to vector<64xf32>
    %39 = vector.shape_cast %38 : vector<64xf32> to vector<64x1xf32>
    %40 = vector.broadcast %39 : vector<64x1xf32> to vector<64x3xf32>
    %41 = arith.subf %37, %40 : vector<64x3xf32>
    %42 = math.exp %41 : vector<64x3xf32>
    %cst_19 = arith.constant dense<0.000000e+00> : vector<64xf32>
    %43 = vector.multi_reduction <add>, %42, %cst_19 [1] : vector<64x3xf32> to vector<64xf32>
    %44 = vector.shape_cast %43 : vector<64xf32> to vector<64x1xf32>
    %45 = tpu.reciprocal %44 {approx = true} : vector<64x1xf32> -> vector<64x1xf32>
    %46 = vector.broadcast %45 : vector<64x1xf32> to vector<64x3xf32>
    %47 = arith.mulf %42, %46 : vector<64x3xf32>
    %48 = tpu.concatenate %25, %36, %47 in 1 : vector<64x3xf32>, vector<64x3xf32>, vector<64x3xf32> -> vector<64x9xf32>
    %c0_20 = arith.constant 0 : index
    %c0_21 = arith.constant 0 : index
    %49 = vector.load %arg14[%c0_20, %c0_21] : memref<64x9xf32, #tpu.memory_space<vmem>>, vector<64x9xf32>
    tpu.vector_store %arg14[%c0_20, %c0_21], %48 {strides = array<i32>} : memref<64x9xf32, #tpu.memory_space<vmem>>, vector<64x9xf32>,
    %50 = vector.extract_strided_slice %7 {offsets = [0, 0], sizes = [32, 96], strides = [1, 1]} : vector<64x96xf32> to vector<32x96xf32>
    %cst_22 = arith.constant dense<0.000000e+00> : vector<32x96xf32>
    %51 = tpu.matmul %0, %50, %cst_22 {dimension_numbers = #tpu.dot_dimension_numbers<[1], [0], [0], [1], [0, 0, 1, 1], [], []>} : vector<32x32xf32>, vector<32x96xf32>, vector<32x96xf32> -> vector<32x96xf32>
    %52 = vector.extract_strided_slice %7 {offsets = [32, 0], sizes = [32, 96], strides = [1, 1]} : vector<64x96xf32> to vector<32x96xf32>
    %cst_23 = arith.constant dense<0.000000e+00> : vector<32x96xf32>
    %53 = tpu.matmul %0, %52, %cst_23 {dimension_numbers = #tpu.dot_dimension_numbers<[1], [0], [0], [1], [0, 0, 1, 1], [], []>} : vector<32x32xf32>, vector<32x96xf32>, vector<32x96xf32> -> vector<32x96xf32>
    %54 = tpu.concatenate %51, %53 in 0 : vector<32x96xf32>, vector<32x96xf32> -> vector<64x96xf32>
    %c0_24 = arith.constant 0 : index
    %c0_25 = arith.constant 0 : index
    %c0_26 = arith.constant 0 : index
    %55 = vector.load %arg7[%c0_24, %c0_25, %c0_26] : memref<2x96x96xf32, #tpu.memory_space<vmem>>, vector<1x96x96xf32>
    %56 = vector.shape_cast %55 : vector<1x96x96xf32> to vector<96x96xf32>
    %cst_27 = arith.constant dense<0.000000e+00> : vector<64x96xf32>
    %57 = tpu.matmul %54, %56, %cst_27 {dimension_numbers = #tpu.dot_dimension_numbers<[1], [0], [0], [1], [0, 0, 1, 1], [], []>} : vector<64x96xf32>, vector<96x96xf32>, vector<64x96xf32> -> vector<64x96xf32>
    %c0_28 = arith.constant 0 : index
    %c0_29 = arith.constant 0 : index
    %c0_30 = arith.constant 0 : index
    %58 = vector.load %arg8[%c0_28, %c0_29, %c0_30] : memref<2x1x96xf32, #tpu.memory_space<vmem>>, vector<1x1x96xf32>
    %59 = vector.shape_cast %58 : vector<1x1x96xf32> to vector<1x96xf32>
    %60 = vector.broadcast %59 : vector<1x96xf32> to vector<64x96xf32>
    %61 = arith.addf %57, %60 : vector<64x96xf32>
    %cst_31 = arith.constant 0.000000e+00 : f32
    %62 = vector.broadcast %cst_31 : f32 to vector<64x96xf32>
    %63 = arith.maximumf %61, %62 : vector<64x96xf32>
    %64 = vector.extract_strided_slice %25 {offsets = [0, 0], sizes = [64, 1], strides = [1, 1]} : vector<64x3xf32> to vector<64x1xf32>
    %65 = vector.extract_strided_slice %63 {offsets = [0, 0], sizes = [64, 32], strides = [1, 1]} : vector<64x96xf32> to vector<64x32xf32>
    %66 = vector.broadcast %64 : vector<64x1xf32> to vector<64x32xf32>
    %67 = arith.mulf %66, %65 : vector<64x32xf32>
    %68 = vector.extract_strided_slice %25 {offsets = [0, 1], sizes = [64, 1], strides = [1, 1]} : vector<64x3xf32> to vector<64x1xf32>
    %69 = vector.extract_strided_slice %63 {offsets = [0, 32], sizes = [64, 32], strides = [1, 1]} : vector<64x96xf32> to vector<64x32xf32>
    %70 = vector.broadcast %68 : vector<64x1xf32> to vector<64x32xf32>
    %71 = arith.mulf %70, %69 : vector<64x32xf32>
    %72 = arith.addf %67, %71 : vector<64x32xf32>
    %73 = vector.extract_strided_slice %25 {offsets = [0, 2], sizes = [64, 1], strides = [1, 1]} : vector<64x3xf32> to vector<64x1xf32>
    %74 = vector.extract_strided_slice %63 {offsets = [0, 64], sizes = [64, 32], strides = [1, 1]} : vector<64x96xf32> to vector<64x32xf32>
    %75 = vector.broadcast %73 : vector<64x1xf32> to vector<64x32xf32>
    %76 = arith.mulf %75, %74 : vector<64x32xf32>
    %77 = arith.addf %72, %76 : vector<64x32xf32>
    %78 = vector.extract_strided_slice %36 {offsets = [0, 0], sizes = [64, 1], strides = [1, 1]} : vector<64x3xf32> to vector<64x1xf32>
    %79 = vector.extract_strided_slice %63 {offsets = [0, 0], sizes = [64, 32], strides = [1, 1]} : vector<64x96xf32> to vector<64x32xf32>
    %80 = vector.broadcast %78 : vector<64x1xf32> to vector<64x32xf32>
    %81 = arith.mulf %80, %79 : vector<64x32xf32>
    %82 = vector.extract_strided_slice %36 {offsets = [0, 1], sizes = [64, 1], strides = [1, 1]} : vector<64x3xf32> to vector<64x1xf32>
    %83 = vector.extract_strided_slice %63 {offsets = [0, 32], sizes = [64, 32], strides = [1, 1]} : vector<64x96xf32> to vector<64x32xf32>
    %84 = vector.broadcast %82 : vector<64x1xf32> to vector<64x32xf32>
    %85 = arith.mulf %84, %83 : vector<64x32xf32>
    %86 = arith.addf %81, %85 : vector<64x32xf32>
    %87 = vector.extract_strided_slice %36 {offsets = [0, 2], sizes = [64, 1], strides = [1, 1]} : vector<64x3xf32> to vector<64x1xf32>
    %88 = vector.extract_strided_slice %63 {offsets = [0, 64], sizes = [64, 32], strides = [1, 1]} : vector<64x96xf32> to vector<64x32xf32>
    %89 = vector.broadcast %87 : vector<64x1xf32> to vector<64x32xf32>
    %90 = arith.mulf %89, %88 : vector<64x32xf32>
    %91 = arith.addf %86, %90 : vector<64x32xf32>
    %92 = vector.extract_strided_slice %47 {offsets = [0, 0], sizes = [64, 1], strides = [1, 1]} : vector<64x3xf32> to vector<64x1xf32>
    %93 = vector.extract_strided_slice %63 {offsets = [0, 0], sizes = [64, 32], strides = [1, 1]} : vector<64x96xf32> to vector<64x32xf32>
    %94 = vector.broadcast %92 : vector<64x1xf32> to vector<64x32xf32>
    %95 = arith.mulf %94, %93 : vector<64x32xf32>
    %96 = vector.extract_strided_slice %47 {offsets = [0, 1], sizes = [64, 1], strides = [1, 1]} : vector<64x3xf32> to vector<64x1xf32>
    %97 = vector.extract_strided_slice %63 {offsets = [0, 32], sizes = [64, 32], strides = [1, 1]} : vector<64x96xf32> to vector<64x32xf32>
    %98 = vector.broadcast %96 : vector<64x1xf32> to vector<64x32xf32>
    %99 = arith.mulf %98, %97 : vector<64x32xf32>
    %100 = arith.addf %95, %99 : vector<64x32xf32>
    %101 = vector.extract_strided_slice %47 {offsets = [0, 2], sizes = [64, 1], strides = [1, 1]} : vector<64x3xf32> to vector<64x1xf32>
    %102 = vector.extract_strided_slice %63 {offsets = [0, 64], sizes = [64, 32], strides = [1, 1]} : vector<64x96xf32> to vector<64x32xf32>
    %103 = vector.broadcast %101 : vector<64x1xf32> to vector<64x32xf32>
    %104 = arith.mulf %103, %102 : vector<64x32xf32>
    %105 = arith.addf %100, %104 : vector<64x32xf32>
    %106 = tpu.concatenate %77, %91, %105 in 1 : vector<64x32xf32>, vector<64x32xf32>, vector<64x32xf32> -> vector<64x96xf32>
    %c1 = arith.constant 1 : index
    %c0_32 = arith.constant 0 : index
    %c0_33 = arith.constant 0 : index
    %107 = vector.load %arg5[%c1, %c0_32, %c0_33] : memref<2x96x9xf32, #tpu.memory_space<vmem>>, vector<1x96x9xf32>
    %108 = vector.shape_cast %107 : vector<1x96x9xf32> to vector<96x9xf32>
    %cst_34 = arith.constant dense<0.000000e+00> : vector<64x9xf32>
    %109 = tpu.matmul %106, %108, %cst_34 {dimension_numbers = #tpu.dot_dimension_numbers<[1], [0], [0], [1], [0, 0, 1, 1], [], []>} : vector<64x96xf32>, vector<96x9xf32>, vector<64x9xf32> -> vector<64x9xf32>
    %c1_35 = arith.constant 1 : index
    %c0_36 = arith.constant 0 : index
    %c0_37 = arith.constant 0 : index
    %110 = vector.load %arg6[%c1_35, %c0_36, %c0_37] : memref<2x1x9xf32, #tpu.memory_space<vmem>>, vector<1x1x9xf32>
    %111 = vector.shape_cast %110 : vector<1x1x9xf32> to vector<1x9xf32>
    %112 = vector.broadcast %111 : vector<1x9xf32> to vector<64x9xf32>
    %113 = arith.addf %109, %112 : vector<64x9xf32>
    %114 = vector.extract_strided_slice %113 {offsets = [0, 0], sizes = [64, 3], strides = [1, 1]} : vector<64x9xf32> to vector<64x3xf32>
    %cst_38 = arith.constant dense<0xFF800000> : vector<64xf32>
    %115 = vector.multi_reduction <maximumf>, %114, %cst_38 [1] : vector<64x3xf32> to vector<64xf32>
    %116 = vector.shape_cast %115 : vector<64xf32> to vector<64x1xf32>
    %117 = vector.broadcast %116 : vector<64x1xf32> to vector<64x3xf32>
    %118 = arith.subf %114, %117 : vector<64x3xf32>
    %119 = math.exp %118 : vector<64x3xf32>
    %cst_39 = arith.constant dense<0.000000e+00> : vector<64xf32>
    %120 = vector.multi_reduction <add>, %119, %cst_39 [1] : vector<64x3xf32> to vector<64xf32>
    %121 = vector.shape_cast %120 : vector<64xf32> to vector<64x1xf32>
    %122 = tpu.reciprocal %121 {approx = true} : vector<64x1xf32> -> vector<64x1xf32>
    %123 = vector.broadcast %122 : vector<64x1xf32> to vector<64x3xf32>
    %124 = arith.mulf %119, %123 : vector<64x3xf32>
    %125 = vector.extract_strided_slice %113 {offsets = [0, 3], sizes = [64, 3], strides = [1, 1]} : vector<64x9xf32> to vector<64x3xf32>
    %cst_40 = arith.constant dense<0xFF800000> : vector<64xf32>
    %126 = vector.multi_reduction <maximumf>, %125, %cst_40 [1] : vector<64x3xf32> to vector<64xf32>
    %127 = vector.shape_cast %126 : vector<64xf32> to vector<64x1xf32>
    %128 = vector.broadcast %127 : vector<64x1xf32> to vector<64x3xf32>
    %129 = arith.subf %125, %128 : vector<64x3xf32>
    %130 = math.exp %129 : vector<64x3xf32>
    %cst_41 = arith.constant dense<0.000000e+00> : vector<64xf32>
    %131 = vector.multi_reduction <add>, %130, %cst_41 [1] : vector<64x3xf32> to vector<64xf32>
    %132 = vector.shape_cast %131 : vector<64xf32> to vector<64x1xf32>
    %133 = tpu.reciprocal %132 {approx = true} : vector<64x1xf32> -> vector<64x1xf32>
    %134 = vector.broadcast %133 : vector<64x1xf32> to vector<64x3xf32>
    %135 = arith.mulf %130, %134 : vector<64x3xf32>
    %136 = vector.extract_strided_slice %113 {offsets = [0, 6], sizes = [64, 3], strides = [1, 1]} : vector<64x9xf32> to vector<64x3xf32>
    %cst_42 = arith.constant dense<0xFF800000> : vector<64xf32>
    %137 = vector.multi_reduction <maximumf>, %136, %cst_42 [1] : vector<64x3xf32> to vector<64xf32>
    %138 = vector.shape_cast %137 : vector<64xf32> to vector<64x1xf32>
    %139 = vector.broadcast %138 : vector<64x1xf32> to vector<64x3xf32>
    %140 = arith.subf %136, %139 : vector<64x3xf32>
    %141 = math.exp %140 : vector<64x3xf32>
    %cst_43 = arith.constant dense<0.000000e+00> : vector<64xf32>
    %142 = vector.multi_reduction <add>, %141, %cst_43 [1] : vector<64x3xf32> to vector<64xf32>
    %143 = vector.shape_cast %142 : vector<64xf32> to vector<64x1xf32>
    %144 = tpu.reciprocal %143 {approx = true} : vector<64x1xf32> -> vector<64x1xf32>
    %145 = vector.broadcast %144 : vector<64x1xf32> to vector<64x3xf32>
    %146 = arith.mulf %141, %145 : vector<64x3xf32>
    %147 = arith.addf %124, %135 : vector<64x3xf32>
    %148 = arith.addf %147, %146 : vector<64x3xf32>
    %cst_44 = arith.constant 0.333333343 : f32
    %149 = vector.broadcast %cst_44 : f32 to vector<64x3xf32>
    %150 = arith.mulf %148, %149 : vector<64x3xf32>
    %c0_45 = arith.constant 0 : index
    %c0_46 = arith.constant 0 : index
    %151 = vector.load %arg15[%c0_45, %c0_46] : memref<64x3xf32, #tpu.memory_space<vmem>>, vector<64x3xf32>
    tpu.vector_store %arg15[%c0_45, %c0_46], %150 {strides = array<i32>} : memref<64x3xf32, #tpu.memory_space<vmem>>, vector<64x3xf32>,
    %152 = vector.extract_strided_slice %106 {offsets = [0, 0], sizes = [32, 96], strides = [1, 1]} : vector<64x96xf32> to vector<32x96xf32>
    %cst_47 = arith.constant dense<0.000000e+00> : vector<32x96xf32>
    %153 = tpu.matmul %0, %152, %cst_47 {dimension_numbers = #tpu.dot_dimension_numbers<[1], [0], [0], [1], [0, 0, 1, 1], [], []>} : vector<32x32xf32>, vector<32x96xf32>, vector<32x96xf32> -> vector<32x96xf32>
    %154 = vector.extract_strided_slice %106 {offsets = [32, 0], sizes = [32, 96], strides = [1, 1]} : vector<64x96xf32> to vector<32x96xf32>
    %cst_48 = arith.constant dense<0.000000e+00> : vector<32x96xf32>
    %155 = tpu.matmul %0, %154, %cst_48 {dimension_numbers = #tpu.dot_dimension_numbers<[1], [0], [0], [1], [0, 0, 1, 1], [], []>} : vector<32x32xf32>, vector<32x96xf32>, vector<32x96xf32> -> vector<32x96xf32>
    %156 = tpu.concatenate %153, %155 in 0 : vector<32x96xf32>, vector<32x96xf32> -> vector<64x96xf32>
    %c1_49 = arith.constant 1 : index
    %c0_50 = arith.constant 0 : index
    %c0_51 = arith.constant 0 : index
    %157 = vector.load %arg7[%c1_49, %c0_50, %c0_51] : memref<2x96x96xf32, #tpu.memory_space<vmem>>, vector<1x96x96xf32>
    %158 = vector.shape_cast %157 : vector<1x96x96xf32> to vector<96x96xf32>
    %cst_52 = arith.constant dense<0.000000e+00> : vector<64x96xf32>
    %159 = tpu.matmul %156, %158, %cst_52 {dimension_numbers = #tpu.dot_dimension_numbers<[1], [0], [0], [1], [0, 0, 1, 1], [], []>} : vector<64x96xf32>, vector<96x96xf32>, vector<64x96xf32> -> vector<64x96xf32>
    %c1_53 = arith.constant 1 : index
    %c0_54 = arith.constant 0 : index
    %c0_55 = arith.constant 0 : index
    %160 = vector.load %arg8[%c1_53, %c0_54, %c0_55] : memref<2x1x96xf32, #tpu.memory_space<vmem>>, vector<1x1x96xf32>
    %161 = vector.shape_cast %160 : vector<1x1x96xf32> to vector<1x96xf32>
    %162 = vector.broadcast %161 : vector<1x96xf32> to vector<64x96xf32>
    %163 = arith.addf %159, %162 : vector<64x96xf32>
    %cst_56 = arith.constant 0.000000e+00 : f32
    %164 = vector.broadcast %cst_56 : f32 to vector<64x96xf32>
    %165 = arith.maximumf %163, %164 : vector<64x96xf32>
    %166 = vector.extract_strided_slice %150 {offsets = [0, 0], sizes = [64, 1], strides = [1, 1]} : vector<64x3xf32> to vector<64x1xf32>
    %167 = vector.extract_strided_slice %165 {offsets = [0, 0], sizes = [64, 32], strides = [1, 1]} : vector<64x96xf32> to vector<64x32xf32>
    %168 = vector.broadcast %166 : vector<64x1xf32> to vector<64x32xf32>
    %169 = arith.mulf %168, %167 : vector<64x32xf32>
    %170 = vector.extract_strided_slice %150 {offsets = [0, 1], sizes = [64, 1], strides = [1, 1]} : vector<64x3xf32> to vector<64x1xf32>
    %171 = vector.extract_strided_slice %165 {offsets = [0, 32], sizes = [64, 32], strides = [1, 1]} : vector<64x96xf32> to vector<64x32xf32>
    %172 = vector.broadcast %170 : vector<64x1xf32> to vector<64x32xf32>
    %173 = arith.mulf %172, %171 : vector<64x32xf32>
    %174 = arith.addf %169, %173 : vector<64x32xf32>
    %175 = vector.extract_strided_slice %150 {offsets = [0, 2], sizes = [64, 1], strides = [1, 1]} : vector<64x3xf32> to vector<64x1xf32>
    %176 = vector.extract_strided_slice %165 {offsets = [0, 64], sizes = [64, 32], strides = [1, 1]} : vector<64x96xf32> to vector<64x32xf32>
    %177 = vector.broadcast %175 : vector<64x1xf32> to vector<64x32xf32>
    %178 = arith.mulf %177, %176 : vector<64x32xf32>
    %179 = arith.addf %174, %178 : vector<64x32xf32>
    %cst_57 = arith.constant dense<0.000000e+00> : vector<64xf32>
    %180 = vector.multi_reduction <add>, %179, %cst_57 [1] : vector<64x32xf32> to vector<64xf32>
    %181 = vector.shape_cast %180 : vector<64xf32> to vector<64x1xf32>
    %cst_58 = arith.constant 3.200000e+01 : f32
    %182 = vector.broadcast %cst_58 : f32 to vector<64x1xf32>
    %183 = arith.divf %181, %182 : vector<64x1xf32>
    %184 = vector.broadcast %183 : vector<64x1xf32> to vector<64x32xf32>
    %185 = arith.subf %179, %184 : vector<64x32xf32>
    %186 = arith.mulf %185, %185 : vector<64x32xf32>
    %cst_59 = arith.constant dense<0.000000e+00> : vector<64xf32>
    %187 = vector.multi_reduction <add>, %186, %cst_59 [1] : vector<64x32xf32> to vector<64xf32>
    %188 = vector.shape_cast %187 : vector<64xf32> to vector<64x1xf32>
    %cst_60 = arith.constant 3.200000e+01 : f32
    %189 = vector.broadcast %cst_60 : f32 to vector<64x1xf32>
    %190 = arith.divf %188, %189 : vector<64x1xf32>
    %cst_61 = arith.constant 9.99999993E-9 : f32
    %191 = vector.broadcast %cst_61 : f32 to vector<64x1xf32>
    %192 = arith.addf %190, %191 : vector<64x1xf32>
    %193 = math.rsqrt %192 : vector<64x1xf32>
    %194 = vector.broadcast %193 : vector<64x1xf32> to vector<64x32xf32>
    %195 = arith.mulf %185, %194 : vector<64x32xf32>
    %c0_62 = arith.constant 0 : index
    %c0_63 = arith.constant 0 : index
    %196 = vector.load %arg9[%c0_62, %c0_63] : memref<1x32xf32, #tpu.memory_space<vmem>>, vector<1x32xf32>
    %197 = vector.broadcast %196 : vector<1x32xf32> to vector<64x32xf32>
    %198 = arith.mulf %195, %197 : vector<64x32xf32>
    %c0_64 = arith.constant 0 : index
    %c0_65 = arith.constant 0 : index
    %199 = vector.load %arg10[%c0_64, %c0_65] : memref<1x32xf32, #tpu.memory_space<vmem>>, vector<1x32xf32>
    %200 = vector.broadcast %199 : vector<1x32xf32> to vector<64x32xf32>
    %201 = arith.addf %198, %200 : vector<64x32xf32>
    %c0_66 = arith.constant 0 : index
    %c0_67 = arith.constant 0 : index
    %202 = vector.load %arg11[%c0_66, %c0_67] : memref<32x128xf32, #tpu.memory_space<vmem>>, vector<32x128xf32>
    %cst_68 = arith.constant dense<0.000000e+00> : vector<64x128xf32>
    %203 = tpu.matmul %201, %202, %cst_68 {dimension_numbers = #tpu.dot_dimension_numbers<[1], [0], [0], [1], [0, 0, 1, 1], [], []>} : vector<64x32xf32>, vector<32x128xf32>, vector<64x128xf32> -> vector<64x128xf32>
    %c0_69 = arith.constant 0 : index
    %c0_70 = arith.constant 0 : index
    %204 = vector.load %arg12[%c0_69, %c0_70] : memref<1x128xf32, #tpu.memory_space<vmem>>, vector<1x128xf32>
    %205 = vector.broadcast %204 : vector<1x128xf32> to vector<64x128xf32>
    %206 = arith.addf %203, %205 : vector<64x128xf32>
    %cst_71 = arith.constant 0.000000e+00 : f32
    %207 = vector.broadcast %cst_71 : f32 to vector<64x128xf32>
    %208 = arith.maximumf %206, %207 : vector<64x128xf32>
    %c0_72 = arith.constant 0 : index
    %c0_73 = arith.constant 0 : index
    %209 = vector.load %arg13[%c0_72, %c0_73] : memref<64x128xf32, #tpu.memory_space<vmem>>, vector<64x128xf32>
    tpu.vector_store %arg13[%c0_72, %c0_73], %208 {strides = array<i32>} : memref<64x128xf32, #tpu.memory_space<vmem>>, vector<64x128xf32>,
    return
  }
  func.func @transform_0(%arg0: i32) -> (i32, i32) {
    %c0_i32 = arith.constant 0 : i32
    %c0_i32_0 = arith.constant 0 : i32
    return %arg0, %c0_i32 : i32, i32
  }
  func.func @transform_1(%arg0: i32) -> (i32, i32) {
    %c0_i32 = arith.constant 0 : i32
    %c0_i32_0 = arith.constant 0 : i32
    %c0_i32_1 = arith.constant 0 : i32
    return %c0_i32, %c0_i32_0 : i32, i32
  }
  func.func @transform_2(%arg0: i32) -> (i32, i32) {
    %c0_i32 = arith.constant 0 : i32
    %c0_i32_0 = arith.constant 0 : i32
    %c0_i32_1 = arith.constant 0 : i32
    return %c0_i32, %c0_i32_0 : i32, i32
  }
  func.func @transform_3(%arg0: i32) -> (i32, i32) {
    %c0_i32 = arith.constant 0 : i32
    %c0_i32_0 = arith.constant 0 : i32
    %c0_i32_1 = arith.constant 0 : i32
    return %c0_i32, %c0_i32_0 : i32, i32
  }
  func.func @transform_4(%arg0: i32) -> (i32, i32, i32) {
    %c0_i32 = arith.constant 0 : i32
    %c0_i32_0 = arith.constant 0 : i32
    %c0_i32_1 = arith.constant 0 : i32
    %c0_i32_2 = arith.constant 0 : i32
    return %c0_i32, %c0_i32_0, %c0_i32_1 : i32, i32, i32
  }
  func.func @transform_5(%arg0: i32) -> (i32, i32, i32) {
    %c0_i32 = arith.constant 0 : i32
    %c0_i32_0 = arith.constant 0 : i32
    %c0_i32_1 = arith.constant 0 : i32
    %c0_i32_2 = arith.constant 0 : i32
    return %c0_i32, %c0_i32_0, %c0_i32_1 : i32, i32, i32
  }
  func.func @transform_6(%arg0: i32) -> (i32, i32, i32) {
    %c0_i32 = arith.constant 0 : i32
    %c0_i32_0 = arith.constant 0 : i32
    %c0_i32_1 = arith.constant 0 : i32
    %c0_i32_2 = arith.constant 0 : i32
    return %c0_i32, %c0_i32_0, %c0_i32_1 : i32, i32, i32
  }
  func.func @transform_7(%arg0: i32) -> (i32, i32, i32) {
    %c0_i32 = arith.constant 0 : i32
    %c0_i32_0 = arith.constant 0 : i32
    %c0_i32_1 = arith.constant 0 : i32
    %c0_i32_2 = arith.constant 0 : i32
    return %c0_i32, %c0_i32_0, %c0_i32_1 : i32, i32, i32
  }
  func.func @transform_8(%arg0: i32) -> (i32, i32) {
    %c0_i32 = arith.constant 0 : i32
    %c0_i32_0 = arith.constant 0 : i32
    %c0_i32_1 = arith.constant 0 : i32
    return %c0_i32, %c0_i32_0 : i32, i32
  }
  func.func @transform_9(%arg0: i32) -> (i32, i32) {
    %c0_i32 = arith.constant 0 : i32
    %c0_i32_0 = arith.constant 0 : i32
    %c0_i32_1 = arith.constant 0 : i32
    return %c0_i32, %c0_i32_0 : i32, i32
  }
  func.func @transform_10(%arg0: i32) -> (i32, i32) {
    %c0_i32 = arith.constant 0 : i32
    %c0_i32_0 = arith.constant 0 : i32
    %c0_i32_1 = arith.constant 0 : i32
    return %c0_i32, %c0_i32_0 : i32, i32
  }
  func.func @transform_11(%arg0: i32) -> (i32, i32) {
    %c0_i32 = arith.constant 0 : i32
    %c0_i32_0 = arith.constant 0 : i32
    %c0_i32_1 = arith.constant 0 : i32
    return %c0_i32, %c0_i32_0 : i32, i32
  }
  func.func @transform_12(%arg0: i32) -> (i32, i32) {
    %c0_i32 = arith.constant 0 : i32
    %c0_i32_0 = arith.constant 0 : i32
    return %arg0, %c0_i32 : i32, i32
  }
  func.func @transform_13(%arg0: i32) -> (i32, i32) {
    %c0_i32 = arith.constant 0 : i32
    %c0_i32_0 = arith.constant 0 : i32
    return %arg0, %c0_i32 : i32, i32
  }
  func.func @transform_14(%arg0: i32) -> (i32, i32) {
    %c0_i32 = arith.constant 0 : i32
    %c0_i32_0 = arith.constant 0 : i32
    return %arg0, %c0_i32 : i32, i32
  }
}

</mosaic_0001>

<bundles_post_ra>
// kernel: tpu_custom_call.1
= control target key start
LH: loop header
LB: loop body
LE: loop exit
PB: predicated region body
PF: predicated region fallthrough
CT: control target
= control target key end

     0   :  { %vm90_vm0 = vcmask 1043456   ;;  %vm65_vm1 = vcmask 31744   ;;  %s5878_s0 = inlined_call_operand.vmem [shape: f32[64,4], index: 0, kind: input, shape index: {}]   ;;  %s5879_s1 = inlined_call_operand.vmem [shape: f32[4,32], index: 1, kind: input, shape index: {}]   ;;  %s5880_s2 = inlined_call_operand.vmem [shape: f32[1,32], index: 2, kind: input, shape index: {}]   ;;  %s5881_s3 = inlined_call_operand.vmem [shape: f32[32,32], index: 3, kind: input, shape index: {}]   ;;  %s5882_s4 = inlined_call_operand.vmem [shape: f32[2,96,9], index: 4, kind: input, shape index: {}]   ;;  %s5883_s5 = inlined_call_operand.vmem [shape: f32[2,1,9], index: 5, kind: input, shape index: {}]   ;;  %s5884_s6 = inlined_call_operand.vmem [shape: f32[2,96,96], index: 6, kind: input, shape index: {}]   ;;  %s5885_s7 = inlined_call_operand.vmem [shape: f32[2,1,96], index: 7, kind: input, shape index: {}]   ;;  %s5886_s8 = inlined_call_operand.vmem [shape: f32[1,32], index: 8, kind: input, shape index: {}]   ;;  %s5887_s9 = inlined_call_operand.vmem [shape: f32[1,32], index: 9, kind: input, shape index: {}]   ;;  %s5888_s10 = inlined_call_operand.vmem [shape: f32[32,128], index: 10, kind: input, shape index: {}]   ;;  %s5889_s11 = inlined_call_operand.vmem [shape: f32[1,128], index: 11, kind: input, shape index: {}]   ;;  %s5890_s12 = inlined_call_operand.hbm [shape: f32[64,128], index: 12, kind: output, shape index: {0}]   ;;  %s5891_s13 = inlined_call_operand.vmem [shape: f32[64,9], index: 13, kind: output, shape index: {1}]   ;;  %s5892_s14 = inlined_call_operand.vmem [shape: f32[64,3], index: 14, kind: output, shape index: {2}]  }
   0x1   :  { %v57_v0 = vld [vmem:[%s5879_s1] sm:$0xf]  ;;  %v50_v2 = vld [vmem:[%s5878_s0 + $0x8] sm:$0xff]  ;;  %v51_v3 = vld [vmem:[%s5878_s0 + $0x10] sm:$0xff] }
   0x2   :  { %v49_v1 = vld [vmem:[%s5878_s0] sm:$0xff]  ;;  %3478 = vmatprep.subr.msk.mxu1 %vm90_vm0, %v57_v0 }
   0x3   :  { %3480 = vmatprep.mubr.msk.f32.mxu1 %vm65_vm1, %v49_v1  ;;  %3479 = vmatpush3.msk.msra.mxu1 %vm90_vm0, %v57_v0 }
   0x4   :  { %3481 = vmatmul.mubr.msk.f32.vlgmr.msra.gmra.mrb[0].mxu1 %vm65_vm1, %v50_v2 }
   0x5   :  { %20 = vsyncpa [#allocation3], 0  ;;  %3483 = vmatprep.mubr.msk.f32.mxu1 %vm65_vm1, %v51_v3  ;;  %v52_v4 = vld [vmem:[%s5878_s0 + $0x18] sm:$0xff]  ;;  %v53_v5 = vld [vmem:[%s5878_s0 + $0x20] sm:$0xff]  ;;  %s4187_s21 = smov 32   ;;  %vm255_vm2 = vcmask 261120  }
   0x6   :  { %v54_v6 = vld [vmem:[%s5878_s0 + $0x28] sm:$0xff]  ;;  %v55_v7 = vld [vmem:[%s5878_s0 + $0x30] sm:$0xff]  ;;  %v56_v8 = vld [vmem:[%s5878_s0 + $0x38] sm:$0xff]  ;;  %s4186_s0 = smov 64   ;;  %vm264_vm3 = vcmask 523264   ;;  %vm292_vm4 = vcmask 785408  }
   0x7   :  { %v273_v9 = vld [vmem:[%s5882_s4] sm:$0xff]  ;;  %v274_v10 = vld [vmem:[%s5882_s4 + $0x8] sm:$0xff]  ;;  %v275_v11 = vld [vmem:[%s5882_s4 + $0x10] sm:$0xff]  ;;  %vm632_vm5 = vcmask 72752   ;;  %vm511_vm6 = vcmask 48152   ;;  %vm422_vm7 = vcmask 23552  }
   0x8   :  { %3484 = vmatmul.mubr.msk.f32.gmra.mrb[2].mxu1 %vm65_vm1, %v52_v4  ;;  %v3712_v12 = vpack.c.bf16 %v274_v10, %v273_v9  ;;  %v276_v13 = vld [vmem:[%s5882_s4 + $0x18] sm:$0xff]  ;;  %v277_v15 = vld [vmem:[%s5882_s4 + $0x20] sm:$0xff]  ;;  %v278_v16 = vld [vmem:[%s5882_s4 + $0x28] sm:$0xff]  ;;  %s4188_s15 = smov 125   ;;  %s4189_s16 = smov 122   ;;  %vm761_vm8 = vcmask 48128  }
   0x9   :  { %3486 = vmatprep.mubr.msk.f32.mxu1 %vm65_vm1, %v53_v5  ;;  %v3716_v14 = vpack.c.bf16 %v276_v13, %v275_v11  ;;  %v3720_v17 = vpack.c.bf16 %v278_v16, %v277_v15  ;;  %v279_v18 = vld [vmem:[%s5882_s4 + $0x30] sm:$0xff]  ;;  %v280_v19 = vld [vmem:[%s5882_s4 + $0x38] sm:$0xff]  ;;  %v281_v21 = vld [vmem:[%s5882_s4 + $0x40] sm:$0xff]  ;;  %vm770_vm9 = vcmask 72704  }
   0xa   :  { %3713 = vmatprep.subr.bf16.mxu1 %v3712_v12  ;;  %v3724_v20 = vpack.c.bf16 %v280_v19, %v279_v18  ;;  %v282_v22 = vld [vmem:[%s5882_s4 + $0x48] sm:$0xff]  ;;  %v283_v24 = vld [vmem:[%s5882_s4 + $0x50] sm:$0xff]  ;;  %v284_v25 = vld [vmem:[%s5882_s4 + $0x58] sm:$0xff] }
   0xb   :  { %3715 = vmatpush3.bf16.msra.mxu1 %v3712_v12  ;;  %v3728_v23 = vpack.c.bf16 %v282_v22, %v281_v21  ;;  %v3732_v26 = vpack.c.bf16 %v284_v25, %v283_v24  ;;  %v3246_v27 = vld [vmem:[%s5880_s2] ss:$0 sm:$0xff]  ;;  %v4390_v1 = vld [vmem:[%s5881_s3 + $0x8] sm:$0xff] }
   0xc   :  { %3487 = vmatmul.mubr.msk.f32.gmra.mrb[4].mxu1 %vm65_vm1, %v54_v6  ;;  %3717 = vmatprep.subr.bf16.mxu1 %v3716_v14  ;;  %v4361_v39 = vld [vmem:[%s5881_s3] sm:$0xff] }
   0xd   :  { %3489 = vmatprep.mubr.msk.f32.mxu1 %vm65_vm1, %v55_v7  ;;  %3536 = vmatprep.mubr.msk.f32.mxu0 %vm255_vm2, %v4361_v39  ;;  %v3256_v18 = vld [vmem:[%s5883_s5] ss:$0 sm:$0xff] }
   0xf   :  { %3719 = vmatpush3.bf16.msra.mxu1 %v3716_v14 }
  0x10   :  { %3490 = vmatmul.mubr.msk.f32.gmra.mrb[6].mxu1 %vm65_vm1, %v56_v8  ;;  %3721 = vmatprep.subr.bf16.mxu1 %v3720_v17 }
  0x13   :  { %3723 = vmatpush3.bf16.msra.mxu1 %v3720_v17 }
  0x14   :  { %3725 = vmatprep.subr.bf16.mxu1 %v3724_v20 }
  0x17   :  { %3727 = vmatpush3.bf16.msra.mxu1 %v3724_v20 }
  0x18   :  { %3729 = vmatprep.subr.bf16.mxu1 %v3728_v23 }
  0x1b   :  { %3731 = vmatpush3.bf16.msra.mxu1 %v3728_v23 }
  0x1c   :  { %3733 = vmatprep.subr.bf16.mxu1 %v3732_v26 }
  0x1f   :  { %3735 = vmatpush3.bf16.msra.mxu1 %v3732_v26 }
  0xd7   :  { %v3482_v28 = vpop.f32.mrb[0].mxu1 }
  0xd8   :  { %v166_v29 = vadd.f32 %v3482_v28, %v3246_v27  ;;  %v160_v30 = vpop.f32.mrb[1].mxu1 }
  0xd9   :  { %v161_v32 = vadd.f32 %v3246_v27, %v160_v30 }
  0xda   :  { %233 = vrot.lane.b32.xlu1 %v166_v29, %s4186_s0  ;;  %209 = vrot.lane.b32.xlu0 %v166_v29, %s4187_s21 }
  0xdb   :  { %v3485_v31 = vpop.f32.mrb[2].mxu1 }
  0xdc   :  { %v170_v33 = vpop.f32.mrb[3].mxu1  ;;  %v176_v34 = vadd.f32 %v3485_v31, %v3246_v27 }
  0xdd   :  { %v171_v35 = vadd.f32 %v3246_v27, %v170_v33 }
  0xde   :  { %231 = vrot.lane.b32.xlu1 %v161_v32, %s4186_s0  ;;  %207 = vrot.lane.b32.xlu0 %v161_v32, %s4187_s21 }
  0xdf   :  { %v3488_v36 = vpop.f32.mrb[4].mxu1 }
  0xe0   :  { %v180_v37 = vpop.f32.mrb[5].mxu1  ;;  %v186_v41 = vadd.f32 %v3488_v36, %v3246_v27 }
  0xe1   :  { %v181_v42 = vadd.f32 %v3246_v27, %v180_v37 }
  0xe2   :  { %213 = vrot.lane.b32.xlu1 %v176_v34, %s4187_s21  ;;  %211 = vrot.lane.b32.xlu0 %v171_v35, %s4187_s21 }
  0xe3   :  { %v3491_v38 = vpop.f32.mrb[6].mxu1 }
  0xe4   :  { %v190_v40 = vpop.f32.mrb[7].mxu1  ;;  %v196_v43 = vadd.f32 %v3491_v38, %v3246_v27 }
  0xe5   :  { %v191_v44 = vadd.f32 %v3246_v27, %v190_v40 }
  0xe6   :  { %237 = vrot.lane.b32.xlu1 %v176_v34, %s4186_s0  ;;  %235 = vrot.lane.b32.xlu0 %v171_v35, %s4186_s0 }
  0xea   :  { %217 = vrot.lane.b32.xlu1 %v186_v41, %s4187_s21  ;;  %215 = vrot.lane.b32.xlu0 %v181_v42, %s4187_s21 }
  0xee   :  { %241 = vrot.lane.b32.xlu1 %v186_v41, %s4186_s0  ;;  %239 = vrot.lane.b32.xlu0 %v181_v42, %s4186_s0 }
  0xf2   :  { %221 = vrot.lane.b32.xlu1 %v196_v43, %s4187_s21  ;;  %219 = vrot.lane.b32.xlu0 %v191_v44, %s4187_s21 }
  0xf6   :  { %245 = vrot.lane.b32.xlu1 %v196_v43, %s4186_s0  ;;  %243 = vrot.lane.b32.xlu0 %v191_v44, %s4186_s0 }
 0x14c   :  { %v234_v45 = vpop.permute.xlu1 %233  ;;  %v210_v46 = vpop.permute.xlu0 %209 }
 0x14d   :  { %v257_v47 = vsel %vm255_vm2, %v166_v29, %v210_v46 }
 0x14e   :  { %v266_v51 = vsel %vm264_vm3, %v257_v47, %v234_v45 }
 0x150   :  { %v232_v48 = vpop.permute.xlu1 %231  ;;  %v208_v49 = vpop.permute.xlu0 %207 }
 0x151   :  { %v256_v50 = vsel %vm255_vm2, %v161_v32, %v208_v49 }
 0x152   :  { %v265_v52 = vsel %vm264_vm3, %v256_v50, %v232_v48 }
 0x153   :  { %3516 = vmatprep.mubr.msk.f32.mxu1 %vm292_vm4, %v265_v52  ;;  %v3736_v53 = vpack.c.bf16 %v266_v51, %v265_v52 }
 0x154   :  { %v214_v54 = vpop.permute.xlu1 %213  ;;  %3517 = vmatmul.mubr.msk.f32.vlgmr.msra.gmra.mrb[8].mxu1 %vm292_vm4, %v266_v51  ;;  %v212_v55 = vpop.permute.xlu0 %211 }
 0x155   :  { %3737 = vmatprep.subr.bf16.mxu0 %v3736_v53  ;;  %v259_v56 = vsel %vm255_vm2, %v176_v34, %v214_v54  ;;  %v258_v57 = vsel %vm255_vm2, %v171_v35, %v212_v55 }
 0x156   :  { %3739 = vmatpush3.bf16.msra.mxu0 %v3736_v53 }
 0x158   :  { %v238_v58 = vpop.permute.xlu1 %237  ;;  %v236_v59 = vpop.permute.xlu0 %235 }
 0x159   :  { %v268_v60 = vsel %vm264_vm3, %v259_v56, %v238_v58  ;;  %v267_v61 = vsel %vm264_vm3, %v258_v57, %v236_v59 }
 0x15a   :  { %v3740_v62 = vpack.c.bf16 %v268_v60, %v267_v61  ;;  %3519 = vmatprep.mubr.msk.f32.mxu1 %vm292_vm4, %v267_v61  ;;  %v48_v61 = vld [vmem:[%s5881_s3 + $0x18] sm:$0xff] }
 0x15b   :  { %3520 = vmatmul.mubr.msk.f32.gmra.mrb[10].mxu1 %vm292_vm4, %v268_v60  ;;  %v47_v60 = vld [vmem:[%s5881_s3 + $0x10] sm:$0xff] }
 0x15c   :  { %v218_v63 = vpop.permute.xlu1 %217  ;;  %3741 = vmatprep.subr.bf16.mxu0 %v3740_v62  ;;  %v216_v0 = vpop.permute.xlu0 %215 }
 0x15d   :  { %3743 = vmatpush3.bf16.msra.mxu0 %v3740_v62  ;;  %v261_v2 = vsel %vm255_vm2, %v186_v41, %v218_v63  ;;  %v260_v3 = vsel %vm255_vm2, %v181_v42, %v216_v0 }
 0x160   :  { %v242_v4 = vpop.permute.xlu1 %241  ;;  %v240_v5 = vpop.permute.xlu0 %239  ;;  %3537 = vmatmul.mubr.msk.f32.vlgmr.msra.gmra.mrb[0].mxu0 %vm255_vm2, %v4390_v1 }
 0x161   :  { %v270_v6 = vsel %vm264_vm3, %v261_v2, %v242_v4  ;;  %v269_v7 = vsel %vm264_vm3, %v260_v3, %v240_v5  ;;  %3539 = vmatprep.mubr.msk.f32.mxu0 %vm255_vm2, %v47_v60 }
 0x162   :  { %v3744_v8 = vpack.c.bf16 %v270_v6, %v269_v7  ;;  %3522 = vmatprep.mubr.msk.f32.mxu1 %vm292_vm4, %v269_v7 }
 0x163   :  { %3523 = vmatmul.mubr.msk.f32.gmra.mrb[12].mxu1 %vm292_vm4, %v270_v6 }
 0x164   :  { %v222_v9 = vpop.permute.xlu1 %221  ;;  %3745 = vmatprep.subr.bf16.mxu0 %v3744_v8  ;;  %v220_v10 = vpop.permute.xlu0 %219  ;;  %3540 = vmatmul.mubr.msk.f32.gmra.mrb[2].mxu0 %vm255_vm2, %v48_v61 }
 0x165   :  { %3747 = vmatpush3.bf16.msra.mxu0 %v3744_v8  ;;  %v263_v11 = vsel %vm255_vm2, %v196_v43, %v222_v9  ;;  %v262_v12 = vsel %vm255_vm2, %v191_v44, %v220_v10  ;;  %3550 = vmatprep.mubr.msk.f32.mxu0 %vm255_vm2, %v4361_v39 }
 0x168   :  { %v246_v13 = vpop.permute.xlu1 %245  ;;  %v244_v14 = vpop.permute.xlu0 %243 }
 0x169   :  { %v272_v15 = vsel %vm264_vm3, %v263_v11, %v246_v13  ;;  %v271_v16 = vsel %vm264_vm3, %v262_v12, %v244_v14 }
 0x16a   :  { %v3748_v17 = vpack.c.bf16 %v272_v15, %v271_v16  ;;  %3525 = vmatprep.mubr.msk.f32.mxu1 %vm292_vm4, %v271_v16 }
 0x16b   :  { %3526 = vmatmul.mubr.msk.f32.gmra.mrb[14].mxu1 %vm292_vm4, %v272_v15 }
 0x16c   :  { %3749 = vmatprep.subr.bf16.mxu0 %v3748_v17 }
 0x16d   :  { %3751 = vmatpush3.bf16.msra.mxu0 %v3748_v17 }
 0x170   :  { %3551 = vmatmul.mubr.msk.f32.vlgmr.msra.gmra.mrb[4].mxu0 %vm255_vm2, %v4390_v1 }
 0x171   :  { %3553 = vmatprep.mubr.msk.f32.mxu0 %vm255_vm2, %v47_v60  ;;  %v968_v60 = vld [vmem:[%s5884_s6 + $0x38] sm:$0xff] }
 0x174   :  { %3554 = vmatmul.mubr.msk.f32.gmra.mrb[6].mxu0 %vm255_vm2, %v48_v61 }
 0x227   :  { %v3518_v19 = vpop.f32.mrb[8].mxu1 }
 0x228   :  { %v4409_v20 = vadd.f32 %v3518_v19, %v3256_v18  ;;  %v383_v21 = vpop.f32.mrb[9].mxu1 }
 0x229   :  { %v4411_v22 = vadd.f32 %v3256_v18, %v383_v21 }
 0x22a   :  { %v636_v23 = vsel %vm632_vm5, %v4409_v20, -inf  ;;  %v515_v24 = vsel %vm511_vm6, %v4409_v20, -inf  ;;  %v426_v26 = vsel %vm422_vm7, %v4409_v20, -inf }
 0x22b   :  { %637 = vmax.xlane.f32.xlu0 %v636_v23  ;;  %516 = vmax.xlane.f32.xlu1 %v515_v24  ;;  %v512_v27 = vsel %vm511_vm6, %v4411_v22, -inf  ;;  %v633_v30 = vsel %vm632_vm5, %v4411_v22, -inf  ;;  %v423_v34 = vsel %vm422_vm7, %v4411_v22, -inf }
 0x22e   :  { %v3521_v25 = vpop.f32.mrb[10].mxu1 }
 0x22f   :  { %427 = vmax.xlane.f32.xlu1 %v426_v26  ;;  %513 = vmax.xlane.f32.xlu0 %v512_v27  ;;  %v393_v28 = vpop.f32.mrb[11].mxu1  ;;  %v4427_v32 = vadd.f32 %v3521_v25, %v3256_v18 }
 0x230   :  { %v4421_v29 = vadd.f32 %v3256_v18, %v393_v28 }
 0x231   :  { %v521_v38 = vsel %vm511_vm6, %v4427_v32, -inf  ;;  %v642_v42 = vsel %vm632_vm5, %v4427_v32, -inf  ;;  %v432_v46 = vsel %vm422_vm7, %v4427_v32, -inf }
 0x232   :  { %v518_v31 = vsel %vm511_vm6, %v4421_v29, -inf  ;;  %v639_v35 = vsel %vm632_vm5, %v4421_v29, -inf  ;;  %v429_v49 = vsel %vm422_vm7, %v4421_v29, -inf }
 0x233   :  { %634 = vmax.xlane.f32.xlu0 %v633_v30  ;;  %519 = vmax.xlane.f32.xlu1 %v518_v31 }
 0x236   :  { %v3524_v33 = vpop.f32.mrb[12].mxu1 }
 0x237   :  { %424 = vmax.xlane.f32.xlu0 %v423_v34  ;;  %640 = vmax.xlane.f32.xlu1 %v639_v35  ;;  %v403_v36 = vpop.f32.mrb[13].mxu1  ;;  %v4449_v48 = vadd.f32 %v3524_v33, %v3256_v18 }
 0x238   :  { %v4433_v37 = vadd.f32 %v3256_v18, %v403_v36 }
 0x239   :  { %v527_v51 = vsel %vm511_vm6, %v4449_v48, -inf  ;;  %v648_v53 = vsel %vm632_vm5, %v4449_v48, -inf  ;;  %v438_v56 = vsel %vm422_vm7, %v4449_v48, -inf }
 0x23a   :  { %v524_v40 = vsel %vm511_vm6, %v4433_v37, -inf  ;;  %v645_v43 = vsel %vm632_vm5, %v4433_v37, -inf  ;;  %v435_v47 = vsel %vm422_vm7, %v4433_v37, -inf }
 0x23b   :  { %522 = vmax.xlane.f32.xlu0 %v521_v38  ;;  %525 = vmax.xlane.f32.xlu1 %v524_v40 }
 0x23e   :  { %v3527_v41 = vpop.f32.mrb[14].mxu1 }
 0x23f   :  { %643 = vmax.xlane.f32.xlu0 %v642_v42  ;;  %646 = vmax.xlane.f32.xlu1 %v645_v43  ;;  %v413_v44 = vpop.f32.mrb[15].mxu1  ;;  %v4463_v55 = vadd.f32 %v3527_v41, %v3256_v18 }
 0x240   :  { %v4443_v45 = vadd.f32 %v3256_v18, %v413_v44 }
 0x241   :  { %v533_v57 = vsel %vm511_vm6, %v4463_v55, -inf  ;;  %v654_v58 = vsel %vm632_vm5, %v4463_v55, -inf  ;;  %v444_v59 = vsel %vm422_vm7, %v4463_v55, -inf }
 0x242   :  { %v530_v50 = vsel %vm511_vm6, %v4443_v45, -inf  ;;  %v651_v52 = vsel %vm632_vm5, %v4443_v45, -inf  ;;  %v441_v54 = vsel %vm422_vm7, %v4443_v45, -inf }
 0x243   :  { %433 = vmax.xlane.f32.xlu0 %v432_v46  ;;  %436 = vmax.xlane.f32.xlu1 %v435_v47  ;;  %v961_v46 = vld [vmem:[%s5884_s6] sm:$0xff]  ;;  %v962_v47 = vld [vmem:[%s5884_s6 + $0x8] sm:$0xff] }
 0x247   :  { %430 = vmax.xlane.f32.xlu0 %v429_v49  ;;  %531 = vmax.xlane.f32.xlu1 %v530_v50  ;;  %v3752_v49 = vpack.c.bf16 %v962_v47, %v961_v46 }
 0x249   :  { %3753 = vmatprep.subr.bf16.mxu1 %v3752_v49 }
 0x24a   :  { %3755 = vmatpush3.bf16.msra.mxu1 %v3752_v49 }
 0x24b   :  { %528 = vmax.xlane.f32.xlu0 %v527_v51  ;;  %652 = vmax.xlane.f32.xlu1 %v651_v52  ;;  %v964_v51 = vld [vmem:[%s5884_s6 + $0x18] sm:$0xff] }
 0x24f   :  { %649 = vmax.xlane.f32.xlu0 %v648_v53  ;;  %442 = vmax.xlane.f32.xlu1 %v441_v54  ;;  %v965_v54 = vld [vmem:[%s5884_s6 + $0x20] sm:$0xff] }
 0x253   :  { %439 = vmax.xlane.f32.xlu0 %v438_v56  ;;  %v966_v56 = vld [vmem:[%s5884_s6 + $0x28] sm:$0xff] }
 0x257   :  { %534 = vmax.xlane.f32.xlu0 %v533_v57  ;;  %v3760_v57 = vpack.c.bf16 %v966_v56, %v965_v54 }
 0x25b   :  { %655 = vmax.xlane.f32.xlu0 %v654_v58 }
 0x25f   :  { %445 = vmax.xlane.f32.xlu0 %v444_v59  ;;  %v967_v59 = vld [vmem:[%s5884_s6 + $0x30] sm:$0xff] }
 0x260   :  { %v3764_v61 = vpack.c.bf16 %v968_v60, %v967_v59 }
 0x2b8   :  { %v517_v62 = vpop.xlane.xlu1 %516  ;;  %v638_v63 = vpop.xlane.xlu0 %637 }
 0x2b9   :  { %v537_v0 = vsub.f32 %v4409_v20, %v517_v62  ;;  %v658_v2 = vsub.f32 %v4409_v20, %v638_v63 }
 0x2bb   :  { %v546_v3 = vmul.f32 1.442695, %v537_v0  ;;  %v667_v4 = vmul.f32 1.442695, %v658_v2  ;;  %v969_v2 = vld [vmem:[%s5884_s6 + $0x40] sm:$0xff] }
 0x2bc   :  { %v514_v5 = vpop.xlane.xlu0 %513  ;;  %v428_v12 = vpop.xlane.xlu1 %427 }
 0x2bd   :  { %3950 = vpow2.f32 %v546_v3  ;;  %v536_v6 = vsub.f32 %v4411_v22, %v514_v5  ;;  %v448_v14 = vsub.f32 %v4409_v20, %v428_v12  ;;  %v970_v3 = vld [vmem:[%s5884_s6 + $0x48] sm:$0xff] }
 0x2be   :  { %3952 = vpow2.f32 %v667_v4  ;;  %v3768_v4 = vpack.c.bf16 %v970_v3, %v969_v2 }
 0x2bf   :  { %v544_v39 = vmul.f32 1.442695, %v536_v6  ;;  %v457_v15 = vmul.f32 1.442695, %v448_v14 }
 0x2c0   :  { %v635_v7 = vpop.xlane.xlu0 %634  ;;  %v520_v21 = vpop.xlane.xlu1 %519 }
 0x2c1   :  { %v657_v1 = vsub.f32 %v4411_v22, %v635_v7  ;;  %3954 = vpow2.f32 %v544_v39  ;;  %v538_v24 = vsub.f32 %v4421_v29, %v520_v21  ;;  %v971_v39 = vld [vmem:[%s5884_s6 + $0x50] sm:$0xff]  ;;  %v972_v7 = vld [vmem:[%s5884_s6 + $0x58] sm:$0xff] }
 0x2c3   :  { %v665_v8 = vmul.f32 1.442695, %v657_v1  ;;  %v548_v25 = vmul.f32 1.442695, %v538_v24  ;;  %v3772_v1 = vpack.c.bf16 %v972_v7, %v971_v39 }
 0x2c4   :  { %v425_v16 = vpop.xlane.xlu0 %424  ;;  %v641_v20 = vpop.xlane.xlu1 %640 }
 0x2c5   :  { %3956 = vpow2.f32 %v665_v8  ;;  %v447_v17 = vsub.f32 %v4411_v22, %v425_v16  ;;  %v659_v26 = vsub.f32 %v4421_v29, %v641_v20 }
 0x2c6   :  { %3958 = vpow2.f32 %v457_v15  ;;  %v3538_v15 = vpop.f32.mrb[0].mxu0 }
 0x2c7   :  { %v4491_v9 = vpop.eup %3950  ;;  %v455_v19 = vmul.f32 1.442695, %v447_v17  ;;  %v669_v22 = vmul.f32 1.442695, %v659_v26  ;;  %v857_v16 = vpop.f32.mrb[1].mxu0 }
 0x2c8   :  { %v4493_v10 = vpop.eup %3952  ;;  %570 = vrot.lane.b32.xlu0 %v4491_v9, %s4188_s15  ;;  %v523_v27 = vpop.xlane.xlu0 %522  ;;  %3580 = vmatprep.mubr.msk.f32.mxu1 %vm292_vm4, %v857_v16  ;;  %v4191_v16 = vmov 1  }
 0x2c9   :  { %691 = vrot.lane.b32.xlu1 %v4493_v10, %s4189_s16  ;;  %3960 = vpow2.f32 %v455_v19  ;;  %v539_v30 = vsub.f32 %v4427_v32, %v523_v27  ;;  %v526_v0 = vpop.xlane.xlu1 %525  ;;  %3865 = vset.pattern.permute.xlu0 %v4191_v16 }
 0x2ca   :  { %3962 = vpow2.f32 %v548_v25  ;;  %v540_v5 = vsub.f32 %v4433_v37, %v526_v0 }
 0x2cb   :  { %v4499_v11 = vpop.eup %3954  ;;  %3964 = vpow2.f32 %v669_v22  ;;  %v550_v34 = vmul.f32 1.442695, %v539_v30  ;;  %v3541_v22 = vpop.f32.mrb[2].mxu0 }
 0x2cc   :  { %v644_v31 = vpop.xlane.xlu0 %643  ;;  %v552_v8 = vmul.f32 1.442695, %v540_v5  ;;  %v867_v30 = vpop.f32.mrb[3].mxu0 }
 0x2cd   :  { %568 = vrot.lane.b32.xlu1 %v4499_v11, %s4188_s15  ;;  %v660_v35 = vsub.f32 %v4427_v32, %v644_v31  ;;  %3966 = vpow2.f32 %v550_v34  ;;  %v647_v6 = vpop.xlane.xlu1 %646 }
 0x2ce   :  { %v661_v12 = vsub.f32 %v4433_v37, %v647_v6 }
 0x2cf   :  { %v4503_v13 = vpop.eup %3956  ;;  %v671_v36 = vmul.f32 1.442695, %v660_v35 }
 0x2d0   :  { %v4509_v18 = vpop.eup %3958  ;;  %v434_v42 = vpop.xlane.xlu0 %433  ;;  %v673_v19 = vmul.f32 1.442695, %v661_v12  ;;  %v4190_v12 = vmov 2  }
 0x2d1   :  { %689 = vrot.lane.b32.xlu1 %v4503_v13, %s4189_s16  ;;  %v474_v23 = vsel %vm422_vm7, %v4509_v18, 0.0  ;;  %3968 = vpow2.f32 %v671_v36  ;;  %v450_v44 = vsub.f32 %v4427_v32, %v434_v42  ;;  %v963_v32 = vld [vmem:[%s5884_s6 + $0x10] sm:$0xff]  ;;  %v3552_v42 = vpop.f32.mrb[4].mxu0 }
 0x2d2   :  { %v3756_v52 = vpack.c.bf16 %v964_v51, %v963_v32  ;;  %3866 = vset.pattern.permute.xlu1 %v4190_v12 }
 0x2d3   :  { %v4515_v28 = vpop.eup %3960  ;;  %v461_v50 = vmul.f32 1.442695, %v450_v44  ;;  %v942_v44 = vpop.f32.mrb[5].mxu0 }
 0x2d4   :  { %v471_v33 = vsel %vm422_vm7, %v4515_v28, 0.0  ;;  %v4521_v38 = vpop.eup %3962  ;;  %v431_v53 = vpop.xlane.xlu0 %430  ;;  %3757 = vmatprep.subr.bf16.mxu1 %v3756_v52 }
 0x2d5   :  { %v4525_v40 = vpop.eup %3964  ;;  %3970 = vpow2.f32 %v461_v50  ;;  %3759 = vmatpush3.bf16.msra.mxu1 %v3756_v52  ;;  %v449_v58 = vsub.f32 %v4421_v29, %v431_v53  ;;  %v3555_v47 = vpop.f32.mrb[6].mxu0 }
 0x2d6   :  { %3761 = vmatprep.subr.bf16.mxu1 %v3760_v57  ;;  %v952_v49 = vpop.f32.mrb[7].mxu0  ;;  %v437_v50 = vpop.xlane.xlu1 %436 }
 0x2d7   :  { %v4529_v41 = vpop.eup %3966  ;;  %v459_v63 = vmul.f32 1.442695, %v449_v58 }
 0x2d8   :  { %v529_v14 = vpop.xlane.xlu0 %528 }
 0x2d9   :  { %3763 = vmatpush3.bf16.msra.mxu1 %v3760_v57  ;;  %3972 = vpow2.f32 %v459_v63  ;;  %v541_v21 = vsub.f32 %v4449_v48, %v529_v14 }
 0x2da   :  { %3765 = vmatprep.subr.bf16.mxu1 %v3764_v61  ;;  %3974 = vpow2.f32 %v552_v8  ;;  %v532_v52 = vpop.xlane.xlu1 %531 }
 0x2db   :  { %v4533_v43 = vpop.eup %3968  ;;  %3976 = vpow2.f32 %v673_v19  ;;  %v554_v20 = vmul.f32 1.442695, %v541_v21  ;;  %v542_v54 = vsub.f32 %v4443_v45, %v532_v52 }
 0x2dd   :  { %3767 = vmatpush3.bf16.msra.mxu1 %v3764_v61  ;;  %3978 = vpow2.f32 %v554_v20  ;;  %v556_v57 = vmul.f32 1.442695, %v542_v54 }
 0x2de   :  { %3769 = vmatprep.subr.bf16.mxu1 %v3768_v4  ;;  %v653_v56 = vpop.xlane.xlu1 %652 }
 0x2df   :  { %v4563_v62 = vpop.eup %3970  ;;  %v663_v58 = vsub.f32 %v4443_v45, %v653_v56 }
 0x2e0   :  { %v480_v29 = vsel %vm422_vm7, %v4563_v62, 0.0 }
 0x2e1   :  { %3771 = vmatpush3.bf16.msra.mxu1 %v3768_v4 }
 0x2e2   :  { %3773 = vmatprep.subr.bf16.mxu1 %v3772_v1  ;;  %v443_v8 = vpop.xlane.xlu1 %442 }
 0x2e3   :  { %v4581_v17 = vpop.eup %3972  ;;  %v453_v21 = vsub.f32 %v4443_v45, %v443_v8 }
 0x2e4   :  { %v477_v24 = vsel %vm422_vm7, %v4581_v17, 0.0  ;;  %v4589_v27 = vpop.eup %3974 }
 0x2e5   :  { %3775 = vmatpush3.bf16.msra.mxu1 %v3772_v1  ;;  %v4594_v31 = vpop.eup %3976 }
 0x2e7   :  { %475 = vadd.xlane.f32.xlu0 %v474_v23  ;;  %v650_v23 = vpop.xlane.xlu0 %649 }
 0x2e8   :  { %3581 = vmatmul.mubr.msk.f32.vlgmr.msra.gmra.mrb[16].mxu1 %vm292_vm4, %v3538_v15  ;;  %v662_v25 = vsub.f32 %v4449_v48, %v650_v23 }
 0x2e9   :  { %3583 = vmatprep.mubr.msk.f32.mxu1 %vm292_vm4, %v867_v30 }
 0x2ea   :  { %v675_v26 = vmul.f32 1.442695, %v662_v25 }
 0x2eb   :  { %v440_v34 = vpop.xlane.xlu0 %439 }
 0x2ec   :  { %3980 = vpow2.f32 %v675_v26  ;;  %3584 = vmatmul.mubr.msk.f32.gmra.mrb[18].mxu1 %vm292_vm4, %v3541_v22  ;;  %v452_v36 = vsub.f32 %v4449_v48, %v440_v34  ;;  %v451_v48 = vsub.f32 %v4433_v37, %v437_v50  ;;  %v677_v37 = vmul.f32 1.442695, %v663_v58 }
 0x2ed   :  { %3586 = vmatprep.mubr.msk.f32.mxu1 %vm292_vm4, %v942_v44 }
 0x2ee   :  { %v465_v46 = vmul.f32 1.442695, %v452_v36  ;;  %v463_v51 = vmul.f32 1.442695, %v451_v48 }
 0x2ef   :  { %v535_v59 = vpop.xlane.xlu0 %534 }
 0x2f0   :  { %3587 = vmatmul.mubr.msk.f32.gmra.mrb[20].mxu1 %vm292_vm4, %v3552_v42  ;;  %3982 = vpow2.f32 %v465_v46  ;;  %v543_v61 = vsub.f32 %v4463_v55, %v535_v59 }
 0x2f1   :  { %3589 = vmatprep.mubr.msk.f32.mxu1 %vm292_vm4, %v952_v49  ;;  %3984 = vpow2.f32 %v463_v51 }
 0x2f2   :  { %3986 = vpow2.f32 %v556_v57 }
 0x2f3   :  { %v656_v63 = vpop.xlane.xlu0 %655  ;;  %3988 = vpow2.f32 %v677_v37 }
 0x2f4   :  { %3590 = vmatmul.mubr.msk.f32.gmra.mrb[22].mxu1 %vm292_vm4, %v3555_v47  ;;  %v664_v2 = vsub.f32 %v4463_v55, %v656_v63 }
 0x2f5   :  { %472 = vadd.xlane.f32.xlu1 %v471_v33  ;;  %v4599_v33 = vpop.eup %3978 }
 0x2f6   :  { %v4603_v35 = vpop.eup %3980  ;;  %v679_v3 = vmul.f32 1.442695, %v664_v2 }
 0x2f7   :  { %v446_v39 = vpop.xlane.xlu0 %445 }
 0x2f8   :  { %v454_v1 = vsub.f32 %v4463_v55, %v446_v39 }
 0x2fa   :  { %v4613_v32 = vpop.eup %3982  ;;  %v469_v14 = vmul.f32 1.442695, %v454_v1 }
 0x2fb   :  { %v486_v53 = vsel %vm422_vm7, %v4613_v32, 0.0  ;;  %v4619_v60 = vpop.eup %3984 }
 0x2fc   :  { %v483_v0 = vsel %vm422_vm7, %v4619_v60, 0.0  ;;  %v4625_v4 = vpop.eup %3986 }
 0x2fd   :  { %572 = vrot.lane.b32.xlu0 %v4521_v38, %s4188_s15  ;;  %v4629_v5 = vpop.eup %3988 }
 0x301   :  { %693 = vrot.lane.b32.xlu0 %v4525_v40, %s4189_s16 }
 0x306   :  { %574 = vrot.lane.b32.xlu1 %v4529_v41, %s4188_s15 }
 0x30a   :  { %695 = vrot.lane.b32.xlu1 %v4533_v43, %s4189_s16 }
 0x320   :  { %481 = vadd.xlane.f32.xlu0 %v480_v29  ;;  %v558_v29 = vmul.f32 1.442695, %v543_v61 }
 0x322   :  { %3990 = vpow2.f32 %v558_v29 }
 0x323   :  { %3992 = vpow2.f32 %v679_v3 }
 0x324   :  { %3994 = vpow2.f32 %v469_v14 }
 0x32c   :  { %v4633_v6 = vpop.eup %3990 }
 0x32d   :  { %v4637_v7 = vpop.eup %3992 }
 0x32e   :  { %478 = vadd.xlane.f32.xlu1 %v477_v24  ;;  %v4645_v23 = vpop.eup %3994  ;;  %v467_v24 = vmul.f32 1.442695, %v453_v21 }
 0x32f   :  { %v492_v20 = vsel %vm422_vm7, %v4645_v23, 0.0 }
 0x330   :  { %3996 = vpow2.f32 %v467_v24 }
 0x336   :  { %576 = vrot.lane.b32.xlu0 %v4589_v27, %s4188_s15 }
 0x33a   :  { %697 = vrot.lane.b32.xlu0 %v4594_v31, %s4189_s16  ;;  %v571_v25 = vpop.permute.xlu0 %570  ;;  %v4651_v36 = vpop.eup %3996 }
 0x33b   :  { %v692_v15 = vpop.permute.xlu1 %691  ;;  %v595_v22 = vsel %vm422_vm7, %v571_v25, 0.0  ;;  %v489_v46 = vsel %vm422_vm7, %v4651_v36, 0.0 }
 0x33c   :  { %v716_v34 = vsel %vm422_vm7, %v692_v15, 0.0 }
 0x33f   :  { %578 = vrot.lane.b32.xlu1 %v4599_v33, %s4188_s15  ;;  %v569_v19 = vpop.permute.xlu1 %568 }
 0x340   :  { %v592_v50 = vsel %vm422_vm7, %v569_v19, 0.0 }
 0x343   :  { %699 = vrot.lane.b32.xlu1 %v4603_v35, %s4189_s16  ;;  %v690_v55 = vpop.permute.xlu1 %689 }
 0x344   :  { %v713_v48 = vsel %vm422_vm7, %v690_v55, 0.0 }
 0x359   :  { %487 = vadd.xlane.f32.xlu0 %v486_v53 }
 0x367   :  { %484 = vadd.xlane.f32.xlu1 %v483_v0 }
 0x36f   :  { %580 = vrot.lane.b32.xlu0 %v4625_v4, %s4188_s15 }
 0x373   :  { %701 = vrot.lane.b32.xlu0 %v4629_v5, %s4189_s16 }
 0x374   :  { %v476_v45 = vpop.xlane.xlu0 %475 }
 0x375   :  { %3998 = vrcp.f32 %v476_v45 }
 0x378   :  { %582 = vrot.lane.b32.xlu1 %v4633_v6, %s4188_s15  ;;  %v573_v49 = vpop.permute.xlu0 %572 }
 0x379   :  { %v598_v52 = vsel %vm422_vm7, %v573_v49, 0.0 }
 0x37c   :  { %703 = vrot.lane.b32.xlu1 %v4637_v7, %s4189_s16  ;;  %v694_v51 = vpop.permute.xlu0 %693 }
 0x37d   :  { %v719_v54 = vsel %vm422_vm7, %v694_v51, 0.0 }
 0x37f   :  { %v3999_v21 = vpop.eup %3998 }
 0x380   :  { %v4672_v25 = vmul.f32 %v3999_v21, %v4509_v18  ;;  %v4687_v18 = vld [vmem:[%s5885_s7] ss:$0 sm:$0xff] }
 0x382   :  { %v473_v26 = vpop.xlane.xlu1 %472 }
 0x383   :  { %4000 = vrcp.f32 %v473_v26 }
 0x386   :  { %v575_v30 = vpop.permute.xlu1 %574 }
 0x387   :  { %v601_v42 = vsel %vm422_vm7, %v575_v30, 0.0 }
 0x38a   :  { %v696_v44 = vpop.permute.xlu1 %695 }
 0x38b   :  { %v722_v47 = vsel %vm422_vm7, %v696_v44, 0.0 }
 0x392   :  { %493 = vadd.xlane.f32.xlu0 %v492_v20 }
 0x396   :  { %596 = vadd.xlane.f32.xlu0 %v595_v22  ;;  %v4001_v22 = vpop.eup %4000 }
 0x397   :  { %v4678_v26 = vmul.f32 %v4001_v22, %v4515_v28 }
 0x39a   :  { %717 = vadd.xlane.f32.xlu0 %v716_v34  ;;  %v4192_v34 = vmov 0  }
 0x39e   :  { %602 = vadd.xlane.f32.xlu0 %v601_v42 }
 0x3a0   :  { %490 = vadd.xlane.f32.xlu1 %v489_v46 }
 0x3a2   :  { %723 = vadd.xlane.f32.xlu0 %v722_v47 }
 0x3a4   :  { %593 = vadd.xlane.f32.xlu1 %v592_v50 }
 0x3a8   :  { %714 = vadd.xlane.f32.xlu1 %v713_v48 }
 0x3ac   :  { %599 = vadd.xlane.f32.xlu1 %v598_v52 }
 0x3ad   :  { %v482_v53 = vpop.xlane.xlu0 %481 }
 0x3ae   :  { %4002 = vrcp.f32 %v482_v53 }
 0x3b0   :  { %720 = vadd.xlane.f32.xlu1 %v719_v54 }
 0x3b1   :  { %v577_v56 = vpop.permute.xlu0 %576 }
 0x3b2   :  { %v604_v57 = vsel %vm422_vm7, %v577_v56, 0.0 }
 0x3b4   :  { %605 = vadd.xlane.f32.xlu1 %v604_v57 }
 0x3b5   :  { %v698_v58 = vpop.permute.xlu0 %697 }
 0x3b6   :  { %v725_v59 = vsel %vm422_vm7, %v698_v58, 0.0 }
 0x3b8   :  { %726 = vadd.xlane.f32.xlu1 %v725_v59  ;;  %v4003_v45 = vpop.eup %4002 }
 0x3b9   :  { %v4693_v28 = vmul.f32 %v4003_v45, %v4563_v62 }
 0x3bb   :  { %v479_v37 = vpop.xlane.xlu1 %478  ;;  %v4669_v20 = vpop.f32.mrb[16].mxu1 }
 0x3bc   :  { %v4675_v30 = vpop.f32.mrb[17].mxu1  ;;  %4004 = vrcp.f32 %v479_v37 }
 0x3bf   :  { %v579_v61 = vpop.permute.xlu1 %578  ;;  %v3585_v42 = vpop.f32.mrb[18].mxu1 }
 0x3c0   :  { %v607_v63 = vsel %vm422_vm7, %v579_v61, 0.0  ;;  %v4690_v44 = vadd.f32 %v3585_v42, %v4687_v18  ;;  %v1080_v46 = vpop.f32.mrb[19].mxu1 }
 0x3c1   :  { %608 = vadd.xlane.f32.xlu0 %v607_v63  ;;  %v4705_v47 = vadd.f32 %v4687_v18, %v1080_v46 }
 0x3c3   :  { %v700_v0 = vpop.permute.xlu1 %699  ;;  %v3588_v48 = vpop.f32.mrb[20].mxu1 }
 0x3c4   :  { %v728_v29 = vsel %vm422_vm7, %v700_v0, 0.0  ;;  %v4718_v53 = vadd.f32 %v3588_v48, %v4687_v18 }
 0x3c5   :  { %729 = vadd.xlane.f32.xlu0 %v728_v29 }
 0x3c6   :  { %v4005_v62 = vpop.eup %4004 }
 0x3c7   :  { %v4709_v49 = vmul.f32 %v4005_v62, %v4581_v17  ;;  %v1090_v17 = vpop.f32.mrb[21].mxu1 }
 0x3c8   :  { %v4722_v56 = vadd.f32 %v4687_v18, %v1090_v17  ;;  %v4194_v17 = vmov 5  }
 0x3e6   :  { %v488_v2 = vpop.xlane.xlu0 %487 }
 0x3ea   :  { %v581_v3 = vpop.permute.xlu0 %580 }
 0x3eb   :  { %v610_v39 = vsel %vm422_vm7, %v581_v3, 0.0  ;;  %v3591_v3 = vpop.f32.mrb[22].mxu1 }
 0x3ec   :  { %611 = vadd.xlane.f32.xlu1 %v610_v39  ;;  %v4751_v39 = vadd.f32 %v3591_v3, %v4687_v18 }
 0x3ee   :  { %v702_v1 = vpop.permute.xlu0 %701 }
 0x3ef   :  { %v731_v8 = vsel %vm422_vm7, %v702_v1, 0.0  ;;  %v1100_v1 = vpop.f32.mrb[23].mxu1 }
 0x3f0   :  { %732 = vadd.xlane.f32.xlu1 %v731_v8 }
 0x3f4   :  { %v485_v14 = vpop.xlane.xlu1 %484 }
 0x3f5   :  { %4006 = vrcp.f32 %v485_v14 }
 0x3f6   :  { %4008 = vrcp.f32 %v488_v2 }
 0x3f8   :  { %v583_v15 = vpop.permute.xlu1 %582 }
 0x3f9   :  { %v613_v19 = vsel %vm422_vm7, %v583_v15, 0.0  ;;  %v4756_v15 = vadd.f32 %v4687_v18, %v1100_v1 }
 0x3fa   :  { %614 = vadd.xlane.f32.xlu0 %v613_v19 }
 0x3fc   :  { %v704_v24 = vpop.permute.xlu1 %703 }
 0x3fd   :  { %v734_v55 = vsel %vm422_vm7, %v704_v24, 0.0 }
 0x3fe   :  { %735 = vadd.xlane.f32.xlu0 %v734_v55 }
 0x3ff   :  { %v4007_v51 = vpop.eup %4006 }
 0x400   :  { %v4009_v54 = vpop.eup %4008  ;;  %v4725_v57 = vmul.f32 %v4007_v51, %v4619_v60 }
 0x401   :  { %1250 = vperm.xlu1 %3866, %v4672_v25   ;;  %v4729_v59 = vmul.f32 %v4009_v54, %v4613_v32 }
 0x405   :  { %3868 = vset.pattern.permute.xlu1 %v4191_v16 }
 0x406   :  { %1166 = vperm.xlu1 %3868, %v4678_v26  }
 0x40a   :  { %3870 = vset.pattern.permute.xlu1 %v4192_v34 }
 0x40b   :  { %1119 = vperm.xlu1 %3870, %v4678_v26  }
 0x40f   :  { %3871 = vset.pattern.permute.xlu1 %v4191_v16 }
 0x410   :  { %1178 = vperm.xlu1 %3871, %v4693_v28  }
 0x414   :  { %1170 = vperm.xlu0 %3865, %v4672_v25   ;;  %3872 = vset.pattern.permute.xlu1 %v4190_v12 }
 0x415   :  { %1258 = vperm.xlu1 %3872, %v4693_v28  }
 0x418   :  { %3867 = vset.pattern.permute.xlu0 %v4192_v34 }
 0x419   :  { %1124 = vperm.xlu0 %3867, %v4672_v25   ;;  %3873 = vset.pattern.permute.xlu1 %v4192_v34 }
 0x41a   :  { %1134 = vperm.xlu1 %3873, %v4693_v28  }
 0x41d   :  { %3869 = vset.pattern.permute.xlu0 %v4190_v12 }
 0x41e   :  { %1246 = vperm.xlu0 %3869, %v4678_v26   ;;  %3875 = vset.pattern.permute.xlu1 %v4190_v12 }
 0x41f   :  { %1254 = vperm.xlu1 %3875, %v4709_v49   ;;  %v494_v50 = vpop.xlane.xlu0 %493 }
 0x422   :  { %3874 = vset.pattern.permute.xlu0 %v4191_v16 }
 0x423   :  { %1174 = vperm.xlu0 %3874, %v4709_v49   ;;  %3876 = vset.pattern.permute.xlu1 %v4192_v34  ;;  %v597_v52 = vpop.xlane.xlu0 %596 }
 0x424   :  { %4010 = vrcp.f32 %v597_v52  ;;  %1129 = vperm.xlu1 %3876, %v4709_v49  }
 0x427   :  { %3881 = vset.pattern.permute.xlu0 %v4190_v12  ;;  %v718_v58 = vpop.xlane.xlu0 %717 }
 0x428   :  { %1262 = vperm.xlu0 %3881, %v4725_v57   ;;  %4012 = vrcp.f32 %v718_v58  ;;  %3877 = vset.pattern.permute.xlu1 %v4191_v16  ;;  %v4195_v58 = vmov 8  }
 0x429   :  { %1186 = vperm.xlu1 %3877, %v4729_v59  }
 0x42b   :  { %v603_v37 = vpop.xlane.xlu0 %602 }
 0x42c   :  { %3882 = vset.pattern.permute.xlu0 %v4192_v34  ;;  %4014 = vrcp.f32 %v603_v37  ;;  %v4196_v37 = vmov 7  }
 0x42d   :  { %4016 = vrcp.f32 %v494_v50  ;;  %v491_v60 = vpop.xlane.xlu1 %490  ;;  %1139 = vperm.xlu0 %3882, %v4725_v57   ;;  %3878 = vset.pattern.permute.xlu1 %v4190_v12 }
 0x42e   :  { %v4011_v61 = vpop.eup %4010  ;;  %4018 = vrcp.f32 %v491_v60  ;;  %1266 = vperm.xlu1 %3878, %v4729_v59  }
 0x42f   :  { %v724_v32 = vpop.xlane.xlu0 %723  ;;  %v4739_v63 = vmul.f32 %v4011_v61, %v4491_v9 }
 0x430   :  { %4020 = vrcp.f32 %v724_v32 }
 0x431   :  { %v594_v0 = vpop.xlane.xlu1 %593  ;;  %3884 = vset.pattern.permute.xlu0 %v4191_v16  ;;  %v754_v9 = vsel %vm422_vm7, %v4672_v25, %v4739_v63 }
 0x432   :  { %v4013_v29 = vpop.eup %4012  ;;  %4022 = vrcp.f32 %v594_v0  ;;  %3879 = vset.pattern.permute.xlu1 %v4192_v34  ;;  %v4197_v0 = vmov 3  }
 0x433   :  { %1144 = vperm.xlu1 %3879, %v4729_v59   ;;  %v4745_v2 = vmul.f32 %v4013_v29, %v4493_v10 }
 0x435   :  { %v715_v8 = vpop.xlane.xlu1 %714  ;;  %v763_v14 = vsel %vm761_vm8, %v754_v9, %v4745_v2 }
 0x436   :  { %v4015_v19 = vpop.eup %4014  ;;  %4024 = vrcp.f32 %v715_v8  ;;  %772 = vst.msk [vmem:[%s5891_s13 + $0x8] sm:$0xff] %vm770_vm9, %v763_v14  ;;  %v4198_v8 = vmov 6  }
 0x437   :  { %v4017_v10 = vpop.eup %4016  ;;  %3880 = vset.pattern.permute.xlu1 %v4191_v16  ;;  %v4765_v24 = vmul.f32 %v4015_v19, %v4529_v41 }
 0x438   :  { %v4019_v21 = vpop.eup %4018  ;;  %1182 = vperm.xlu1 %3880, %v4725_v57   ;;  %v4771_v45 = vmul.f32 %v4017_v10, %v4645_v23  ;;  %v4193_v23 = vmov 4  }
 0x439   :  { %v600_v55 = vpop.xlane.xlu1 %599  ;;  %v4768_v25 = vmul.f32 %v4019_v21, %v4651_v36  ;;  %v756_v41 = vsel %vm422_vm7, %v4693_v28, %v4765_v24 }
 0x43a   :  { %v4021_v22 = vpop.eup %4020  ;;  %4026 = vrcp.f32 %v600_v55 }
 0x43b   :  { %1190 = vperm.xlu0 %3884, %v4768_v25   ;;  %v4775_v42 = vmul.f32 %v4021_v22, %v4533_v43 }
 0x43c   :  { %v4023_v62 = vpop.eup %4022  ;;  %1194 = vperm.xlu1 %3880, %v4771_v45  }
 0x43d   :  { %v721_v46 = vpop.xlane.xlu1 %720  ;;  %v765_v36 = vsel %vm761_vm8, %v756_v41, %v4775_v42  ;;  %v4788_v43 = vmul.f32 %v4023_v62, %v4499_v11 }
 0x43e   :  { %4028 = vrcp.f32 %v721_v46  ;;  %774 = vst.msk [vmem:[%s5891_s13 + $0x18] sm:$0xff] %vm770_vm9, %v765_v36 }
 0x43f   :  { %3885 = vset.pattern.permute.xlu0 %v4193_v23  ;;  %v753_v11 = vsel %vm422_vm7, %v4678_v26, %v4788_v43 }
 0x440   :  { %v4025_v50 = vpop.eup %4024  ;;  %1378 = vperm.xlu0 %3885, %v4739_v63   ;;  %3883 = vset.pattern.permute.xlu1 %v4190_v12 }
 0x441   :  { %v606_v28 = vpop.xlane.xlu1 %605  ;;  %1274 = vperm.xlu1 %3883, %v4771_v45   ;;  %v4795_v48 = vmul.f32 %v4025_v50, %v4503_v13 }
 0x442   :  { %4030 = vrcp.f32 %v606_v28 }
 0x443   :  { %v762_v51 = vsel %vm761_vm8, %v753_v11, %v4795_v48 }
 0x444   :  { %v4027_v52 = vpop.eup %4026  ;;  %3899 = vset.pattern.permute.xlu0 %v4194_v17  ;;  %771 = vst.msk [vmem:[%s5891_s13] sm:$0xff] %vm770_vm9, %v762_v51 }
 0x445   :  { %v727_v54 = vpop.xlane.xlu1 %726  ;;  %1466 = vperm.xlu0 %3899, %v4765_v24   ;;  %1270 = vperm.xlu1 %3883, %v4768_v25   ;;  %v4810_v13 = vmul.f32 %v4027_v52, %v4521_v38 }
 0x446   :  { %4032 = vrcp.f32 %v727_v54 }
 0x447   :  { %v755_v61 = vsel %vm422_vm7, %v4709_v49, %v4810_v13 }
 0x448   :  { %v4029_v26 = vpop.eup %4028 }
 0x449   :  { %3900 = vset.pattern.permute.xlu0 %v4195_v58  ;;  %3886 = vset.pattern.permute.xlu1 %v4196_v37  ;;  %v4815_v60 = vmul.f32 %v4029_v26, %v4525_v40 }
 0x44a   :  { %1674 = vperm.xlu0 %3900, %v4775_v42   ;;  %1586 = vperm.xlu1 %3886, %v4745_v2  }
 0x44b   :  { %v764_v38 = vsel %vm761_vm8, %v755_v61, %v4815_v60 }
 0x44c   :  { %v4031_v32 = vpop.eup %4030  ;;  %773 = vst.msk [vmem:[%s5891_s13 + $0x10] sm:$0xff] %vm770_vm9, %v764_v38 }
 0x44d   :  { %v4831_v29 = vmul.f32 %v4031_v32, %v4589_v27 }
 0x44e   :  { %3901 = vset.pattern.permute.xlu0 %v4197_v0  ;;  %v609_v40 = vpop.xlane.xlu0 %608  ;;  %3887 = vset.pattern.permute.xlu1 %v4194_v17 }
 0x44f   :  { %4034 = vrcp.f32 %v609_v40  ;;  %1342 = vperm.xlu0 %3901, %v4765_v24   ;;  %1458 = vperm.xlu1 %3887, %v4739_v63   ;;  %v757_v1 = vsel %vm422_vm7, %v4725_v57, %v4831_v29 }
 0x450   :  { %v4033_v49 = vpop.eup %4032 }
 0x451   :  { %v4836_v3 = vmul.f32 %v4033_v49, %v4594_v31 }
 0x452   :  { %v730_v9 = vpop.xlane.xlu0 %729 }
 0x453   :  { %4036 = vrcp.f32 %v730_v9  ;;  %3902 = vset.pattern.permute.xlu0 %v4198_v8  ;;  %3888 = vset.pattern.permute.xlu1 %v4195_v58  ;;  %v766_v27 = vsel %vm761_vm8, %v757_v1, %v4836_v3 }
 0x454   :  { %1550 = vperm.xlu0 %3902, %v4775_v42   ;;  %1666 = vperm.xlu1 %3888, %v4745_v2   ;;  %775 = vst.msk [vmem:[%s5891_s13 + $0x20] sm:$0xff] %vm770_vm9, %v766_v27 }
 0x458   :  { %3904 = vset.pattern.permute.xlu0 %v4196_v37  ;;  %3889 = vset.pattern.permute.xlu1 %v4197_v0 }
 0x459   :  { %v4035_v31 = vpop.eup %4034  ;;  %1590 = vperm.xlu0 %3904, %v4815_v60   ;;  %1332 = vperm.xlu1 %3889, %v4739_v63  }
 0x45a   :  { %v4856_v57 = vmul.f32 %v4035_v31, %v4599_v33 }
 0x45c   :  { %v758_v10 = vsel %vm422_vm7, %v4729_v59, %v4856_v57 }
 0x45d   :  { %v4037_v14 = vpop.eup %4036  ;;  %3917 = vset.pattern.permute.xlu0 %v4194_v17  ;;  %3890 = vset.pattern.permute.xlu1 %v4198_v8 }
 0x45e   :  { %1470 = vperm.xlu0 %3917, %v4831_v29   ;;  %1540 = vperm.xlu1 %3890, %v4745_v2   ;;  %v4863_v19 = vmul.f32 %v4037_v14, %v4603_v35 }
 0x460   :  { %v767_v33 = vsel %vm761_vm8, %v758_v10, %v4863_v19 }
 0x461   :  { %776 = vst.msk [vmem:[%s5891_s13 + $0x28] sm:$0xff] %vm770_vm9, %v767_v33 }
 0x462   :  { %3918 = vset.pattern.permute.xlu0 %v4195_v58  ;;  %3891 = vset.pattern.permute.xlu1 %v4193_v23 }
 0x463   :  { %1678 = vperm.xlu0 %3918, %v4836_v3   ;;  %1374 = vperm.xlu1 %3891, %v4788_v43  }
 0x467   :  { %3919 = vset.pattern.permute.xlu0 %v4197_v0  ;;  %3892 = vset.pattern.permute.xlu1 %v4196_v37 }
 0x468   :  { %1347 = vperm.xlu0 %3919, %v4831_v29   ;;  %1582 = vperm.xlu1 %3892, %v4795_v48  }
 0x46c   :  { %3893 = vset.pattern.permute.xlu1 %v4194_v17  ;;  %3921 = vset.pattern.permute.xlu0 %v4193_v23 }
 0x46d   :  { %1454 = vperm.xlu1 %3893, %v4788_v43  }
 0x471   :  { %3894 = vset.pattern.permute.xlu1 %v4195_v58 }
 0x472   :  { %1662 = vperm.xlu1 %3894, %v4795_v48  }
 0x476   :  { %3895 = vset.pattern.permute.xlu1 %v4197_v0 }
 0x477   :  { %1327 = vperm.xlu1 %3895, %v4788_v43  }
 0x479   :  { %v612_v35 = vpop.xlane.xlu1 %611 }
 0x47a   :  { %4038 = vrcp.f32 %v612_v35 }
 0x47b   :  { %3896 = vset.pattern.permute.xlu1 %v4198_v8 }
 0x47c   :  { %1535 = vperm.xlu1 %3896, %v4795_v48  }
 0x47d   :  { %v733_v59 = vpop.xlane.xlu1 %732 }
 0x47e   :  { %4040 = vrcp.f32 %v733_v59 }
 0x480   :  { %3897 = vset.pattern.permute.xlu1 %v4193_v23 }
 0x481   :  { %v4892_v63 = vpop.permute.xlu1 %1250  ;;  %1386 = vperm.xlu1 %3897, %v4765_v24  }
 0x484   :  { %v4039_v2 = vpop.eup %4038 }
 0x485   :  { %v1167_v21 = vpop.permute.xlu1 %1166  ;;  %3898 = vset.pattern.permute.xlu1 %v4196_v37  ;;  %v4898_v55 = vmul.f32 %v4039_v2, %v4625_v4 }
 0x486   :  { %1594 = vperm.xlu1 %3898, %v4775_v42  }
 0x487   :  { %v615_v22 = vpop.xlane.xlu0 %614  ;;  %v759_v24 = vsel %vm422_vm7, %v4768_v25, %v4898_v55 }
 0x488   :  { %v4041_v62 = vpop.eup %4040  ;;  %4042 = vrcp.f32 %v615_v22 }
 0x489   :  { %v4901_v41 = vmul.f32 %v4041_v62, %v4629_v5 }
 0x48a   :  { %v4903_v46 = vpop.permute.xlu1 %1119  ;;  %3903 = vset.pattern.permute.xlu1 %v4193_v23 }
 0x48b   :  { %v736_v36 = vpop.xlane.xlu0 %735  ;;  %1382 = vperm.xlu1 %3903, %v4810_v13   ;;  %v768_v4 = vsel %vm761_vm8, %v759_v24, %v4901_v41 }
 0x48c   :  { %4044 = vrcp.f32 %v736_v36  ;;  %777 = vst.msk [vmem:[%s5891_s13 + $0x30] sm:$0xff] %vm770_vm9, %v768_v4 }
 0x48f   :  { %v4916_v5 = vpop.permute.xlu1 %1178  ;;  %3905 = vset.pattern.permute.xlu1 %v4194_v17 }
 0x490   :  { %1462 = vperm.xlu1 %3905, %v4810_v13  }
 0x492   :  { %v4043_v42 = vpop.eup %4042 }
 0x493   :  { %v631_v43 = vmul.f32 %v4043_v42, %v4633_v6  ;;  %v1171_v40 = vpop.permute.xlu0 %1170 }
 0x494   :  { %v4921_v50 = vpop.permute.xlu1 %1258  ;;  %3906 = vset.pattern.permute.xlu1 %v4195_v58 }
 0x495   :  { %1402 = vperm.xlu0 %3921, %v631_v43   ;;  %1670 = vperm.xlu1 %3906, %v4815_v60   ;;  %v760_v11 = vsel %vm422_vm7, %v4771_v45, %v631_v43 }
 0x496   :  { %v4045_v28 = vpop.eup %4044 }
 0x497   :  { %v752_v48 = vmul.f32 %v4045_v28, %v4637_v7  ;;  %v1071_v7 = vadd.f32 %v4687_v18, %v4675_v30 }
 0x498   :  { %v4981_v1 = vpop.permute.xlu0 %1124 }
 0x499   :  { %3922 = vset.pattern.permute.xlu0 %v4196_v37  ;;  %v4929_v51 = vpop.permute.xlu1 %1134  ;;  %3907 = vset.pattern.permute.xlu1 %v4197_v0  ;;  %v769_v6 = vsel %vm761_vm8, %v760_v11, %v752_v48  ;;  %v4945_v54 = vmax.f32 %v1071_v7, 0.0 }
 0x49a   :  { %1610 = vperm.xlu0 %3922, %v752_v48   ;;  %778 = vst.msk [vmem:[%s5891_s13 + $0x38] sm:$0xff] %vm770_vm9, %v769_v6  ;;  %1337 = vperm.xlu1 %3907, %v4810_v13   ;;  %s4199_s13 = smov 96  }
 0x49b   :  { %v1197_v30 = vmul.f32 %v1167_v21, %v4945_v54 }
 0x49d   :  { %v4986_v31 = vpop.permute.xlu0 %1246 }
 0x49e   :  { %3924 = vset.pattern.permute.xlu0 %v4195_v58  ;;  %v4941_v52 = vpop.permute.xlu1 %1254  ;;  %3908 = vset.pattern.permute.xlu1 %v4198_v8 }
 0x49f   :  { %1690 = vperm.xlu0 %3924, %v752_v48   ;;  %1545 = vperm.xlu1 %3908, %v4815_v60  }
 0x4a3   :  { %3925 = vset.pattern.permute.xlu0 %v4197_v0  ;;  %v4948_v26 = vpop.permute.xlu1 %1129  ;;  %3909 = vset.pattern.permute.xlu1 %v4193_v23 }
 0x4a4   :  { %1362 = vperm.xlu0 %3925, %v631_v43   ;;  %1394 = vperm.xlu1 %3909, %v4856_v57  }
 0x4a8   :  { %1213 = vrot.lane.b32.xlu0 %v1197_v30, %s4199_s13  ;;  %v4954_v13 = vpop.permute.xlu1 %1186  ;;  %3910 = vset.pattern.permute.xlu1 %v4196_v37 }
 0x4a9   :  { %1602 = vperm.xlu1 %3910, %v4863_v19   ;;  %3935 = vset.pattern.permute.xlu0 %v4190_v12 }
 0x4ad   :  { %v4959_v60 = vpop.permute.xlu1 %1266  ;;  %3911 = vset.pattern.permute.xlu1 %v4194_v17 }
 0x4ae   :  { %1474 = vperm.xlu1 %3911, %v4856_v57  }
 0x4b2   :  { %v4963_v61 = vpop.permute.xlu1 %1144  ;;  %3912 = vset.pattern.permute.xlu1 %v4195_v58 }
 0x4b3   :  { %1682 = vperm.xlu1 %3912, %v4863_v19  }
 0x4b7   :  { %v4967_v38 = vpop.permute.xlu1 %1182  ;;  %3913 = vset.pattern.permute.xlu1 %v4197_v0 }
 0x4b8   :  { %1352 = vperm.xlu1 %3913, %v4856_v57   ;;  %v1076_v57 = vadd.f32 %v4669_v20, %v4687_v18 }
 0x4bb   :  { %v4971_v32 = vpop.permute.xlu1 %1194 }
 0x4bc   :  { %3914 = vset.pattern.permute.xlu1 %v4198_v8 }
 0x4bd   :  { %1560 = vperm.xlu1 %3914, %v4863_v19   ;;  %v4994_v19 = vpop.permute.xlu0 %1174 }
 0x4c0   :  { %v4975_v49 = vpop.permute.xlu1 %1274 }
 0x4c1   :  { %3915 = vset.pattern.permute.xlu1 %v4193_v23 }
 0x4c2   :  { %1390 = vperm.xlu1 %3915, %v4831_v29   ;;  %v4992_v29 = vmax.f32 %v1076_v57, 0.0  ;;  %v5054_v57 = vmax.f32 %v4705_v47, 0.0 }
 0x4c4   :  { %v4979_v9 = vpop.permute.xlu1 %1270  ;;  %v1198_v42 = vmul.f32 %v1171_v40, %v4992_v29 }
 0x4c6   :  { %3916 = vset.pattern.permute.xlu1 %v4196_v37 }
 0x4c7   :  { %1598 = vperm.xlu1 %3916, %v4836_v3  }
 0x4c9   :  { %v1587_v27 = vpop.permute.xlu1 %1586 }
 0x4cb   :  { %3920 = vset.pattern.permute.xlu1 %v4198_v8 }
 0x4cc   :  { %1555 = vperm.xlu1 %3920, %v4836_v3   ;;  %v4999_v3 = vpop.permute.xlu0 %1262 }
 0x4ce   :  { %v1459_v14 = vpop.permute.xlu1 %1458 }
 0x4cf   :  { %v1486_v7 = vmul.f32 %v1459_v14, %v4992_v29 }
 0x4d0   :  { %3923 = vset.pattern.permute.xlu1 %v4194_v17  ;;  %v5007_v18 = vpop.permute.xlu0 %1139 }
 0x4d1   :  { %1482 = vperm.xlu1 %3923, %v631_v43  }
 0x4d3   :  { %v1667_v10 = vpop.permute.xlu1 %1666 }
 0x4d4   :  { %v1694_v33 = vmul.f32 %v1667_v10, %v4992_v29  ;;  %v5011_v59 = vpop.permute.xlu0 %1190 }
 0x4d5   :  { %3926 = vset.pattern.permute.xlu1 %v4198_v8 }
 0x4d6   :  { %1570 = vperm.xlu1 %3926, %v752_v48   ;;  %1711 = vrot.lane.b32.xlu0 %v1694_v33, %s4186_s0 }
 0x4d8   :  { %v5001_v35 = vpop.permute.xlu1 %1332  ;;  %v1379_v22 = vpop.permute.xlu0 %1378 }
 0x4da   :  { %3927 = vset.pattern.permute.xlu1 %v4193_v23 }
 0x4db   :  { %1398 = vperm.xlu1 %3927, %v4898_v55  }
 0x4dc   :  { %v1467_v36 = vpop.permute.xlu0 %1466 }
 0x4dd   :  { %v5005_v20 = vpop.permute.xlu1 %1540 }
 0x4df   :  { %3928 = vset.pattern.permute.xlu1 %v4196_v37 }
 0x4e0   :  { %1606 = vperm.xlu1 %3928, %v4901_v41  }
 0x4e2   :  { %v1375_v2 = vpop.permute.xlu1 %1374 }
 0x4e3   :  { %v1405_v21 = vmul.f32 %v1375_v2, %v4945_v54 }
 0x4e4   :  { %3929 = vset.pattern.permute.xlu1 %v4194_v17 }
 0x4e5   :  { %1478 = vperm.xlu1 %3929, %v4898_v55   ;;  %1421 = vrot.lane.b32.xlu0 %v1405_v21, %s4199_s13 }
 0x4e7   :  { %v1583_v23 = vpop.permute.xlu1 %1582 }
 0x4e8   :  { %v1613_v62 = vmul.f32 %v1583_v23, %v4945_v54 }
 0x4e9   :  { %3930 = vset.pattern.permute.xlu1 %v4195_v58  ;;  %v1675_v58 = vpop.permute.xlu0 %1674 }
 0x4ea   :  { %1686 = vperm.xlu1 %3930, %v4901_v41   ;;  %1629 = vrot.lane.b32.xlu0 %v1613_v62, %s4199_s13 }
 0x4ec   :  { %v1455_v37 = vpop.permute.xlu1 %1454 }
 0x4ed   :  { %v1485_v24 = vmul.f32 %v1455_v37, %v4945_v54 }
 0x4ee   :  { %3931 = vset.pattern.permute.xlu1 %v4197_v0  ;;  %v1406_v0 = vmul.f32 %v1379_v22, %v4992_v29 }
 0x4ef   :  { %1357 = vperm.xlu1 %3931, %v4898_v55   ;;  %1501 = vrot.lane.b32.xlu0 %v1485_v24, %s4186_s0  ;;  %v5035_v55 = vpop.permute.xlu0 %1342  ;;  %v5073_v24 = vmax.f32 %v4718_v53, 0.0 }
 0x4f1   :  { %v1663_v17 = vpop.permute.xlu1 %1662 }
 0x4f2   :  { %v1693_v4 = vmul.f32 %v1663_v17, %v4945_v54 }
 0x4f3   :  { %3932 = vset.pattern.permute.xlu1 %v4198_v8  ;;  %v1614_v8 = vmul.f32 %v1587_v27, %v4992_v29  ;;  %v5044_v48 = vpop.permute.xlu0 %1550 }
 0x4f4   :  { %1565 = vperm.xlu1 %3932, %v4901_v41   ;;  %1709 = vrot.lane.b32.xlu0 %v1693_v4, %s4186_s0  ;;  %v5042_v41 = vmax.f32 %v4690_v44, 0.0 }
 0x4f6   :  { %v5030_v43 = vpop.permute.xlu1 %1327  ;;  %v1488_v30 = vmul.f32 %v1467_v36, %v5042_v41  ;;  %v1696_v14 = vmul.f32 %v1675_v58, %v5042_v41 }
 0x4f7   :  { %v1591_v27 = vpop.permute.xlu0 %1590 }
 0x4f8   :  { %1215 = vrot.lane.b32.xlu1 %v1198_v42, %s4199_s13  ;;  %v1615_v10 = vmul.f32 %v1591_v27, %v5054_v57 }
 0x4f9   :  { %3933 = vset.pattern.permute.xlu1 %v4192_v34 }
 0x4fb   :  { %v5037_v28 = vpop.permute.xlu1 %1535  ;;  %v1471_v53 = vpop.permute.xlu0 %1470 }
 0x4fc   :  { %1423 = vrot.lane.b32.xlu1 %v1406_v0, %s4199_s13 }
 0x500   :  { %v1387_v11 = vpop.permute.xlu1 %1386  ;;  %1631 = vrot.lane.b32.xlu1 %v1614_v8, %s4199_s13 }
 0x501   :  { %v1408_v6 = vmul.f32 %v1387_v11, %v5042_v41 }
 0x503   :  { %1427 = vrot.lane.b32.xlu0 %v1408_v6, %s4199_s13 }
 0x504   :  { %1503 = vrot.lane.b32.xlu1 %v1486_v7, %s4186_s0  ;;  %v1679_v7 = vpop.permute.xlu0 %1678 }
 0x505   :  { %v1595_v40 = vpop.permute.xlu1 %1594 }
 0x506   :  { %v1616_v44 = vmul.f32 %v1595_v40, %v5042_v41  ;;  %v5088_v40 = vmax.f32 %v4722_v56, 0.0 }
 0x507   :  { %1507 = vrot.lane.b32.xlu0 %v1488_v30, %s4186_s0 }
 0x508   :  { %1635 = vrot.lane.b32.xlu1 %v1616_v44, %s4199_s13  ;;  %v5090_v44 = vpop.permute.xlu0 %1347 }
 0x50a   :  { %v1383_v33 = vpop.permute.xlu1 %1382 }
 0x50b   :  { %1633 = vrot.lane.b32.xlu0 %v1615_v10, %s4199_s13  ;;  %v1407_v2 = vmul.f32 %v1383_v33, %v5054_v57 }
 0x50c   :  { %1715 = vrot.lane.b32.xlu1 %v1696_v14, %s4186_s0  ;;  %v1489_v14 = vmul.f32 %v1471_v53, %v5088_v40 }
 0x50f   :  { %v1463_v21 = vpop.permute.xlu1 %1462 }
 0x510   :  { %v1487_v23 = vmul.f32 %v1463_v21, %v5054_v57  ;;  %1425 = vrot.lane.b32.xlu1 %v1407_v2, %s4199_s13 }
 0x512   :  { %1505 = vrot.lane.b32.xlu0 %v1487_v23, %s4186_s0  ;;  %v5097_v23 = vmax.f32 %v4751_v39, 0.0 }
 0x514   :  { %v1671_v47 = vpop.permute.xlu1 %1670  ;;  %v1403_v33 = vpop.permute.xlu0 %1402 }
 0x515   :  { %v1695_v22 = vmul.f32 %v1671_v47, %v5054_v57  ;;  %v1412_v56 = vmul.f32 %v1403_v33, %v5097_v23  ;;  %v1697_v47 = vmul.f32 %v1679_v7, %v5088_v40 }
 0x517   :  { %1713 = vrot.lane.b32.xlu1 %v1695_v22, %s4186_s0 }
 0x519   :  { %v5068_v62 = vpop.permute.xlu1 %1337 }
 0x51e   :  { %v5070_v37 = vpop.permute.xlu1 %1545 }
 0x523   :  { %v1395_v36 = vpop.permute.xlu1 %1394 }
 0x524   :  { %v1410_v17 = vmul.f32 %v1395_v36, %v5073_v24  ;;  %v1611_v36 = vpop.permute.xlu0 %1610 }
 0x526   :  { %1431 = vrot.lane.b32.xlu0 %v1410_v17, %s4199_s13  ;;  %v1620_v17 = vmul.f32 %v1611_v36, %v5097_v23  ;;  %v1278_v36 = vmul.f32 %v4892_v63, %v4992_v29  ;;  %v1200_v63 = vmul.f32 %v4916_v5, %v5042_v41 }
 0x528   :  { %v1603_v4 = vpop.permute.xlu1 %1602 }
 0x529   :  { %v1618_v58 = vmul.f32 %v1603_v4, %v5073_v24 }
 0x52b   :  { %1639 = vrot.lane.b32.xlu1 %v1618_v58, %s4199_s13  ;;  %v1691_v58 = vpop.permute.xlu0 %1690 }
 0x52d   :  { %v1475_v42 = vpop.permute.xlu1 %1474 }
 0x52e   :  { %v1490_v0 = vmul.f32 %v1475_v42, %v5073_v24  ;;  %v1700_v42 = vmul.f32 %v1691_v58, %v5097_v23 }
 0x52f   :  { %v5120_v7 = vpop.permute.xlu0 %1362 }
 0x530   :  { %1511 = vrot.lane.b32.xlu0 %v1490_v0, %s4186_s0 }
 0x532   :  { %v1683_v8 = vpop.permute.xlu1 %1682 }
 0x533   :  { %v1698_v11 = vmul.f32 %v1683_v8, %v5073_v24  ;;  %v5116_v8 = vmax.f32 %v4756_v15, 0.0  ;;  %v5124_v33 = vpop.permute.xlu0 %1213  ;;  %v1277_v15 = vmul.f32 %v4986_v31, %v4945_v54  ;;  %v1199_v31 = vmul.f32 %v4994_v19, %v5054_v57 }
 0x535   :  { %1719 = vrot.lane.b32.xlu1 %v1698_v11, %s4186_s0 }
 0x537   :  { %v5083_v6 = vpop.permute.xlu1 %1352 }
 0x53c   :  { %v5085_v30 = vpop.permute.xlu1 %1560 }
 0x541   :  { %v1391_v27 = vpop.permute.xlu1 %1390 }
 0x542   :  { %v1409_v10 = vmul.f32 %v1391_v27, %v5088_v40 }
 0x544   :  { %1429 = vrot.lane.b32.xlu0 %v1409_v10, %s4199_s13 }
 0x546   :  { %v1599_v2 = vpop.permute.xlu1 %1598 }
 0x547   :  { %v1617_v21 = vmul.f32 %v1599_v2, %v5088_v40 }
 0x548   :  { %1509 = vrot.lane.b32.xlu0 %v1489_v14, %s4186_s0 }
 0x549   :  { %1637 = vrot.lane.b32.xlu1 %v1617_v21, %s4199_s13  ;;  %v1712_v21 = vpop.permute.xlu0 %1711 }
 0x54b   :  { %v5103_v22 = vpop.permute.xlu1 %1555 }
 0x54c   :  { %1435 = vrot.lane.b32.xlu0 %v1412_v56, %s4199_s13 }
 0x54d   :  { %1717 = vrot.lane.b32.xlu1 %v1697_v47, %s4186_s0 }
 0x550   :  { %v1483_v4 = vpop.permute.xlu1 %1482 }
 0x551   :  { %v1492_v39 = vmul.f32 %v1483_v4, %v5097_v23  ;;  %1643 = vrot.lane.b32.xlu1 %v1620_v17, %s4199_s13 }
 0x553   :  { %1515 = vrot.lane.b32.xlu0 %v1492_v39, %s4186_s0 }
 0x555   :  { %v5112_v0 = vpop.permute.xlu1 %1570 }
 0x557   :  { %1723 = vrot.lane.b32.xlu0 %v1700_v42, %s4186_s0  ;;  %v5135_v17 = vpop.permute.xlu0 %1421  ;;  %v1279_v42 = vmul.f32 %v4941_v52, %v5054_v57  ;;  %v1202_v52 = vmul.f32 %v4954_v13, %v5073_v24  ;;  %v1203_v13 = vmul.f32 %v5011_v59, %v5116_v8  ;;  %v1204_v59 = vmul.f32 %v4971_v32, %v5097_v23 }
 0x558   :  { %v1573_v32 = vmul.f32 %v5037_v28, %v4945_v54 }
 0x55a   :  { %v1399_v11 = vpop.permute.xlu1 %1398 }
 0x55b   :  { %v1411_v53 = vmul.f32 %v1399_v11, %v5116_v8 }
 0x55c   :  { %v1630_v39 = vpop.permute.xlu0 %1629 }
 0x55d   :  { %1433 = vrot.lane.b32.xlu0 %v1411_v53, %s4199_s13  ;;  %v3282_v53 = vld [vmem:[%s5882_s4 + $0x60] sm:$0xff] }
 0x55f   :  { %v1607_v27 = vpop.permute.xlu1 %1606 }
 0x560   :  { %v1619_v10 = vmul.f32 %v1607_v27, %v5116_v8  ;;  %v1281_v27 = vmul.f32 %v4999_v3, %v5088_v40  ;;  %v3285_v3 = vld [vmem:[%s5882_s4 + $0x78] sm:$0xff] }
 0x561   :  { %v5157_v19 = vpop.permute.xlu0 %1501 }
 0x562   :  { %1641 = vrot.lane.b32.xlu1 %v1619_v10, %s4199_s13 }
 0x564   :  { %v1479_v14 = vpop.permute.xlu1 %1478 }
 0x565   :  { %v1491_v2 = vmul.f32 %v1479_v14, %v5116_v8 }
 0x566   :  { %v1710_v10 = vpop.permute.xlu0 %1709 }
 0x567   :  { %1513 = vrot.lane.b32.xlu0 %v1491_v2, %s4186_s0  ;;  %v3284_v2 = vld [vmem:[%s5882_s4 + $0x70] sm:$0xff] }
 0x569   :  { %v1687_v56 = vpop.permute.xlu1 %1686 }
 0x56a   :  { %v1699_v47 = vmul.f32 %v1687_v56, %v5116_v8  ;;  %v3780_v56 = vpack.c.bf16 %v3285_v3, %v3284_v2  ;;  %v3290_v2 = vld [vmem:[%s5882_s4 + $0xa0] sm:$0xff] }
 0x56b   :  { %1293 = vrot.lane.b32.xlu0 %v1277_v15, %s4186_s0  ;;  %v1282_v15 = vmul.f32 %v4959_v60, %v5073_v24  ;;  %v3286_v60 = vld [vmem:[%s5882_s4 + $0x80] sm:$0xff] }
 0x56c   :  { %1721 = vrot.lane.b32.xlu1 %v1699_v47, %s4186_s0  ;;  %v1574_v47 = vmul.f32 %v5005_v20, %v4992_v29  ;;  %v3287_v20 = vld [vmem:[%s5882_s4 + $0x88] sm:$0xff] }
 0x56e   :  { %v5137_v4 = vpop.permute.xlu1 %1357 }
 0x56f   :  { %1295 = vrot.lane.b32.xlu0 %v1278_v36, %s4186_s0 }
 0x570   :  { %1149 = vperm.xlu1 %3933, %v4768_v25   ;;  %v1201_v25 = vmul.f32 %v4967_v38, %v5088_v40  ;;  %v3283_v38 = vld [vmem:[%s5882_s4 + $0x68] sm:$0xff] }
 0x573   :  { %v5143_v58 = vpop.permute.xlu1 %1565  ;;  %1217 = vrot.lane.b32.xlu0 %v1199_v31, %s4199_s13 }
 0x574   :  { %1154 = vperm.xlu1 %3933, %v4771_v45   ;;  %v1280_v45 = vmul.f32 %v4921_v50, %v5042_v41  ;;  %v3776_v50 = vpack.c.bf16 %v3283_v38, %v3282_v53  ;;  %v3288_v38 = vld [vmem:[%s5882_s4 + $0x90] sm:$0xff] }
 0x575   :  { %v1428_v36 = vpop.permute.xlu0 %1427 }
 0x576   :  { %3777 = vmatprep.subr.bf16.mxu0 %v3776_v50 }
 0x577   :  { %v5151_v11 = vpop.permute.xlu1 %1215  ;;  %1219 = vrot.lane.b32.xlu0 %v1200_v63, %s4199_s13  ;;  %3779 = vmatpush3.bf16.msra.mxu0 %v3776_v50  ;;  %v1366_v50 = vmul.f32 %v5001_v35, %v4992_v29  ;;  %v1576_v35 = vmul.f32 %v5044_v48, %v5042_v41 }
 0x578   :  { %1297 = vrot.lane.b32.xlu1 %v1279_v42, %s4186_s0  ;;  %3781 = vmatprep.subr.bf16.mxu0 %v3780_v56  ;;  %v1283_v42 = vmul.f32 %v4979_v9, %v5116_v8  ;;  %v3289_v9 = vld [vmem:[%s5882_s4 + $0x98] sm:$0xff] }
 0x579   :  { %3934 = vset.pattern.permute.xlu1 %v4191_v16 }
 0x57b   :  { %v1424_v5 = vpop.permute.xlu1 %1423  ;;  %1221 = vrot.lane.b32.xlu0 %v1201_v25, %s4199_s13  ;;  %3783 = vmatpush3.bf16.msra.mxu0 %v3780_v56  ;;  %v3784_v25 = vpack.c.bf16 %v3287_v20, %v3286_v60 }
 0x57c   :  { %1299 = vrot.lane.b32.xlu1 %v1280_v45, %s4186_s0 }
 0x57d   :  { %3785 = vmatprep.subr.bf16.mxu0 %v3784_v25 }
 0x57f   :  { %v1632_v14 = vpop.permute.xlu1 %1631  ;;  %1223 = vrot.lane.b32.xlu0 %v1202_v52, %s4199_s13  ;;  %v1508_v52 = vpop.permute.xlu0 %1507  ;;  %3787 = vmatpush3.bf16.msra.mxu0 %v3784_v25  ;;  %v1367_v25 = vmul.f32 %v5068_v62, %v5054_v57  ;;  %v1370_v62 = vmul.f32 %v5083_v6, %v5073_v24 }
 0x580   :  { %1301 = vrot.lane.b32.xlu1 %v1281_v27, %s4186_s0  ;;  %v1654_v63 = vadd.f32 %v1632_v14, %v1574_v47  ;;  %v1284_v27 = vmul.f32 %v4975_v49, %v5097_v23  ;;  %v3788_v14 = vpack.c.bf16 %v3289_v9, %v3288_v38  ;;  %v3291_v49 = vld [vmem:[%s5882_s4 + $0xa8] sm:$0xff] }
 0x582   :  { %v1734_v53 = vadd.f32 %v1712_v21, %v1654_v63  ;;  %v1446_v21 = vadd.f32 %v1424_v5, %v1366_v50  ;;  %3789 = vmatprep.subr.bf16.mxu0 %v3788_v14  ;;  %v1365_v5 = vmul.f32 %v5030_v43, %v4945_v54  ;;  %v1575_v63 = vmul.f32 %v5070_v37, %v5054_v57  ;;  %v3292_v43 = vld [vmem:[%s5882_s4 + $0xb0] sm:$0xff] }
 0x583   :  { %v1504_v31 = vpop.permute.xlu1 %1503  ;;  %1225 = vrot.lane.b32.xlu0 %v1203_v13, %s4199_s13  ;;  %v1653_v13 = vadd.f32 %v1630_v39, %v1573_v32  ;;  %3791 = vmatpush3.bf16.msra.mxu0 %v3788_v14  ;;  %v3792_v39 = vpack.c.bf16 %v3291_v49, %v3290_v2  ;;  %v1634_v56 = vpop.permute.xlu0 %1633  ;;  %v1369_v49 = vmul.f32 %v5090_v44, %v5088_v40 }
 0x584   :  { %1303 = vrot.lane.b32.xlu1 %v1282_v15, %s4186_s0  ;;  %v1526_v15 = vadd.f32 %v1504_v31, %v1446_v21  ;;  %v1445_v60 = vadd.f32 %v5135_v17, %v1365_v5  ;;  %v1368_v31 = vmul.f32 %v5035_v55, %v5042_v41  ;;  %v1655_v37 = vadd.f32 %v1634_v56, %v1575_v63 }
 0x585   :  { %v1733_v3 = vadd.f32 %v1710_v10, %v1653_v13  ;;  %3793 = vmatprep.subr.bf16.mxu0 %v3792_v39  ;;  %v3293_v10 = vld [vmem:[%s5882_s4 + $0xb8] sm:$0xff]  ;;  %v1577_v5 = vmul.f32 %v5103_v22, %v5088_v40 }
 0x586   :  { %v1525_v20 = vadd.f32 %v5157_v19, %v1445_v60 }
 0x587   :  { %v1636_v45 = vpop.permute.xlu1 %1635  ;;  %1227 = vrot.lane.b32.xlu0 %v1204_v59, %s4199_s13  ;;  %3795 = vmatpush3.bf16.msra.mxu0 %v3792_v39  ;;  %v1506_v55 = vpop.permute.xlu0 %1505 }
 0x588   :  { %1305 = vrot.lane.b32.xlu1 %v1283_v42, %s4186_s0  ;;  %v1656_v47 = vadd.f32 %v1636_v45, %v1576_v35  ;;  %v3796_v42 = vpack.c.bf16 %v3293_v10, %v3292_v43  ;;  %v1448_v45 = vadd.f32 %v1428_v36, %v1368_v31 }
 0x58a   :  { %3797 = vmatprep.subr.bf16.mxu0 %v3796_v42 }
 0x58b   :  { %v1716_v28 = vpop.permute.xlu1 %1715  ;;  %1783 = vrot.lane.b32.xlu0 %v1734_v53, %s4186_s0  ;;  %3799 = vmatpush3.bf16.msra.mxu0 %v3796_v42  ;;  %v1528_v53 = vadd.f32 %v1508_v52, %v1448_v45  ;;  %v1578_v52 = vmul.f32 %v5085_v30, %v5073_v24  ;;  %v1579_v45 = vmul.f32 %v5143_v58, %v5116_v8 }
 0x58c   :  { %1307 = vrot.lane.b32.xlu1 %v1284_v27, %s4186_s0  ;;  %v1736_v48 = vadd.f32 %v1716_v28, %v1656_v47 }
 0x58f   :  { %v1426_v59 = vpop.permute.xlu1 %1425  ;;  %1781 = vrot.lane.b32.xlu0 %v1733_v3, %s4186_s0 }
 0x590   :  { %1751 = vrot.lane.b32.xlu1 %v1526_v15, %s4187_s21  ;;  %v1447_v38 = vadd.f32 %v1426_v59, %v1367_v25  ;;  %v1372_v59 = vmul.f32 %v5120_v7, %v5097_v23  ;;  %v1371_v7 = vmul.f32 %v5137_v4, %v5116_v8 }
 0x592   :  { %v1527_v19 = vadd.f32 %v1506_v55, %v1447_v38 }
 0x593   :  { %v1714_v17 = vpop.permute.xlu1 %1713  ;;  %1787 = vrot.lane.b32.xlu0 %v1736_v48, %s4186_s0  ;;  %v1580_v48 = vmul.f32 %v5112_v0, %v5097_v23 }
 0x594   :  { %v1735_v32 = vadd.f32 %v1714_v17, %v1655_v37  ;;  %1749 = vrot.lane.b32.xlu1 %v1525_v20, %s4187_s21 }
 0x597   :  { %1785 = vrot.lane.b32.xlu0 %v1735_v32, %s4186_s0 }
 0x598   :  { %1755 = vrot.lane.b32.xlu1 %v1528_v53, %s4187_s21  ;;  %v1432_v9 = vpop.permute.xlu0 %1431 }
 0x599   :  { %v1450_v36 = vadd.f32 %v1432_v9, %v1370_v62 }
 0x59c   :  { %1753 = vrot.lane.b32.xlu1 %v1527_v19, %s4187_s21 }
 0x59d   :  { %v1640_v50 = vpop.permute.xlu1 %1639 }
 0x59e   :  { %v1658_v13 = vadd.f32 %v1640_v50, %v1578_v52 }
 0x5a2   :  { %v1512_v27 = vpop.permute.xlu0 %1511 }
 0x5a3   :  { %v1530_v14 = vadd.f32 %v1512_v27, %v1450_v36 }
 0x5a5   :  { %1759 = vrot.lane.b32.xlu1 %v1530_v14, %s4187_s21 }
 0x5a7   :  { %v1720_v28 = vpop.permute.xlu1 %1719 }
 0x5a8   :  { %v1738_v21 = vadd.f32 %v1720_v28, %v1658_v13 }
 0x5aa   :  { %1791 = vrot.lane.b32.xlu0 %v1738_v21, %s4186_s0 }
 0x5b6   :  { %v1430_v2 = vpop.permute.xlu0 %1429 }
 0x5b7   :  { %v1449_v35 = vadd.f32 %v1430_v2, %v1369_v49 }
 0x5ba   :  { %v1510_v6 = vpop.permute.xlu0 %1509 }
 0x5bb   :  { %v1529_v3 = vadd.f32 %v1510_v6, %v1449_v35  ;;  %v1638_v39 = vpop.permute.xlu1 %1637  ;;  %v1158_v35 = vmul.f32 %v4981_v1, %v4992_v29  ;;  %v1157_v6 = vmul.f32 %v4903_v46, %v4945_v54  ;;  %v1159_v54 = vmul.f32 %v4948_v26, %v5054_v57 }
 0x5bc   :  { %v1657_v30 = vadd.f32 %v1638_v39, %v1577_v5 }
 0x5bd   :  { %1757 = vrot.lane.b32.xlu1 %v1529_v3, %s4187_s21  ;;  %v1238_v3 = vadd.f32 %v5151_v11, %v1158_v35  ;;  %v1237_v5 = vadd.f32 %v5124_v33, %v1157_v6 }
 0x5be   :  { %v1436_v47 = vpop.permute.xlu0 %1435 }
 0x5bf   :  { %v1718_v15 = vpop.permute.xlu1 %1717  ;;  %v1452_v63 = vadd.f32 %v1436_v47, %v1372_v59 }
 0x5c0   :  { %v1737_v56 = vadd.f32 %v1718_v15, %v1657_v30 }
 0x5c2   :  { %1789 = vrot.lane.b32.xlu0 %v1737_v56, %s4186_s0 }
 0x5c3   :  { %v1644_v44 = vpop.permute.xlu1 %1643 }
 0x5c4   :  { %v1660_v10 = vadd.f32 %v1644_v44, %v1580_v48 }
 0x5c5   :  { %v1516_v60 = vpop.permute.xlu0 %1515 }
 0x5c6   :  { %v1532_v43 = vadd.f32 %v1516_v60, %v1452_v63  ;;  %v1160_v63 = vmul.f32 %v4929_v51, %v5042_v41 }
 0x5c8   :  { %1763 = vrot.lane.b32.xlu1 %v1532_v43, %s4187_s21 }
 0x5c9   :  { %v1724_v22 = vpop.permute.xlu0 %1723 }
 0x5ca   :  { %v1740_v31 = vadd.f32 %v1724_v22, %v1660_v10 }
 0x5cc   :  { %1795 = vrot.lane.b32.xlu1 %v1740_v31, %s4186_s0 }
 0x5cf   :  { %v1434_v20 = vpop.permute.xlu0 %1433 }
 0x5d0   :  { %v1451_v37 = vadd.f32 %v1434_v20, %v1371_v7  ;;  %v1162_v7 = vmul.f32 %v4963_v61, %v5073_v24 }
 0x5d4   :  { %v1642_v17 = vpop.permute.xlu1 %1641 }
 0x5d5   :  { %v1659_v0 = vadd.f32 %v1642_v17, %v1579_v45 }
 0x5d9   :  { %v1514_v42 = vpop.permute.xlu0 %1513 }
 0x5da   :  { %v1531_v25 = vadd.f32 %v1514_v42, %v1451_v37  ;;  %v1161_v42 = vmul.f32 %v5007_v18, %v5088_v40 }
 0x5dc   :  { %1761 = vrot.lane.b32.xlu0 %v1531_v25, %s4187_s21 }
 0x5dd   :  { %v1294_v32 = vpop.permute.xlu0 %1293 }
 0x5de   :  { %v1722_v53 = vpop.permute.xlu1 %1721  ;;  %v1317_v56 = vadd.f32 %v1294_v32, %v1237_v5 }
 0x5df   :  { %v1739_v38 = vadd.f32 %v1722_v53, %v1659_v0 }
 0x5e1   :  { %v1296_v55 = vpop.permute.xlu0 %1295  ;;  %1793 = vrot.lane.b32.xlu0 %v1739_v38, %s4186_s0 }
 0x5e2   :  { %v1318_v30 = vadd.f32 %v1296_v55, %v1238_v3 }
 0x5e5   :  { %v1218_v19 = vpop.permute.xlu0 %1217 }
 0x5e6   :  { %v1239_v48 = vadd.f32 %v1218_v19, %v1159_v54 }
 0x5e9   :  { %v1220_v9 = vpop.permute.xlu0 %1219 }
 0x5ea   :  { %v1240_v29 = vadd.f32 %v1220_v9, %v1160_v63 }
 0x5ed   :  { %v1222_v4 = vpop.permute.xlu0 %1221 }
 0x5ee   :  { %v1241_v25 = vadd.f32 %v1222_v4, %v1161_v42 }
 0x5ef   :  { %v5271_v62 = vpop.permute.xlu1 %1149 }
 0x5f0   :  { %v1163_v24 = vmul.f32 %v5271_v62, %v5116_v8 }
 0x5f1   :  { %v1224_v50 = vpop.permute.xlu0 %1223 }
 0x5f2   :  { %v1242_v17 = vadd.f32 %v1224_v50, %v1162_v7 }
 0x5f3   :  { %v5273_v36 = vpop.permute.xlu1 %1154 }
 0x5f4   :  { %v1164_v40 = vmul.f32 %v5273_v36, %v5097_v23  ;;  %v4158_v23 = vld [vmem:[%s5881_s3] sm:$0xff] }
 0x5f5   :  { %v5275_v58 = vpop.permute.xlu0 %1225 }
 0x5f6   :  { %v1243_v50 = vadd.f32 %v5275_v58, %v1163_v24  ;;  %v4159_v58 = vld [vmem:[%s5881_s3 + $0x8] sm:$0xff] }
 0x5f7   :  { %v1298_v27 = vpop.permute.xlu1 %1297 }
 0x5f8   :  { %v1319_v51 = vadd.f32 %v1298_v27, %v1239_v48 }
 0x5f9   :  { %v5277_v28 = vpop.permute.xlu0 %1227 }
 0x5fb   :  { %v1300_v14 = vpop.permute.xlu1 %1299 }
 0x5fc   :  { %v1320_v43 = vadd.f32 %v1300_v14, %v1240_v29  ;;  %v1244_v14 = vadd.f32 %v5277_v28, %v1164_v40  ;;  %v4160_v28 = vld [vmem:[%s5881_s3 + $0x10] sm:$0xff] }
 0x5fd   :  { %v1784_v2 = vpop.permute.xlu0 %1783 }
 0x5ff   :  { %v1302_v52 = vpop.permute.xlu1 %1301 }
 0x600   :  { %v1321_v53 = vadd.f32 %v1302_v52, %v1241_v25 }
 0x601   :  { %v1782_v15 = vpop.permute.xlu0 %1781 }
 0x603   :  { %v1304_v13 = vpop.permute.xlu1 %1303 }
 0x604   :  { %v1322_v45 = vadd.f32 %v1304_v13, %v1242_v17 }
 0x605   :  { %v1788_v33 = vpop.permute.xlu0 %1787 }
 0x607   :  { %v5279_v21 = vpop.permute.xlu1 %1305 }
 0x608   :  { %v1323_v52 = vadd.f32 %v5279_v21, %v1243_v50  ;;  %v4161_v21 = vld [vmem:[%s5881_s3 + $0x18] sm:$0xff] }
 0x609   :  { %v1786_v22 = vpop.permute.xlu0 %1785 }
 0x60b   :  { %v5281_v49 = vpop.permute.xlu1 %1307 }
 0x60c   :  { %v1324_v13 = vadd.f32 %v5281_v49, %v1244_v14  ;;  %v3295_v49 = vld [vmem:[%s5883_s5 + $0x1] ss:$0 sm:$0xff] }
 0x60f   :  { %v1752_v39 = vpop.permute.xlu1 %1751 }
 0x610   :  { %v1806_v47 = vsel %vm255_vm2, %v1318_v30, %v1752_v39 }
 0x611   :  { %v1814_v1 = vsel %vm264_vm3, %v1806_v47, %v1784_v2 }
 0x613   :  { %v1750_v59 = vpop.permute.xlu1 %1749 }
 0x614   :  { %v1805_v44 = vsel %vm255_vm2, %v1317_v56, %v1750_v59 }
 0x615   :  { %v1813_v46 = vsel %vm264_vm3, %v1805_v44, %v1782_v15 }
 0x616   :  { %3616 = vmatprep.mubr.msk.f32.mxu0 %vm292_vm4, %v1813_v46  ;;  %v3800_v11 = vpack.c.bf16 %v1814_v1, %v1813_v46 }
 0x617   :  { %v1756_v60 = vpop.permute.xlu1 %1755  ;;  %3617 = vmatmul.mubr.msk.f32.vlgmr.msra.gmra.mrb[8].mxu0 %vm292_vm4, %v1814_v1 }
 0x618   :  { %3801 = vmatprep.subr.bf16.mxu0 %v3800_v11  ;;  %v1808_v41 = vsel %vm255_vm2, %v1320_v43, %v1756_v60 }
 0x619   :  { %3803 = vmatpush3.bf16.msra.mxu0 %v3800_v11  ;;  %v1816_v57 = vsel %vm264_vm3, %v1808_v41, %v1788_v33 }
 0x61b   :  { %v1754_v10 = vpop.permute.xlu1 %1753 }
 0x61c   :  { %v1807_v31 = vsel %vm255_vm2, %v1319_v51, %v1754_v10  ;;  %v1792_v0 = vpop.permute.xlu0 %1791 }
 0x61d   :  { %v1815_v26 = vsel %vm264_vm3, %v1807_v31, %v1786_v22 }
 0x61e   :  { %3619 = vmatprep.mubr.msk.f32.mxu0 %vm292_vm4, %v1815_v26  ;;  %v3804_v20 = vpack.c.bf16 %v1816_v57, %v1815_v26 }
 0x61f   :  { %3620 = vmatmul.mubr.msk.f32.gmra.mrb[10].mxu0 %vm292_vm4, %v1816_v57  ;;  %v1760_v37 = vpop.permute.xlu1 %1759 }
 0x620   :  { %3805 = vmatprep.subr.bf16.mxu0 %v3804_v20  ;;  %v1810_v38 = vsel %vm255_vm2, %v1322_v45, %v1760_v37 }
 0x621   :  { %3807 = vmatpush3.bf16.msra.mxu0 %v3804_v20  ;;  %v1818_v9 = vsel %vm264_vm3, %v1810_v38, %v1792_v0 }
 0x62f   :  { %v1758_v32 = vpop.permute.xlu1 %1757 }
 0x630   :  { %v1809_v55 = vsel %vm255_vm2, %v1321_v53, %v1758_v32 }
 0x634   :  { %v1790_v19 = vpop.permute.xlu0 %1789 }
 0x635   :  { %v1817_v27 = vsel %vm264_vm3, %v1809_v55, %v1790_v19 }
 0x636   :  { %v3808_v61 = vpack.c.bf16 %v1818_v9, %v1817_v27  ;;  %3622 = vmatprep.mubr.msk.f32.mxu0 %vm292_vm4, %v1817_v27 }
 0x637   :  { %3623 = vmatmul.mubr.msk.f32.gmra.mrb[12].mxu0 %vm292_vm4, %v1818_v9 }
 0x638   :  { %3809 = vmatprep.subr.bf16.mxu0 %v3808_v61 }
 0x63a   :  { %v1764_v18 = vpop.permute.xlu1 %1763 }
 0x63b   :  { %v1812_v3 = vsel %vm255_vm2, %v1324_v13, %v1764_v18 }
 0x63e   :  { %v1796_v2 = vpop.permute.xlu1 %1795 }
 0x63f   :  { %v1820_v62 = vsel %vm264_vm3, %v1812_v3, %v1796_v2 }
 0x64e   :  { %v1762_v4 = vpop.permute.xlu0 %1761 }
 0x64f   :  { %v1811_v35 = vsel %vm255_vm2, %v1323_v52, %v1762_v4 }
 0x653   :  { %v1794_v6 = vpop.permute.xlu0 %1793 }
 0x654   :  { %v1819_v8 = vsel %vm264_vm3, %v1811_v35, %v1794_v6 }
 0x655   :  { %3625 = vmatprep.mubr.msk.f32.mxu0 %vm292_vm4, %v1819_v8  ;;  %v3812_v36 = vpack.c.bf16 %v1820_v62, %v1819_v8 }
 0x656   :  { %3626 = vmatmul.mubr.msk.f32.gmra.mrb[14].mxu0 %vm292_vm4, %v1820_v62 }
 0x657   :  { %3636 = vmatprep.mubr.msk.f32.mxu0 %vm255_vm2, %v4158_v23 }
 0x65a   :  { %3637 = vmatmul.mubr.msk.f32.vlgmr.msra.gmra.mrb[16].mxu0 %vm255_vm2, %v4159_v58 }
 0x65b   :  { %3811 = vmatpush3.bf16.msra.mxu0 %v3808_v61  ;;  %3639 = vmatprep.mubr.msk.f32.mxu0 %vm255_vm2, %v4160_v28 }
 0x65c   :  { %3813 = vmatprep.subr.bf16.mxu0 %v3812_v36 }
 0x65e   :  { %3640 = vmatmul.mubr.msk.f32.gmra.mrb[18].mxu0 %vm255_vm2, %v4161_v21 }
 0x65f   :  { %3815 = vmatpush3.bf16.msra.mxu0 %v3812_v36  ;;  %3650 = vmatprep.mubr.msk.f32.mxu0 %vm255_vm2, %v4158_v23 }
 0x662   :  { %3651 = vmatmul.mubr.msk.f32.vlgmr.msra.gmra.mrb[20].mxu0 %vm255_vm2, %v4159_v58 }
 0x663   :  { %3653 = vmatprep.mubr.msk.f32.mxu0 %vm255_vm2, %v4160_v28 }
 0x666   :  { %3654 = vmatmul.mubr.msk.f32.gmra.mrb[22].mxu0 %vm255_vm2, %v4161_v21 }
 0x6ea   :  { %v3618_v39 = vpop.f32.mrb[8].mxu0 }
 0x6eb   :  { %v5352_v5 = vadd.f32 %v3618_v39, %v3295_v49  ;;  %v1932_v30 = vpop.f32.mrb[9].mxu0 }
 0x6ec   :  { %v5354_v15 = vadd.f32 %v3295_v49, %v1932_v30 }
 0x6ed   :  { %v2182_v56 = vsel %vm632_vm5, %v5352_v5, -inf  ;;  %v2062_v47 = vsel %vm511_vm6, %v5352_v5, -inf }
 0x6ee   :  { %2183 = vmax.xlane.f32.xlu0 %v2182_v56  ;;  %2063 = vmax.xlane.f32.xlu1 %v2062_v47  ;;  %v2059_v59 = vsel %vm511_vm6, %v5354_v15, -inf  ;;  %v2179_v54 = vsel %vm632_vm5, %v5354_v15, -inf  ;;  %v1971_v0 = vsel %vm422_vm7, %v5354_v15, -inf }
 0x6f2   :  { %2060 = vmax.xlane.f32.xlu0 %v2059_v59  ;;  %v3621_v63 = vpop.f32.mrb[10].mxu0 }
 0x6f3   :  { %v1942_v44 = vpop.f32.mrb[11].mxu0  ;;  %v5364_v46 = vadd.f32 %v3621_v63, %v3295_v49 }
 0x6f4   :  { %v5362_v1 = vadd.f32 %v3295_v49, %v1942_v44 }
 0x6f5   :  { %v2068_v33 = vsel %vm511_vm6, %v5364_v46, -inf  ;;  %v2188_v60 = vsel %vm632_vm5, %v5364_v46, -inf }
 0x6f6   :  { %2180 = vmax.xlane.f32.xlu0 %v2179_v54  ;;  %v2065_v29 = vsel %vm511_vm6, %v5362_v1, -inf  ;;  %v2185_v11 = vsel %vm632_vm5, %v5362_v1, -inf }
 0x6f7   :  { %2066 = vmax.xlane.f32.xlu1 %v2065_v29 }
 0x6fa   :  { %2069 = vmax.xlane.f32.xlu0 %v2068_v33 }
 0x6fb   :  { %2186 = vmax.xlane.f32.xlu1 %v2185_v11 }
 0x6fe   :  { %2189 = vmax.xlane.f32.xlu0 %v2188_v60 }
 0x70a   :  { %v3624_v48 = vpop.f32.mrb[12].mxu0 }
 0x70b   :  { %v5376_v43 = vadd.f32 %v3624_v48, %v3295_v49  ;;  %v1952_v51 = vpop.f32.mrb[13].mxu0 }
 0x70c   :  { %v5378_v41 = vadd.f32 %v3295_v49, %v1952_v51 }
 0x70d   :  { %v2074_v10 = vsel %vm511_vm6, %v5376_v43, -inf  ;;  %v2194_v31 = vsel %vm632_vm5, %v5376_v43, -inf }
 0x70e   :  { %2075 = vmax.xlane.f32.xlu0 %v2074_v10  ;;  %v2071_v22 = vsel %vm511_vm6, %v5378_v41, -inf  ;;  %v2191_v26 = vsel %vm632_vm5, %v5378_v41, -inf }
 0x70f   :  { %2072 = vmax.xlane.f32.xlu1 %v2071_v22 }
 0x712   :  { %2195 = vmax.xlane.f32.xlu0 %v2194_v31 }
 0x713   :  { %2192 = vmax.xlane.f32.xlu1 %v2191_v26 }
 0x729   :  { %v3627_v57 = vpop.f32.mrb[14].mxu0 }
 0x72a   :  { %v5388_v20 = vadd.f32 %v3627_v57, %v3295_v49  ;;  %v1962_v7 = vpop.f32.mrb[15].mxu0 }
 0x72b   :  { %v5390_v37 = vadd.f32 %v3295_v49, %v1962_v7 }
 0x72c   :  { %v2080_v42 = vsel %vm511_vm6, %v5388_v20, -inf  ;;  %v2200_v25 = vsel %vm632_vm5, %v5388_v20, -inf }
 0x72d   :  { %2081 = vmax.xlane.f32.xlu0 %v2080_v42  ;;  %v2077_v17 = vsel %vm511_vm6, %v5390_v37, -inf  ;;  %v2197_v45 = vsel %vm632_vm5, %v5390_v37, -inf }
 0x72e   :  { %2078 = vmax.xlane.f32.xlu1 %v2077_v17 }
 0x731   :  { %2201 = vmax.xlane.f32.xlu0 %v2200_v25 }
 0x732   :  { %2198 = vmax.xlane.f32.xlu1 %v2197_v45 }
 0x735   :  { %1972 = vmax.xlane.f32.xlu0 %v1971_v0 }
 0x77b   :  { %v2064_v32 = vpop.xlane.xlu1 %2063  ;;  %v2184_v53 = vpop.xlane.xlu0 %2183 }
 0x77c   :  { %v2084_v38 = vsub.f32 %v5352_v5, %v2064_v32  ;;  %v2204_v55 = vsub.f32 %v5352_v5, %v2184_v53 }
 0x77e   :  { %v2093_v19 = vmul.f32 1.442695, %v2084_v38  ;;  %v2213_v9 = vmul.f32 1.442695, %v2204_v55 }
 0x77f   :  { %v2061_v27 = vpop.xlane.xlu0 %2060 }
 0x780   :  { %4046 = vpow2.f32 %v2093_v19  ;;  %v2083_v61 = vsub.f32 %v5354_v15, %v2061_v27  ;;  %v1977_v19 = vsel %vm422_vm7, %v5362_v1, -inf }
 0x781   :  { %4048 = vpow2.f32 %v2213_v9 }
 0x782   :  { %v2091_v18 = vmul.f32 1.442695, %v2083_v61 }
 0x783   :  { %v2181_v24 = vpop.xlane.xlu0 %2180 }
 0x784   :  { %4050 = vpow2.f32 %v2091_v18  ;;  %v2203_v40 = vsub.f32 %v5354_v15, %v2181_v24  ;;  %v2067_v4 = vpop.xlane.xlu1 %2066 }
 0x785   :  { %v2085_v50 = vsub.f32 %v5362_v1, %v2067_v4 }
 0x786   :  { %v2211_v14 = vmul.f32 1.442695, %v2203_v40 }
 0x787   :  { %v2095_v52 = vmul.f32 1.442695, %v2085_v50  ;;  %v2070_v13 = vpop.xlane.xlu0 %2069  ;;  %v1974_v50 = vsel %vm422_vm7, %v5352_v5, -inf }
 0x788   :  { %4052 = vpow2.f32 %v2211_v14  ;;  %v2086_v2 = vsub.f32 %v5364_v46, %v2070_v13  ;;  %v2187_v35 = vpop.xlane.xlu1 %2186  ;;  %v1983_v14 = vsel %vm422_vm7, %v5378_v41, -inf }
 0x789   :  { %4054 = vpow2.f32 %v2095_v52  ;;  %v2205_v6 = vsub.f32 %v5362_v1, %v2187_v35  ;;  %v1989_v52 = vsel %vm422_vm7, %v5390_v37, -inf }
 0x78a   :  { %v5409_v3 = vpop.eup %4046  ;;  %v2097_v8 = vmul.f32 1.442695, %v2086_v2 }
 0x78b   :  { %v5411_v62 = vpop.eup %4048  ;;  %v2215_v23 = vmul.f32 1.442695, %v2205_v6  ;;  %2117 = vrot.lane.b32.xlu0 %v5409_v3, %s4188_s15  ;;  %v2190_v36 = vpop.xlane.xlu0 %2189 }
 0x78c   :  { %4056 = vpow2.f32 %v2097_v8  ;;  %2237 = vrot.lane.b32.xlu1 %v5411_v62, %s4189_s16  ;;  %v2206_v58 = vsub.f32 %v5364_v46, %v2190_v36 }
 0x78d   :  { %4058 = vpow2.f32 %v2215_v23 }
 0x78e   :  { %v5418_v28 = vpop.eup %4050  ;;  %v2217_v21 = vmul.f32 1.442695, %v2206_v58 }
 0x790   :  { %4060 = vpow2.f32 %v2217_v21  ;;  %2115 = vrot.lane.b32.xlu1 %v5418_v28, %s4188_s15  ;;  %v1980_v21 = vsel %vm422_vm7, %v5364_v46, -inf }
 0x792   :  { %v5422_v49 = vpop.eup %4052 }
 0x793   :  { %v5424_v39 = vpop.eup %4054 }
 0x794   :  { %2235 = vrot.lane.b32.xlu1 %v5422_v49, %s4189_s16  ;;  %2119 = vrot.lane.b32.xlu0 %v5424_v39, %s4188_s15 }
 0x796   :  { %v5430_v30 = vpop.eup %4056 }
 0x797   :  { %v5432_v56 = vpop.eup %4058 }
 0x798   :  { %2121 = vrot.lane.b32.xlu1 %v5430_v30, %s4188_s15  ;;  %2239 = vrot.lane.b32.xlu0 %v5432_v56, %s4189_s16 }
 0x79a   :  { %v5438_v47 = vpop.eup %4060 }
 0x79b   :  { %v2076_v59 = vpop.xlane.xlu0 %2075 }
 0x79c   :  { %2241 = vrot.lane.b32.xlu1 %v5438_v47, %s4189_s16  ;;  %v2088_v63 = vsub.f32 %v5376_v43, %v2076_v59  ;;  %v2073_v44 = vpop.xlane.xlu1 %2072 }
 0x79d   :  { %v2087_v54 = vsub.f32 %v5378_v41, %v2073_v44 }
 0x79e   :  { %v2101_v29 = vmul.f32 1.442695, %v2088_v63  ;;  %v1986_v63 = vsel %vm422_vm7, %v5376_v43, -inf }
 0x79f   :  { %v2099_v33 = vmul.f32 1.442695, %v2087_v54  ;;  %v2196_v11 = vpop.xlane.xlu0 %2195 }
 0x7a0   :  { %4062 = vpow2.f32 %v2101_v29  ;;  %v2208_v60 = vsub.f32 %v5376_v43, %v2196_v11  ;;  %v2193_v48 = vpop.xlane.xlu1 %2192  ;;  %v1992_v29 = vsel %vm422_vm7, %v5388_v20, -inf }
 0x7a1   :  { %4064 = vpow2.f32 %v2099_v33  ;;  %v2207_v51 = vsub.f32 %v5378_v41, %v2193_v48 }
 0x7a2   :  { %v2221_v10 = vmul.f32 1.442695, %v2208_v60 }
 0x7a3   :  { %v2219_v22 = vmul.f32 1.442695, %v2207_v51 }
 0x7a4   :  { %4066 = vpow2.f32 %v2221_v10 }
 0x7a5   :  { %4068 = vpow2.f32 %v2219_v22 }
 0x7aa   :  { %v5446_v31 = vpop.eup %4062 }
 0x7ab   :  { %v5448_v26 = vpop.eup %4064  ;;  %2125 = vrot.lane.b32.xlu1 %v5446_v31, %s4188_s15 }
 0x7ac   :  { %2123 = vrot.lane.b32.xlu0 %v5448_v26, %s4188_s15 }
 0x7ae   :  { %v5454_v57 = vpop.eup %4066 }
 0x7af   :  { %v5456_v7 = vpop.eup %4068  ;;  %2245 = vrot.lane.b32.xlu1 %v5454_v57, %s4189_s16 }
 0x7b0   :  { %2243 = vrot.lane.b32.xlu0 %v5456_v7, %s4189_s16 }
 0x7ba   :  { %v2082_v42 = vpop.xlane.xlu0 %2081 }
 0x7bb   :  { %v2090_v17 = vsub.f32 %v5388_v20, %v2082_v42  ;;  %v2079_v55 = vpop.xlane.xlu1 %2078 }
 0x7bc   :  { %v2089_v9 = vsub.f32 %v5390_v37, %v2079_v55 }
 0x7bd   :  { %v2105_v25 = vmul.f32 1.442695, %v2090_v17 }
 0x7be   :  { %v2202_v45 = vpop.xlane.xlu0 %2201  ;;  %v2103_v61 = vmul.f32 1.442695, %v2089_v9 }
 0x7bf   :  { %4070 = vpow2.f32 %v2105_v25  ;;  %v2210_v0 = vsub.f32 %v5388_v20, %v2202_v45  ;;  %v2199_v27 = vpop.xlane.xlu1 %2198 }
 0x7c0   :  { %v2209_v18 = vsub.f32 %v5390_v37, %v2199_v27 }
 0x7c1   :  { %v2225_v32 = vmul.f32 1.442695, %v2210_v0 }
 0x7c2   :  { %v2223_v24 = vmul.f32 1.442695, %v2209_v18  ;;  %v1973_v13 = vpop.xlane.xlu0 %1972 }
 0x7c3   :  { %4072 = vpow2.f32 %v2225_v32  ;;  %v1995_v18 = vsub.f32 %v5354_v15, %v1973_v13  ;;  %v3315_v15 = vld [vmem:[%s5884_s6 + $0x78] sm:$0xff] }
 0x7c4   :  { %4074 = vpow2.f32 %v2103_v61 }
 0x7c5   :  { %4076 = vpow2.f32 %v2223_v24  ;;  %v3312_v24 = vld [vmem:[%s5884_s6 + $0x60] sm:$0xff] }
 0x7c9   :  { %v5464_v53 = vpop.eup %4070 }
 0x7ca   :  { %2129 = vrot.lane.b32.xlu1 %v5464_v53, %s4188_s15 }
 0x7cd   :  { %v5468_v38 = vpop.eup %4072 }
 0x7ce   :  { %2249 = vrot.lane.b32.xlu1 %v5468_v38, %s4189_s16  ;;  %v5476_v40 = vpop.eup %4074 }
 0x7cf   :  { %1978 = vmax.xlane.f32.xlu0 %v1977_v19  ;;  %v5480_v4 = vpop.eup %4076 }
 0x7e5   :  { %2127 = vrot.lane.b32.xlu0 %v5476_v40, %s4188_s15 }
 0x7e9   :  { %2247 = vrot.lane.b32.xlu0 %v5480_v4, %s4189_s16 }
 0x7f2   :  { %1975 = vmax.xlane.f32.xlu1 %v1974_v50  ;;  %v3313_v50 = vld [vmem:[%s5884_s6 + $0x68] sm:$0xff] }
 0x7f6   :  { %1984 = vmax.xlane.f32.xlu1 %v1983_v14  ;;  %v3816_v14 = vpack.c.bf16 %v3313_v50, %v3312_v24 }
 0x7f8   :  { %3817 = vmatprep.subr.bf16.mxu1 %v3816_v14 }
 0x7f9   :  { %3819 = vmatpush3.bf16.msra.mxu1 %v3816_v14 }
 0x7fa   :  { %1990 = vmax.xlane.f32.xlu1 %v1989_v52  ;;  %v2003_v52 = vmul.f32 1.442695, %v1995_v18 }
 0x7fc   :  { %4078 = vpow2.f32 %v2003_v52 }
 0x7fd   :  { %v2118_v35 = vpop.permute.xlu0 %2117 }
 0x7fe   :  { %v2238_v2 = vpop.permute.xlu1 %2237  ;;  %v2142_v33 = vsel %vm422_vm7, %v2118_v35, 0.0 }
 0x7ff   :  { %v2262_v60 = vsel %vm422_vm7, %v2238_v2, 0.0  ;;  %v3314_v2 = vld [vmem:[%s5884_s6 + $0x70] sm:$0xff] }
 0x800   :  { %v3820_v13 = vpack.c.bf16 %v3315_v15, %v3314_v2 }
 0x802   :  { %v2116_v6 = vpop.permute.xlu1 %2115  ;;  %3821 = vmatprep.subr.bf16.mxu1 %v3820_v13 }
 0x803   :  { %v2139_v8 = vsel %vm422_vm7, %v2116_v6, 0.0  ;;  %3823 = vmatpush3.bf16.msra.mxu1 %v3820_v13 }
 0x804   :  { %2140 = vadd.xlane.f32.xlu1 %v2139_v8  ;;  %v3316_v8 = vld [vmem:[%s5884_s6 + $0x80] sm:$0xff] }
 0x806   :  { %v2236_v23 = vpop.permute.xlu1 %2235  ;;  %v2120_v36 = vpop.permute.xlu0 %2119 }
 0x807   :  { %v2259_v58 = vsel %vm422_vm7, %v2236_v23, 0.0  ;;  %v2145_v59 = vsel %vm422_vm7, %v2120_v36, 0.0  ;;  %v3317_v23 = vld [vmem:[%s5884_s6 + $0x88] sm:$0xff]  ;;  %v3318_v36 = vld [vmem:[%s5884_s6 + $0x90] sm:$0xff] }
 0x808   :  { %2260 = vadd.xlane.f32.xlu1 %v2259_v58  ;;  %1981 = vmax.xlane.f32.xlu0 %v1980_v21  ;;  %v3638_v58 = vpop.f32.mrb[16].mxu0  ;;  %v3824_v21 = vpack.c.bf16 %v3317_v23, %v3316_v8 }
 0x80a   :  { %v2240_v44 = vpop.permute.xlu0 %2239  ;;  %v2122_v11 = vpop.permute.xlu1 %2121  ;;  %3825 = vmatprep.subr.bf16.mxu1 %v3824_v21 }
 0x80b   :  { %v2265_v54 = vsel %vm422_vm7, %v2240_v44, 0.0  ;;  %v2148_v51 = vsel %vm422_vm7, %v2122_v11, 0.0  ;;  %3827 = vmatpush3.bf16.msra.mxu1 %v3824_v21 }
 0x80c   :  { %2146 = vadd.xlane.f32.xlu1 %v2145_v59  ;;  %1987 = vmax.xlane.f32.xlu0 %v1986_v63  ;;  %v3319_v59 = vld [vmem:[%s5884_s6 + $0x98] sm:$0xff] }
 0x80d   :  { %v3828_v44 = vpack.c.bf16 %v3319_v59, %v3318_v36 }
 0x80e   :  { %v2242_v48 = vpop.permute.xlu1 %2241 }
 0x80f   :  { %v2268_v42 = vsel %vm422_vm7, %v2242_v48, 0.0  ;;  %3829 = vmatprep.subr.bf16.mxu1 %v3828_v44  ;;  %v3322_v48 = vld [vmem:[%s5884_s6 + $0xb0] sm:$0xff] }
 0x810   :  { %2266 = vadd.xlane.f32.xlu1 %v2265_v54  ;;  %1993 = vmax.xlane.f32.xlu0 %v1992_v29  ;;  %v3320_v54 = vld [vmem:[%s5884_s6 + $0xa0] sm:$0xff]  ;;  %v3321_v29 = vld [vmem:[%s5884_s6 + $0xa8] sm:$0xff] }
 0x811   :  { %3831 = vmatpush3.bf16.msra.mxu1 %v3828_v44 }
 0x814   :  { %2143 = vadd.xlane.f32.xlu0 %v2142_v33 }
 0x818   :  { %2263 = vadd.xlane.f32.xlu0 %v2262_v60  ;;  %v3832_v60 = vpack.c.bf16 %v3321_v29, %v3320_v54 }
 0x81a   :  { %3833 = vmatprep.subr.bf16.mxu1 %v3832_v60 }
 0x81b   :  { %3835 = vmatpush3.bf16.msra.mxu1 %v3832_v60 }
 0x81c   :  { %2149 = vadd.xlane.f32.xlu0 %v2148_v51  ;;  %v3323_v51 = vld [vmem:[%s5884_s6 + $0xb8] sm:$0xff] }
 0x81d   :  { %v2126_v10 = vpop.permute.xlu1 %2125 }
 0x81e   :  { %v2124_v22 = vpop.permute.xlu0 %2123  ;;  %v2154_v45 = vsel %vm422_vm7, %v2126_v10, 0.0 }
 0x81f   :  { %v2151_v17 = vsel %vm422_vm7, %v2124_v22, 0.0 }
 0x820   :  { %2269 = vadd.xlane.f32.xlu0 %v2268_v42  ;;  %2152 = vadd.xlane.f32.xlu1 %v2151_v17  ;;  %v5551_v42 = vpop.eup %4078  ;;  %v3836_v17 = vpack.c.bf16 %v3323_v51, %v3322_v48 }
 0x821   :  { %v2246_v32 = vpop.permute.xlu1 %2245 }
 0x822   :  { %v2244_v25 = vpop.permute.xlu0 %2243  ;;  %v2274_v55 = vsel %vm422_vm7, %v2246_v32, 0.0  ;;  %3837 = vmatprep.subr.bf16.mxu1 %v3836_v17 }
 0x823   :  { %v2271_v0 = vsel %vm422_vm7, %v2244_v25, 0.0  ;;  %v2019_v25 = vsel %vm422_vm7, %v5551_v42, 0.0  ;;  %3839 = vmatpush3.bf16.msra.mxu1 %v3836_v17 }
 0x824   :  { %2155 = vadd.xlane.f32.xlu0 %v2154_v45  ;;  %2272 = vadd.xlane.f32.xlu1 %v2271_v0 }
 0x828   :  { %2275 = vadd.xlane.f32.xlu0 %v2274_v55 }
 0x83c   :  { %v2130_v19 = vpop.permute.xlu1 %2129 }
 0x83d   :  { %v2160_v9 = vsel %vm422_vm7, %v2130_v19, 0.0 }
 0x83e   :  { %2161 = vadd.xlane.f32.xlu0 %v2160_v9 }
 0x840   :  { %v2250_v27 = vpop.permute.xlu1 %2249 }
 0x841   :  { %v2280_v61 = vsel %vm422_vm7, %v2250_v27, 0.0 }
 0x842   :  { %2281 = vadd.xlane.f32.xlu0 %v2280_v61 }
 0x85c   :  { %v1979_v35 = vpop.xlane.xlu0 %1978 }
 0x85d   :  { %v1997_v6 = vsub.f32 %v5362_v1, %v1979_v35  ;;  %v2461_v1 = vpop.f32.mrb[17].mxu0 }
 0x85e   :  { %3680 = vmatprep.mubr.msk.f32.mxu1 %vm292_vm4, %v2461_v1  ;;  %v3641_v32 = vpop.f32.mrb[18].mxu0 }
 0x85f   :  { %v2007_v63 = vmul.f32 1.442695, %v1997_v6  ;;  %3681 = vmatmul.mubr.msk.f32.vlgmr.msra.gmra.mrb[24].mxu1 %vm292_vm4, %v3638_v58  ;;  %v2471_v55 = vpop.f32.mrb[19].mxu0 }
 0x860   :  { %v2128_v33 = vpop.permute.xlu0 %2127  ;;  %3683 = vmatprep.mubr.msk.f32.mxu1 %vm292_vm4, %v2471_v55  ;;  %v3652_v19 = vpop.f32.mrb[20].mxu0 }
 0x861   :  { %4080 = vpow2.f32 %v2007_v63  ;;  %v2157_v11 = vsel %vm422_vm7, %v2128_v33, 0.0  ;;  %v2546_v9 = vpop.f32.mrb[21].mxu0 }
 0x862   :  { %2158 = vadd.xlane.f32.xlu1 %v2157_v11  ;;  %v3655_v18 = vpop.f32.mrb[22].mxu0 }
 0x863   :  { %3684 = vmatmul.mubr.msk.f32.gmra.mrb[26].mxu1 %vm292_vm4, %v3641_v32  ;;  %v2556_v50 = vpop.f32.mrb[23].mxu0 }
 0x864   :  { %v2248_v10 = vpop.permute.xlu0 %2247  ;;  %3686 = vmatprep.mubr.msk.f32.mxu1 %vm292_vm4, %v2546_v9 }
 0x865   :  { %v2277_v22 = vsel %vm422_vm7, %v2248_v10, 0.0 }
 0x866   :  { %2278 = vadd.xlane.f32.xlu1 %v2277_v22 }
 0x867   :  { %3687 = vmatmul.mubr.msk.f32.gmra.mrb[28].mxu1 %vm292_vm4, %v3652_v19 }
 0x868   :  { %3689 = vmatprep.mubr.msk.f32.mxu1 %vm292_vm4, %v2556_v50 }
 0x86a   :  { %2020 = vadd.xlane.f32.xlu1 %v2019_v25 }
 0x86b   :  { %v5555_v45 = vpop.eup %4080  ;;  %3690 = vmatmul.mubr.msk.f32.gmra.mrb[30].mxu1 %vm292_vm4, %v3655_v18 }
 0x86c   :  { %v2025_v0 = vsel %vm422_vm7, %v5555_v45, 0.0 }
 0x86e   :  { %2026 = vadd.xlane.f32.xlu1 %v2025_v0 }
 0x87f   :  { %v1976_v27 = vpop.xlane.xlu1 %1975 }
 0x880   :  { %v1996_v61 = vsub.f32 %v5352_v5, %v1976_v27 }
 0x882   :  { %v2005_v24 = vmul.f32 1.442695, %v1996_v61 }
 0x883   :  { %v1985_v14 = vpop.xlane.xlu1 %1984 }
 0x884   :  { %4082 = vpow2.f32 %v2005_v24  ;;  %v1999_v52 = vsub.f32 %v5378_v41, %v1985_v14 }
 0x886   :  { %v2011_v2 = vmul.f32 1.442695, %v1999_v52 }
 0x887   :  { %v1991_v15 = vpop.xlane.xlu1 %1990 }
 0x888   :  { %4084 = vpow2.f32 %v2011_v2  ;;  %v2001_v13 = vsub.f32 %v5390_v37, %v1991_v15 }
 0x88a   :  { %v2015_v35 = vmul.f32 1.442695, %v2001_v13 }
 0x88c   :  { %4086 = vpow2.f32 %v2015_v35 }
 0x88e   :  { %v5569_v6 = vpop.eup %4082 }
 0x88f   :  { %v2022_v5 = vsel %vm422_vm7, %v5569_v6, 0.0 }
 0x890   :  { %2023 = vadd.xlane.f32.xlu0 %v2022_v5 }
 0x891   :  { %v2141_v11 = vpop.xlane.xlu1 %2140 }
 0x892   :  { %v5573_v8 = vpop.eup %4084 }
 0x893   :  { %v2031_v41 = vsel %vm422_vm7, %v5573_v8, 0.0 }
 0x894   :  { %2032 = vadd.xlane.f32.xlu1 %v2031_v41 }
 0x895   :  { %v1982_v23 = vpop.xlane.xlu0 %1981 }
 0x896   :  { %v5577_v36 = vpop.eup %4086  ;;  %v1998_v58 = vsub.f32 %v5364_v46, %v1982_v23 }
 0x897   :  { %v2037_v37 = vsel %vm422_vm7, %v5577_v36, 0.0 }
 0x898   :  { %v2009_v21 = vmul.f32 1.442695, %v1998_v58  ;;  %2038 = vadd.xlane.f32.xlu1 %v2037_v37 }
 0x899   :  { %v1988_v59 = vpop.xlane.xlu0 %1987 }
 0x89a   :  { %4088 = vpow2.f32 %v2009_v21  ;;  %v2000_v1 = vsub.f32 %v5376_v43, %v1988_v59  ;;  %v2261_v43 = vpop.xlane.xlu1 %2260 }
 0x89c   :  { %v2013_v63 = vmul.f32 1.442695, %v2000_v1 }
 0x89d   :  { %v1994_v44 = vpop.xlane.xlu0 %1993 }
 0x89e   :  { %4090 = vpow2.f32 %v2013_v63  ;;  %v2002_v54 = vsub.f32 %v5388_v20, %v1994_v44  ;;  %v2147_v19 = vpop.xlane.xlu1 %2146 }
 0x8a0   :  { %v2017_v29 = vmul.f32 1.442695, %v2002_v54 }
 0x8a1   :  { %v2144_v33 = vpop.xlane.xlu0 %2143 }
 0x8a2   :  { %4092 = vpow2.f32 %v2017_v29  ;;  %v2267_v18 = vpop.xlane.xlu1 %2266 }
 0x8a4   :  { %v5584_v60 = vpop.eup %4088 }
 0x8a5   :  { %v2264_v46 = vpop.xlane.xlu0 %2263  ;;  %v2028_v48 = vsel %vm422_vm7, %v5584_v60, 0.0 }
 0x8a6   :  { %4094 = vrcp.f32 %v2264_v46  ;;  %2029 = vadd.xlane.f32.xlu0 %v2028_v48 }
 0x8a7   :  { %4096 = vrcp.f32 %v2141_v11 }
 0x8a8   :  { %v5588_v51 = vpop.eup %4090  ;;  %4098 = vrcp.f32 %v2261_v43 }
 0x8a9   :  { %v2150_v10 = vpop.xlane.xlu0 %2149  ;;  %v2034_v20 = vsel %vm422_vm7, %v5588_v51, 0.0 }
 0x8aa   :  { %2035 = vadd.xlane.f32.xlu0 %v2034_v20  ;;  %4100 = vrcp.f32 %v2150_v10 }
 0x8ac   :  { %v5592_v22 = vpop.eup %4092 }
 0x8ad   :  { %v2270_v17 = vpop.xlane.xlu0 %2269  ;;  %v2040_v25 = vsel %vm422_vm7, %v5592_v22, 0.0 }
 0x8ae   :  { %2041 = vadd.xlane.f32.xlu0 %v2040_v25  ;;  %4102 = vrcp.f32 %v2270_v17 }
 0x8af   :  { %4104 = vrcp.f32 %v2144_v33 }
 0x8b0   :  { %v4095_v0 = vpop.eup %4094 }
 0x8b1   :  { %v2292_v32 = vmul.f32 %v4095_v0, %v5411_v62  ;;  %v4097_v55 = vpop.eup %4096  ;;  %v2156_v9 = vpop.xlane.xlu0 %2155 }
 0x8b2   :  { %v2171_v27 = vmul.f32 %v4097_v55, %v5418_v28  ;;  %v4099_v61 = vpop.eup %4098  ;;  %4106 = vrcp.f32 %v2156_v9  ;;  %v2153_v62 = vpop.xlane.xlu1 %2152 }
 0x8b3   :  { %2349 = vrot.lane.b32.xlu1 %v2292_v32, %s4189_s16  ;;  %4108 = vrcp.f32 %v2147_v19  ;;  %v2291_v50 = vmul.f32 %v4099_v61, %v5422_v49 }
 0x8b4   :  { %v4101_v14 = vpop.eup %4100 }
 0x8b5   :  { %v2276_v24 = vpop.xlane.xlu0 %2275  ;;  %v2174_v52 = vmul.f32 %v4101_v14, %v5430_v30 }
 0x8b6   :  { %4110 = vrcp.f32 %v2276_v24  ;;  %v2273_v35 = vpop.xlane.xlu1 %2272 }
 0x8b7   :  { %2307 = vrot.lane.b32.xlu1 %v2171_v27, %s4188_s15  ;;  %4112 = vrcp.f32 %v2267_v18 }
 0x8b8   :  { %v4103_v2 = vpop.eup %4102  ;;  %4114 = vrcp.f32 %v2153_v62 }
 0x8b9   :  { %v4105_v15 = vpop.eup %4104  ;;  %v2294_v28 = vmul.f32 %v4103_v2, %v5438_v47  ;;  %4116 = vrcp.f32 %v2273_v35 }
 0x8ba   :  { %v2172_v5 = vmul.f32 %v4105_v15, %v5409_v3 }
 0x8bb   :  { %2347 = vrot.lane.b32.xlu1 %v2291_v50, %s4189_s16 }
 0x8bc   :  { %v4107_v13 = vpop.eup %4106 }
 0x8bd   :  { %v4109_v49 = vpop.eup %4108  ;;  %v2176_v41 = vmul.f32 %v4107_v13, %v5446_v31 }
 0x8be   :  { %v2173_v23 = vmul.f32 %v4109_v49, %v5424_v39 }
 0x8bf   :  { %2313 = vrot.lane.b32.xlu1 %v2174_v52, %s4188_s15 }
 0x8c0   :  { %v4111_v30 = vpop.eup %4110 }
 0x8c1   :  { %v4113_v58 = vpop.eup %4112  ;;  %v2296_v47 = vmul.f32 %v4111_v30, %v5454_v57 }
 0x8c2   :  { %v2293_v3 = vmul.f32 %v4113_v58, %v5432_v56  ;;  %v4115_v37 = vpop.eup %4114 }
 0x8c3   :  { %2353 = vrot.lane.b32.xlu1 %v2294_v28, %s4189_s16  ;;  %v2175_v31 = vmul.f32 %v4115_v37, %v5448_v26  ;;  %v4117_v59 = vpop.eup %4116 }
 0x8c4   :  { %2309 = vrot.lane.b32.xlu0 %v2172_v5, %s4188_s15  ;;  %v2295_v1 = vmul.f32 %v4117_v59, %v5456_v7 }
 0x8c7   :  { %2317 = vrot.lane.b32.xlu1 %v2176_v41, %s4188_s15 }
 0x8c8   :  { %2311 = vrot.lane.b32.xlu0 %v2173_v23, %s4188_s15 }
 0x8cb   :  { %2357 = vrot.lane.b32.xlu1 %v2296_v47, %s4189_s16  ;;  %v2162_v21 = vpop.xlane.xlu0 %2161 }
 0x8cc   :  { %4118 = vrcp.f32 %v2162_v21  ;;  %2351 = vrot.lane.b32.xlu0 %v2293_v3, %s4189_s16 }
 0x8cf   :  { %v2282_v39 = vpop.xlane.xlu0 %2281 }
 0x8d0   :  { %4120 = vrcp.f32 %v2282_v39  ;;  %2315 = vrot.lane.b32.xlu0 %v2175_v31, %s4188_s15 }
 0x8d4   :  { %2355 = vrot.lane.b32.xlu0 %v2295_v1, %s4189_s16 }
 0x8d6   :  { %v4119_v57 = vpop.eup %4118 }
 0x8d7   :  { %v2178_v56 = vmul.f32 %v4119_v57, %v5464_v53 }
 0x8d9   :  { %2321 = vrot.lane.b32.xlu1 %v2178_v56, %s4188_s15 }
 0x8da   :  { %v4121_v63 = vpop.eup %4120 }
 0x8db   :  { %v2298_v44 = vmul.f32 %v4121_v63, %v5468_v38 }
 0x8dd   :  { %2361 = vrot.lane.b32.xlu1 %v2298_v44, %s4189_s16 }
 0x8ef   :  { %v2159_v26 = vpop.xlane.xlu1 %2158 }
 0x8f0   :  { %4122 = vrcp.f32 %v2159_v26 }
 0x8f3   :  { %v2279_v54 = vpop.xlane.xlu1 %2278 }
 0x8f4   :  { %4124 = vrcp.f32 %v2279_v54 }
 0x8f7   :  { %v2021_v53 = vpop.xlane.xlu1 %2020 }
 0x8f8   :  { %4126 = vrcp.f32 %v2021_v53 }
 0x8fa   :  { %v4123_v29 = vpop.eup %4122 }
 0x8fb   :  { %v2177_v33 = vmul.f32 %v4123_v29, %v5476_v40  ;;  %v2027_v46 = vpop.xlane.xlu1 %2026 }
 0x8fd   :  { %2319 = vrot.lane.b32.xlu0 %v2177_v33, %s4188_s15 }
 0x8fe   :  { %v4125_v7 = vpop.eup %4124 }
 0x8ff   :  { %v2297_v11 = vmul.f32 %v4125_v7, %v5480_v4 }
 0x901   :  { %2359 = vrot.lane.b32.xlu0 %v2297_v11, %s4189_s16 }
 0x902   :  { %v4127_v10 = vpop.eup %4126 }
 0x903   :  { %v2051_v25 = vmul.f32 %v4127_v10, %v5551_v42 }
 0x91d   :  { %v2024_v17 = vpop.xlane.xlu0 %2023 }
 0x91e   :  { %4128 = vrcp.f32 %v2024_v17 }
 0x921   :  { %v2033_v38 = vpop.xlane.xlu1 %2032 }
 0x925   :  { %v5628_v48 = vpop.xlane.xlu1 %2038 }
 0x928   :  { %v4129_v42 = vpop.eup %4128 }
 0x929   :  { %v2350_v43 = vpop.permute.xlu1 %2349  ;;  %v2052_v24 = vmul.f32 %v4129_v42, %v5569_v6 }
 0x92d   :  { %v2308_v20 = vpop.permute.xlu1 %2307 }
 0x92e   :  { %v2331_v40 = vadd.f32 %v2308_v20, %v2051_v25 }
 0x931   :  { %v2348_v0 = vpop.permute.xlu1 %2347 }
 0x932   :  { %v2371_v32 = vadd.f32 %v2348_v0, %v2331_v40  ;;  %v5641_v41 = vpop.f32.mrb[24].mxu1 }
 0x933   :  { %v2030_v55 = vpop.xlane.xlu0 %2029 }
 0x934   :  { %v5631_v4 = vmul.f32 0.33333334, %v2371_v32  ;;  %4130 = vrcp.f32 %v2030_v55 }
 0x935   :  { %v2314_v19 = vpop.permute.xlu1 %2313  ;;  %4132 = vrcp.f32 %v2027_v46 }
 0x936   :  { %2387 = vst.msk [vmem:[%s5892_s14] sm:$0xff] %vm422_vm7, %v5631_v4 }
 0x937   :  { %v2036_v9 = vpop.xlane.xlu0 %2035 }
 0x938   :  { %4134 = vrcp.f32 %v2036_v9 }
 0x939   :  { %v2354_v27 = vpop.permute.xlu1 %2353  ;;  %4136 = vrcp.f32 %v2033_v38 }
 0x93b   :  { %v2042_v61 = vpop.xlane.xlu0 %2041 }
 0x93c   :  { %4138 = vrcp.f32 %v2042_v61 }
 0x93d   :  { %v2318_v62 = vpop.permute.xlu1 %2317  ;;  %4140 = vrcp.f32 %v5628_v48 }
 0x93e   :  { %v4131_v18 = vpop.eup %4130 }
 0x93f   :  { %v2054_v50 = vmul.f32 %v4131_v18, %v5584_v60  ;;  %v2310_v14 = vpop.permute.xlu0 %2309  ;;  %v4133_v2 = vpop.eup %4132 }
 0x940   :  { %v2332_v52 = vadd.f32 %v2310_v14, %v2052_v24  ;;  %v2053_v6 = vmul.f32 %v4133_v2, %v5555_v45 }
 0x941   :  { %v2334_v15 = vadd.f32 %v2314_v19, %v2054_v50  ;;  %v2358_v58 = vpop.permute.xlu1 %2357 }
 0x942   :  { %v4135_v28 = vpop.eup %4134  ;;  %v2372_v13 = vadd.f32 %v2350_v43, %v2332_v52 }
 0x943   :  { %v2374_v35 = vadd.f32 %v2354_v27, %v2334_v15  ;;  %v2056_v5 = vmul.f32 %v4135_v28, %v5588_v51  ;;  %v2312_v49 = vpop.permute.xlu0 %2311  ;;  %v5655_v51 = vpop.f32.mrb[25].mxu1 }
 0x944   :  { %v5643_v30 = vmul.f32 0.33333334, %v2372_v13  ;;  %v2333_v47 = vadd.f32 %v2312_v49, %v2053_v6  ;;  %v4137_v37 = vpop.eup %4136  ;;  %v5664_v1 = vpop.f32.mrb[26].mxu1 }
 0x945   :  { %v5646_v23 = vmul.f32 0.33333334, %v2374_v35  ;;  %v2336_v60 = vadd.f32 %v2318_v62, %v2056_v5  ;;  %v2055_v44 = vmul.f32 %v4137_v37, %v5573_v8  ;;  %v5678_v26 = vpop.f32.mrb[27].mxu1 }
 0x946   :  { %2388 = vst.msk [vmem:[%s5892_s14 + $0x8] sm:$0xff] %vm422_vm7, %v5643_v30  ;;  %2856 = vperm.xlu0 %3935, %v5643_v30   ;;  %2776 = vperm.xlu1 %3934, %v5643_v30   ;;  %v4139_v31 = vpop.eup %4138  ;;  %v5680_v33 = vpop.f32.mrb[28].mxu1 }
 0x947   :  { %2390 = vst.msk [vmem:[%s5892_s14 + $0x18] sm:$0xff] %vm422_vm7, %v5646_v23  ;;  %v2376_v45 = vadd.f32 %v2358_v58, %v2336_v60  ;;  %v2352_v3 = vpop.permute.xlu0 %2351  ;;  %v2058_v63 = vmul.f32 %v4139_v31, %v5592_v22  ;;  %v5694_v8 = vpop.f32.mrb[29].mxu1 }
 0x948   :  { %v2373_v21 = vadd.f32 %v2352_v3, %v2333_v47  ;;  %v5702_v43 = vpop.f32.mrb[30].mxu1  ;;  %v4141_v20 = vpop.eup %4140 }
 0x949   :  { %v2384_v59 = vmul.f32 0.33333334, %v2376_v45  ;;  %v5705_v10 = vpop.f32.mrb[31].mxu1  ;;  %v2057_v25 = vmul.f32 %v4141_v20, %v5577_v36 }
 0x94a   :  { %v2381_v39 = vmul.f32 0.33333334, %v2373_v21  ;;  %3936 = vset.pattern.permute.xlu0 %v4191_v16  ;;  %3937 = vset.pattern.permute.xlu1 %v4190_v12 }
 0x94b   :  { %2392 = vst.msk [vmem:[%s5892_s14 + $0x28] sm:$0xff] %vm422_vm7, %v2384_v59  ;;  %v2322_v57 = vpop.permute.xlu1 %2321  ;;  %2772 = vperm.xlu0 %3936, %v5631_v4   ;;  %2852 = vperm.xlu1 %3937, %v5631_v4   ;;  %v2316_v56 = vpop.permute.xlu0 %2315 }
 0x94c   :  { %2389 = vst.msk [vmem:[%s5892_s14 + $0x10] sm:$0xff] %vm422_vm7, %v2381_v39  ;;  %v2338_v54 = vadd.f32 %v2322_v57, %v2058_v63  ;;  %v2335_v29 = vadd.f32 %v2316_v56, %v2055_v44 }
 0x94f   :  { %v2362_v7 = vpop.permute.xlu1 %2361  ;;  %3941 = vset.pattern.permute.xlu0 %v4190_v12  ;;  %3938 = vset.pattern.permute.xlu1 %v4191_v16  ;;  %v2356_v11 = vpop.permute.xlu0 %2355 }
 0x950   :  { %v2378_v53 = vadd.f32 %v2362_v7, %v2338_v54  ;;  %v2375_v46 = vadd.f32 %v2356_v11, %v2335_v29  ;;  %2784 = vperm.xlu1 %3938, %v5646_v23   ;;  %2860 = vperm.xlu0 %3941, %v2381_v39  }
 0x952   :  { %v2386_v22 = vmul.f32 0.33333334, %v2378_v53  ;;  %v2383_v38 = vmul.f32 0.33333334, %v2375_v46 }
 0x954   :  { %2394 = vst.msk [vmem:[%s5892_s14 + $0x38] sm:$0xff] %vm422_vm7, %v2386_v22  ;;  %2391 = vst.msk [vmem:[%s5892_s14 + $0x20] sm:$0xff] %vm422_vm7, %v2383_v38  ;;  %3939 = vset.pattern.permute.xlu1 %v4190_v12  ;;  %2872 = vperm.xlu0 %3941, %v2384_v59  }
 0x955   :  { %2864 = vperm.xlu1 %3939, %v5646_v23  }
 0x958   :  { %3942 = vset.pattern.permute.xlu0 %v4191_v16 }
 0x959   :  { %3940 = vset.pattern.permute.xlu1 %v4191_v16  ;;  %2788 = vperm.xlu0 %3942, %v2383_v38  }
 0x95a   :  { %2780 = vperm.xlu1 %3940, %v2381_v39  }
 0x95d   :  { %3945 = vset.pattern.permute.xlu0 %v4190_v12 }
 0x95e   :  { %2792 = vperm.xlu1 %3940, %v2384_v59  }
 0x962   :  { %3943 = vset.pattern.permute.xlu1 %v4190_v12 }
 0x963   :  { %2868 = vperm.xlu1 %3943, %v2383_v38  }
 0x967   :  { %3944 = vset.pattern.permute.xlu1 %v4191_v16  ;;  %v3325_v16 = vld [vmem:[%s5885_s7 + $0x1] ss:$0 sm:$0xff] }
 0x968   :  { %2800 = vperm.xlu1 %3944, %v2386_v22   ;;  %v2682_v36 = vadd.f32 %v5641_v41, %v3325_v16  ;;  %v2687_v15 = vadd.f32 %v3325_v16, %v5678_v26  ;;  %v2702_v5 = vadd.f32 %v5680_v33, %v3325_v16  ;;  %v2712_v3 = vadd.f32 %v5702_v43, %v3325_v16 }
 0x969   :  { %v2707_v56 = vadd.f32 %v3325_v16, %v5705_v10 }
 0x96a   :  { %v5723_v48 = vmax.f32 %v2682_v36, 0.0  ;;  %v5744_v35 = vmax.f32 %v2687_v15, 0.0 }
 0x96b   :  { %v2721_v63 = vmax.f32 %v2707_v56, 0.0 }
 0x96f   :  { %v2320_v17 = vpop.permute.xlu0 %2319 }
 0x970   :  { %v2337_v40 = vadd.f32 %v2320_v17, %v2057_v25 }
 0x973   :  { %v2360_v0 = vpop.permute.xlu0 %2359 }
 0x974   :  { %v2377_v32 = vadd.f32 %v2360_v0, %v2337_v40 }
 0x976   :  { %v2385_v55 = vmul.f32 0.33333334, %v2377_v32 }
 0x978   :  { %2393 = vst.msk [vmem:[%s5892_s14 + $0x30] sm:$0xff] %vm422_vm7, %v2385_v55  ;;  %2876 = vperm.xlu0 %3945, %v2385_v55   ;;  %2796 = vperm.xlu1 %3944, %v2385_v55  }
 0x97c   :  { %3947 = vset.pattern.permute.xlu0 %v4192_v34  ;;  %3946 = vset.pattern.permute.xlu1 %v4190_v12 }
 0x97d   :  { %2725 = vperm.xlu0 %3947, %v5631_v4   ;;  %2880 = vperm.xlu1 %3946, %v2386_v22   ;;  %v2677_v4 = vadd.f32 %v3325_v16, %v5655_v51 }
 0x97f   :  { %v5728_v42 = vmax.f32 %v2677_v4, 0.0 }
 0x981   :  { %2740 = vperm.xlu0 %3947, %v5646_v23   ;;  %3948 = vset.pattern.permute.xlu1 %v4192_v34  ;;  %v5749_v23 = vmax.f32 %v2702_v5, 0.0 }
 0x982   :  { %2730 = vperm.xlu1 %3948, %v5643_v30   ;;  %v2697_v30 = vadd.f32 %v3325_v16, %v5694_v8 }
 0x984   :  { %v5753_v47 = vmax.f32 %v2697_v30, 0.0 }
 0x985   :  { %2750 = vperm.xlu0 %3947, %v2384_v59   ;;  %v5761_v59 = vmax.f32 %v2712_v3, 0.0 }
 0x986   :  { %2735 = vperm.xlu1 %3948, %v2381_v39  }
 0x989   :  { %2760 = vperm.xlu0 %3947, %v2386_v22  }
 0x98a   :  { %2745 = vperm.xlu1 %3948, %v2383_v38  }
 0x98d   :  { %2755 = vperm.xlu0 %3947, %v2385_v55  }
 0x991   :  { %3949 = vset.pattern.permute.xlu0 %v4190_v12  ;;  %v2692_v12 = vadd.f32 %v5664_v1, %v3325_v16 }
 0x993   :  { %v5734_v50 = vmax.f32 %v2692_v12, 0.0 }
 0x9c5   :  { %v2777_v34 = vpop.permute.xlu1 %2776  ;;  %v2857_v19 = vpop.permute.xlu0 %2856 }
 0x9c6   :  { %v2804_v9 = vmul.f32 %v2777_v34, %v5723_v48  ;;  %v2884_v27 = vmul.f32 %v2857_v19, %v5723_v48 }
 0x9c8   :  { %2821 = vrot.lane.b32.xlu0 %v2804_v9, %s4199_s13  ;;  %2901 = vrot.lane.b32.xlu1 %v2884_v27, %s4186_s0 }
 0x9ca   :  { %v2853_v61 = vpop.permute.xlu1 %2852  ;;  %v2773_v18 = vpop.permute.xlu0 %2772 }
 0x9cb   :  { %v2803_v24 = vmul.f32 %v2773_v18, %v5728_v42  ;;  %v2883_v14 = vmul.f32 %v2853_v61, %v5728_v42 }
 0x9cd   :  { %2819 = vrot.lane.b32.xlu1 %v2803_v24, %s4199_s13 }
 0x9cf   :  { %v2785_v62 = vpop.permute.xlu1 %2784  ;;  %v2861_v2 = vpop.permute.xlu0 %2860 }
 0x9d0   :  { %v2806_v52 = vmul.f32 %v2785_v62, %v5734_v50  ;;  %v2885_v58 = vmul.f32 %v2861_v2, %v5744_v35 }
 0x9d1   :  { %2899 = vrot.lane.b32.xlu1 %v2883_v14, %s4186_s0 }
 0x9d2   :  { %2825 = vrot.lane.b32.xlu0 %v2806_v52, %s4199_s13 }
 0x9d3   :  { %v2873_v49 = vpop.permute.xlu0 %2872 }
 0x9d4   :  { %v2865_v28 = vpop.permute.xlu1 %2864  ;;  %v2888_v37 = vmul.f32 %v2873_v49, %v5749_v23 }
 0x9d5   :  { %v2886_v13 = vmul.f32 %v2865_v28, %v5734_v50 }
 0x9d7   :  { %2905 = vrot.lane.b32.xlu0 %v2886_v13, %s4186_s0 }
 0x9d8   :  { %v2789_v45 = vpop.permute.xlu0 %2788 }
 0x9d9   :  { %v2781_v41 = vpop.permute.xlu1 %2780  ;;  %v2807_v21 = vmul.f32 %v2789_v45, %v5753_v47 }
 0x9da   :  { %v2805_v6 = vmul.f32 %v2781_v41, %v5744_v35 }
 0x9dc   :  { %2823 = vrot.lane.b32.xlu1 %v2805_v6, %s4199_s13 }
 0x9dd   :  { %v2793_v60 = vpop.permute.xlu1 %2792 }
 0x9de   :  { %v2808_v51 = vmul.f32 %v2793_v60, %v5749_v23 }
 0x9e0   :  { %2829 = vrot.lane.b32.xlu0 %v2808_v51, %s4199_s13  ;;  %2903 = vrot.lane.b32.xlu1 %v2885_v58, %s4186_s0 }
 0x9e2   :  { %v2869_v31 = vpop.permute.xlu1 %2868 }
 0x9e3   :  { %v2887_v39 = vmul.f32 %v2869_v31, %v5753_v47 }
 0x9e4   :  { %2909 = vrot.lane.b32.xlu0 %v2888_v37, %s4186_s0  ;;  %2827 = vrot.lane.b32.xlu1 %v2807_v21, %s4199_s13 }
 0x9e7   :  { %v2801_v1 = vpop.permute.xlu1 %2800 }
 0x9e8   :  { %v2810_v57 = vmul.f32 %v2801_v1, %v5761_v59  ;;  %2907 = vrot.lane.b32.xlu1 %v2887_v39, %s4186_s0 }
 0x9ea   :  { %2833 = vrot.lane.b32.xlu0 %v2810_v57, %s4199_s13 }
 0x9f7   :  { %v2797_v44 = vpop.permute.xlu1 %2796  ;;  %v2877_v54 = vpop.permute.xlu0 %2876 }
 0x9f8   :  { %v2809_v26 = vmul.f32 %v2797_v44, %v2721_v63  ;;  %v2889_v29 = vmul.f32 %v2877_v54, %v2721_v63 }
 0x9fa   :  { %2831 = vrot.lane.b32.xlu1 %v2809_v26, %s4199_s13 }
 0x9fc   :  { %v2881_v33 = vpop.permute.xlu1 %2880  ;;  %v2726_v11 = vpop.permute.xlu0 %2725 }
 0x9fd   :  { %v2890_v7 = vmul.f32 %v2881_v33, %v5761_v59  ;;  %v2763_v16 = vmul.f32 %v2726_v11, %v5728_v42 }
 0x9fe   :  { %2911 = vrot.lane.b32.xlu1 %v2889_v29, %s4186_s0 }
 0x9ff   :  { %2913 = vrot.lane.b32.xlu0 %v2890_v7, %s4186_s0 }
 0xa00   :  { %v2741_v53 = vpop.permute.xlu0 %2740 }
 0xa01   :  { %v2731_v46 = vpop.permute.xlu1 %2730  ;;  %v2766_v9 = vmul.f32 %v2741_v53, %v5734_v50 }
 0xa02   :  { %v2764_v20 = vmul.f32 %v2731_v46, %v5723_v48 }
 0xa04   :  { %v2751_v22 = vpop.permute.xlu0 %2750 }
 0xa05   :  { %v2736_v38 = vpop.permute.xlu1 %2735  ;;  %v2768_v2 = vmul.f32 %v2751_v22, %v5749_v23 }
 0xa06   :  { %v2765_v14 = vmul.f32 %v2736_v38, %v5744_v35 }
 0xa08   :  { %v2761_v8 = vpop.permute.xlu0 %2760 }
 0xa09   :  { %v2746_v43 = vpop.permute.xlu1 %2745  ;;  %v2770_v3 = vmul.f32 %v2761_v8, %v5761_v59 }
 0xa0a   :  { %v2767_v49 = vmul.f32 %v2746_v43, %v5753_v47 }
 0xa0c   :  { %v2756_v10 = vpop.permute.xlu0 %2755 }
 0xa0d   :  { %v2769_v51 = vmul.f32 %v2756_v10, %v2721_v63 }
 0xa3a   :  { %v2902_v17 = vpop.permute.xlu1 %2901  ;;  %v2822_v25 = vpop.permute.xlu0 %2821 }
 0xa3b   :  { %v2844_v40 = vadd.f32 %v2822_v25, %v2764_v20 }
 0xa3d   :  { %v2924_v0 = vadd.f32 %v2902_v17, %v2844_v40 }
 0xa3f   :  { %v2820_v32 = vpop.permute.xlu1 %2819  ;;  %v2934_v55 = vsel %vm255_vm2, %v2924_v0, 0.0 }
 0xa40   :  { %2935 = vadd.xlane.f32.xlu0 %v2934_v55  ;;  %v2843_v36 = vadd.f32 %v2820_v32, %v2763_v16 }
 0xa43   :  { %v2900_v4 = vpop.permute.xlu1 %2899 }
 0xa44   :  { %v2923_v34 = vadd.f32 %v2900_v4, %v2843_v36  ;;  %v2826_v19 = vpop.permute.xlu0 %2825 }
 0xa45   :  { %v2846_v48 = vadd.f32 %v2826_v19, %v2766_v9 }
 0xa46   :  { %v2931_v27 = vsel %vm255_vm2, %v2923_v34, 0.0 }
 0xa47   :  { %2932 = vadd.xlane.f32.xlu1 %v2931_v27 }
 0xa49   :  { %v2906_v12 = vpop.permute.xlu0 %2905 }
 0xa4a   :  { %v2926_v61 = vadd.f32 %v2906_v12, %v2846_v48  ;;  %v3066_v48 = vld [vmem:[%s5888_s10] sm:$0xff]  ;;  %v3067_v12 = vld [vmem:[%s5888_s10 + $0x8] sm:$0xff] }
 0xa4c   :  { %v2940_v18 = vsel %vm255_vm2, %v2926_v61, 0.0 }
 0xa4d   :  { %2941 = vadd.xlane.f32.xlu1 %v2940_v18  ;;  %v3068_v18 = vld [vmem:[%s5888_s10 + $0x10] sm:$0xff] }
 0xa4e   :  { %v2824_v24 = vpop.permute.xlu1 %2823 }
 0xa4f   :  { %v2845_v42 = vadd.f32 %v2824_v24, %v2765_v14  ;;  %v3069_v24 = vld [vmem:[%s5888_s10 + $0x18] sm:$0xff] }
 0xa50   :  { %v3844_v14 = vpack.c.bf16 %v3069_v24, %v3068_v18 }
 0xa52   :  { %v2904_v62 = vpop.permute.xlu1 %2903  ;;  %v2830_v52 = vpop.permute.xlu0 %2829 }
 0xa53   :  { %v2925_v15 = vadd.f32 %v2904_v62, %v2845_v42  ;;  %v2848_v28 = vadd.f32 %v2830_v52, %v2768_v2 }
 0xa55   :  { %v2937_v50 = vsel %vm255_vm2, %v2925_v15, 0.0 }
 0xa56   :  { %v2828_v13 = vpop.permute.xlu1 %2827  ;;  %2938 = vadd.xlane.f32.xlu0 %v2937_v50  ;;  %v2910_v5 = vpop.permute.xlu0 %2909 }
 0xa57   :  { %v2928_v41 = vadd.f32 %v2910_v5, %v2848_v28  ;;  %v2847_v30 = vadd.f32 %v2828_v13, %v2767_v49 }
 0xa59   :  { %v2946_v6 = vsel %vm255_vm2, %v2928_v41, 0.0 }
 0xa5a   :  { %v2908_v60 = vpop.permute.xlu1 %2907  ;;  %2947 = vadd.xlane.f32.xlu1 %v2946_v6 }
 0xa5b   :  { %v2927_v35 = vadd.f32 %v2908_v60, %v2847_v30 }
 0xa5c   :  { %v2834_v45 = vpop.permute.xlu0 %2833 }
 0xa5d   :  { %v2943_v58 = vsel %vm255_vm2, %v2927_v35, 0.0  ;;  %v2850_v21 = vadd.f32 %v2834_v45, %v2770_v3 }
 0xa5e   :  { %2944 = vadd.xlane.f32.xlu0 %v2943_v58 }
 0xa6c   :  { %v2832_v23 = vpop.permute.xlu1 %2831 }
 0xa6d   :  { %v2849_v37 = vadd.f32 %v2832_v23, %v2769_v51 }
 0xa70   :  { %v2912_v31 = vpop.permute.xlu1 %2911 }
 0xa71   :  { %v2929_v39 = vadd.f32 %v2912_v31, %v2849_v37  ;;  %v2914_v47 = vpop.permute.xlu0 %2913 }
 0xa72   :  { %v2930_v1 = vadd.f32 %v2914_v47, %v2850_v21  ;;  %v3334_v21 = vld [vmem:[%s5886_s8] ss:$0 sm:$0xff] }
 0xa73   :  { %v2949_v57 = vsel %vm255_vm2, %v2929_v39, 0.0 }
 0xa74   :  { %2950 = vadd.xlane.f32.xlu0 %v2949_v57  ;;  %v2952_v56 = vsel %vm255_vm2, %v2930_v1, 0.0 }
 0xa75   :  { %2953 = vadd.xlane.f32.xlu1 %v2952_v56  ;;  %v3335_v56 = vld [vmem:[%s5887_s9] ss:$0 sm:$0xff] }
 0xacd   :  { %v2936_v44 = vpop.xlane.xlu0 %2935 }
 0xace   :  { %v2957_v26 = vmul.f32 0.03125, %v2936_v44 }
 0xad0   :  { %v5789_v54 = vsub.f32 %v2924_v0, %v2957_v26 }
 0xad2   :  { %v2973_v63 = vmul.f32 %v5789_v54, %v5789_v54 }
 0xad4   :  { %v2933_v59 = vpop.xlane.xlu1 %2932  ;;  %v2983_v29 = vsel %vm255_vm2, %v2973_v63, 0.0 }
 0xad5   :  { %v2956_v33 = vmul.f32 0.03125, %v2933_v59  ;;  %2984 = vadd.xlane.f32.xlu1 %v2983_v29 }
 0xad7   :  { %v5794_v7 = vsub.f32 %v2923_v34, %v2956_v33 }
 0xad9   :  { %v2972_v11 = vmul.f32 %v5794_v7, %v5794_v7 }
 0xada   :  { %v2942_v53 = vpop.xlane.xlu1 %2941 }
 0xadb   :  { %v2959_v46 = vmul.f32 0.03125, %v2942_v53  ;;  %v2980_v22 = vsel %vm255_vm2, %v2972_v11, 0.0 }
 0xadc   :  { %2981 = vadd.xlane.f32.xlu0 %v2980_v22 }
 0xadd   :  { %v5799_v38 = vsub.f32 %v2926_v61, %v2959_v46  ;;  %v3840_v61 = vpack.c.bf16 %v3067_v12, %v3066_v48 }
 0xadf   :  { %v2975_v8 = vmul.f32 %v5799_v38, %v5799_v38  ;;  %3841 = vmatprep.subr.bf16.mxu0 %v3840_v61 }
 0xae0   :  { %3843 = vmatpush3.bf16.msra.mxu0 %v3840_v61 }
 0xae1   :  { %v2989_v43 = vsel %vm255_vm2, %v2975_v8, 0.0  ;;  %3845 = vmatprep.subr.bf16.mxu0 %v3844_v14 }
 0xae2   :  { %2990 = vadd.xlane.f32.xlu1 %v2989_v43 }
 0xae3   :  { %v2939_v10 = vpop.xlane.xlu0 %2938 }
 0xae4   :  { %v2958_v20 = vmul.f32 0.03125, %v2939_v10  ;;  %3847 = vmatpush3.bf16.msra.mxu0 %v3844_v14 }
 0xae6   :  { %v5804_v17 = vsub.f32 %v2925_v15, %v2958_v20 }
 0xae7   :  { %v2948_v25 = vpop.xlane.xlu1 %2947 }
 0xae8   :  { %v2961_v40 = vmul.f32 0.03125, %v2948_v25  ;;  %v2974_v0 = vmul.f32 %v5804_v17, %v5804_v17 }
 0xaea   :  { %v5808_v32 = vsub.f32 %v2928_v41, %v2961_v40  ;;  %v2986_v55 = vsel %vm255_vm2, %v2974_v0, 0.0 }
 0xaeb   :  { %2987 = vadd.xlane.f32.xlu0 %v2986_v55  ;;  %v2945_v16 = vpop.xlane.xlu0 %2944 }
 0xaec   :  { %v2960_v36 = vmul.f32 0.03125, %v2945_v16  ;;  %v2977_v4 = vmul.f32 %v5808_v32, %v5808_v32 }
 0xaee   :  { %v5813_v34 = vsub.f32 %v2927_v35, %v2960_v36  ;;  %v2995_v19 = vsel %vm255_vm2, %v2977_v4, 0.0 }
 0xaef   :  { %2996 = vadd.xlane.f32.xlu1 %v2995_v19 }
 0xaf0   :  { %v2976_v9 = vmul.f32 %v5813_v34, %v5813_v34 }
 0xaf2   :  { %v2992_v27 = vsel %vm255_vm2, %v2976_v9, 0.0 }
 0xaf3   :  { %2993 = vadd.xlane.f32.xlu0 %v2992_v27 }
 0xb01   :  { %v2951_v42 = vpop.xlane.xlu0 %2950 }
 0xb02   :  { %v2962_v62 = vmul.f32 0.03125, %v2951_v42  ;;  %v2954_v52 = vpop.xlane.xlu1 %2953 }
 0xb03   :  { %v2963_v2 = vmul.f32 0.03125, %v2954_v52 }
 0xb04   :  { %v5831_v15 = vsub.f32 %v2929_v39, %v2962_v62 }
 0xb05   :  { %v5833_v28 = vsub.f32 %v2930_v1, %v2963_v2 }
 0xb06   :  { %v2978_v50 = vmul.f32 %v5831_v15, %v5831_v15 }
 0xb07   :  { %v2979_v13 = vmul.f32 %v5833_v28, %v5833_v28 }
 0xb08   :  { %v2998_v5 = vsel %vm255_vm2, %v2978_v50, 0.0  ;;  %v3336_v50 = vld [vmem:[%s5889_s11] ss:$0 sm:$0xff]  ;;  %s4200_s11 = smov [#allocation2]  }
 0xb09   :  { %2999 = vadd.xlane.f32.xlu0 %v2998_v5  ;;  %v3001_v49 = vsel %vm255_vm2, %v2979_v13, 0.0  ;;  %s3227_s19 = sshll.u32 %s4200_s11, 4  ;;  %s3228_s19 = int_to_ptr.vmem [resolvable:$true] %s3227_s19 }
 0xb0a   :  { %3002 = vadd.xlane.f32.xlu1 %v3001_v49  ;;  %s4162_s20 = scalar_lea.vmem %s3228_s19, 1024  ;;  %p4167_p1 = scmp.lt.s32.totalorder %s3228_s19, %s3228_s19 }
 0xb0b   :  { %p4163_p0 = scmp.ne.s32.totalorder %s3228_s19, %s4162_s20  ;;  %p4168_p2 = scmp.lt.s32.totalorder %s4162_s20, %s4162_s20 }
 0xb0d   :  { %p4169_p3 = por %p4168_p2, %p4167_p1 }
 0xb0f   :  { %p4170_p4 = pnand %p4169_p3, %p4163_p0 }
 0xb62   :  { %v2985_v41 = vpop.xlane.xlu1 %2984 }
 0xb63   :  { %v3005_v30 = vmul.f32 0.03125, %v2985_v41 }
 0xb65   :  { %v3013_v6 = vadd.f32 1e-08, %v3005_v30 }
 0xb67   :  { %4142 = vrsqrt.f32 %v3013_v6 }
 0xb69   :  { %v2982_v60 = vpop.xlane.xlu0 %2981 }
 0xb6a   :  { %v3004_v35 = vmul.f32 0.03125, %v2982_v60 }
 0xb6c   :  { %v3012_v58 = vadd.f32 1e-08, %v3004_v35 }
 0xb6e   :  { %4144 = vrsqrt.f32 %v3012_v58 }
 0xb6f   :  { %v2991_v23 = vpop.xlane.xlu1 %2990 }
 0xb70   :  { %v3007_v51 = vmul.f32 0.03125, %v2991_v23 }
 0xb71   :  { %v4143_v45 = vpop.eup %4142 }
 0xb72   :  { %v3015_v3 = vadd.f32 1e-08, %v3007_v51  ;;  %v3029_v37 = vmul.f32 %v4143_v45, %v5789_v54 }
 0xb74   :  { %4146 = vrsqrt.f32 %v3015_v3  ;;  %v3044_v57 = vmul.f32 %v3334_v21, %v3029_v37 }
 0xb76   :  { %v3059_v29 = vadd.f32 %v3335_v56, %v3044_v57 }
 0xb78   :  { %v4145_v31 = vpop.eup %4144  ;;  %v2988_v39 = vpop.xlane.xlu0 %2987 }
 0xb79   :  { %v3006_v47 = vmul.f32 0.03125, %v2988_v39  ;;  %v3028_v1 = vmul.f32 %v4145_v31, %v5794_v7 }
 0xb7b   :  { %v3014_v44 = vadd.f32 1e-08, %v3006_v47  ;;  %v3043_v26 = vmul.f32 %v3334_v21, %v3028_v1 }
 0xb7c   :  { %v2997_v63 = vpop.xlane.xlu1 %2996 }
 0xb7d   :  { %4148 = vrsqrt.f32 %v3014_v44  ;;  %v3009_v54 = vmul.f32 0.03125, %v2997_v63  ;;  %v3058_v59 = vadd.f32 %v3335_v56, %v3043_v26 }
 0xb7e   :  { %v4147_v53 = vpop.eup %4146 }
 0xb7f   :  { %v3017_v33 = vadd.f32 1e-08, %v3009_v54  ;;  %3700 = vmatprep.mubr.msk.f32.mxu0 %vm255_vm2, %v3058_v59  ;;  %v3031_v22 = vmul.f32 %v4147_v53, %v5799_v38 }
 0xb80   :  { %3701 = vmatmul.mubr.msk.f32.vlgmr.msra.gmra.mrb[24].mxu0 %vm255_vm2, %v3059_v29  ;;  %v2994_v11 = vpop.xlane.xlu0 %2993 }
 0xb81   :  { %4150 = vrsqrt.f32 %v3017_v33  ;;  %v3008_v7 = vmul.f32 0.03125, %v2994_v11  ;;  %v3046_v10 = vmul.f32 %v3334_v21, %v3031_v22 }
 0xb83   :  { %v3016_v46 = vadd.f32 1e-08, %v3008_v7  ;;  %v3061_v0 = vadd.f32 %v3335_v56, %v3046_v10 }
 0xb85   :  { %4152 = vrsqrt.f32 %v3016_v46 }
 0xb87   :  { %v4149_v8 = vpop.eup %4148 }
 0xb88   :  { %v3030_v43 = vmul.f32 %v4149_v8, %v5804_v17 }
 0xb8a   :  { %v3045_v20 = vmul.f32 %v3334_v21, %v3030_v43 }
 0xb8b   :  { %v4151_v25 = vpop.eup %4150 }
 0xb8c   :  { %v3060_v40 = vadd.f32 %v3335_v56, %v3045_v20  ;;  %v3033_v55 = vmul.f32 %v4151_v25, %v5808_v32 }
 0xb8e   :  { %3703 = vmatprep.mubr.msk.f32.mxu0 %vm255_vm2, %v3060_v40  ;;  %v3048_v4 = vmul.f32 %v3334_v21, %v3033_v55 }
 0xb8f   :  { %v4153_v16 = vpop.eup %4152  ;;  %3704 = vmatmul.mubr.msk.f32.gmra.mrb[26].mxu0 %vm255_vm2, %v3061_v0 }
 0xb90   :  { %v3032_v36 = vmul.f32 %v4153_v16, %v5813_v34  ;;  %v3063_v9 = vadd.f32 %v3335_v56, %v3048_v4 }
 0xb92   :  { %v3047_v19 = vmul.f32 %v3334_v21, %v3032_v36 }
 0xb94   :  { %v3062_v38 = vadd.f32 %v3335_v56, %v3047_v19 }
 0xb96   :  { %3706 = vmatprep.mubr.msk.f32.mxu0 %vm255_vm2, %v3062_v38  ;;  %v3000_v17 = vpop.xlane.xlu0 %2999 }
 0xb97   :  { %v3010_v27 = vmul.f32 0.03125, %v3000_v17  ;;  %v3003_v48 = vpop.xlane.xlu1 %3002  ;;  %3707 = vmatmul.mubr.msk.f32.gmra.mrb[28].mxu0 %vm255_vm2, %v3063_v9 }
 0xb98   :  { %v3011_v12 = vmul.f32 0.03125, %v3003_v48 }
 0xb99   :  { %v3018_v32 = vadd.f32 1e-08, %v3010_v27 }
 0xb9a   :  { %v3019_v61 = vadd.f32 1e-08, %v3011_v12 }
 0xb9b   :  { %4154 = vrsqrt.f32 %v3018_v32 }
 0xb9c   :  { %4156 = vrsqrt.f32 %v3019_v61 }
 0xba5   :  { %v4155_v18 = vpop.eup %4154 }
 0xba6   :  { %v4157_v24 = vpop.eup %4156  ;;  %v3034_v34 = vmul.f32 %v4155_v18, %v5831_v15 }
 0xba7   :  { %v3035_v14 = vmul.f32 %v4157_v24, %v5833_v28 }
 0xba8   :  { %v3049_v42 = vmul.f32 %v3334_v21, %v3034_v34 }
 0xba9   :  { %v3050_v62 = vmul.f32 %v3334_v21, %v3035_v14 }
 0xbaa   :  { %v3064_v52 = vadd.f32 %v3335_v56, %v3049_v42 }
 0xbab   :  { %v3065_v2 = vadd.f32 %v3335_v56, %v3050_v62 }
 0xbac   :  { %3709 = vmatprep.mubr.msk.f32.mxu0 %vm255_vm2, %v3064_v52 }
 0xbad   :  { %3710 = vmatmul.mubr.msk.f32.gmra.mrb[30].mxu0 %vm255_vm2, %v3065_v2 }
 0xc53   :  { %v3702_v13 = vpop.f32.mrb[24].mxu0 }
 0xc54   :  { %v3173_v5 = vadd.f32 %v3702_v13, %v3336_v50  ;;  %v3167_v49 = vpop.f32.mrb[25].mxu0 }
 0xc55   :  { %v3168_v41 = vadd.f32 %v3336_v50, %v3167_v49 }
 0xc56   :  { %v3207_v30 = vmax.f32 %v3173_v5, 0.0 }
 0xc57   :  { %v3206_v15 = vmax.f32 %v3168_v41, 0.0 }
 0xc58   :  { %3215 = vst [vmem:[#allocation2 + $0x8] sm:$0xff] %v3207_v30 }
 0xc59   :  { %3214 = vst [vmem:[#allocation2] sm:$0xff] %v3206_v15 }
 0xc62   :  { %v3705_v28 = vpop.f32.mrb[26].mxu0 }
 0xc63   :  { %v3183_v6 = vadd.f32 %v3705_v28, %v3336_v50  ;;  %v3177_v60 = vpop.f32.mrb[27].mxu0 }
 0xc64   :  { %v3178_v35 = vadd.f32 %v3336_v50, %v3177_v60 }
 0xc65   :  { %v3209_v58 = vmax.f32 %v3183_v6, 0.0 }
 0xc66   :  { %v3208_v23 = vmax.f32 %v3178_v35, 0.0 }
 0xc67   :  { %3217 = vst [vmem:[#allocation2 + $0x18] sm:$0xff] %v3209_v58 }
 0xc68   :  { %3216 = vst [vmem:[#allocation2 + $0x10] sm:$0xff] %v3208_v23 }
 0xc6a   :  { %v3708_v51 = vpop.f32.mrb[28].mxu0 }
 0xc6b   :  { %v3193_v45 = vadd.f32 %v3708_v51, %v3336_v50  ;;  %v3187_v3 = vpop.f32.mrb[29].mxu0 }
 0xc6c   :  { %v3188_v37 = vadd.f32 %v3336_v50, %v3187_v3 }
 0xc6d   :  { %v3211_v21 = vmax.f32 %v3193_v45, 0.0 }
 0xc6e   :  { %v3210_v31 = vmax.f32 %v3188_v37, 0.0 }
 0xc6f   :  { %3219 = vst [vmem:[#allocation2 + $0x28] sm:$0xff] %v3211_v21 }
 0xc70   :  { %3218 = vst [vmem:[#allocation2 + $0x20] sm:$0xff] %v3210_v31 }
 0xc80   :  { %v3711_v39 = vpop.f32.mrb[30].mxu0 }
 0xc81   :  { %v3203_v47 = vadd.f32 %v3711_v39, %v3336_v50  ;;  %v3197_v1 = vpop.f32.mrb[31].mxu0 }
 0xc82   :  { %v3198_v57 = vadd.f32 %v3336_v50, %v3197_v1 }
 0xc83   :  { %v3213_v56 = vmax.f32 %v3203_v47, 0.0 }
 0xc84   :  { %v3212_v44 = vmax.f32 %v3198_v57, 0.0 }
 0xc85   :  { %3221 = vst [vmem:[#allocation2 + $0x38] sm:$0xff] %v3213_v56 }
 0xc86   :  { %3220 = vst [vmem:[#allocation2 + $0x30] sm:$0xff] %v3212_v44 }
 0xc87   :  { %4173 = shalt.err (!%p4170_p4)
}
 0xc88   :  { %s4174_s4 = scalar_lea.hbm %s5890_s12, 1024 }
 0xc89   :  { %p4175_p5 = scmp.ne.s32.totalorder %s5890_s12, %s4174_s4  ;;  %p4178_p6 = scmp.lt.u32.totalorder %s4174_s4, %s5890_s12 }
 0xc8b   :  { %p4180_p7 = pnand %p4178_p6, %p4175_p5 }
 0xc8d   :  { %4183 = shalt.err (!%p4180_p7)
}
 0xc8e   :  { %s4201_s25 = smov 128   ;;  %s4202_s26 = smov 8  }
 0xc8f   :  { %3233 = dma.vmem_to_hbm [thread:$0]  %s3228_s19, 1024, %s5890_s12, [#allocation3], %s4201_s25, %s4201_s25, %s4202_s26  }
 0xc90   :  { %4184 = dma.done.wait [#allocation3], 1024  }
 0xc91   :  { %4185 = vsyncadd [#allocation3], 4294966272 }
 0xc92   :  { %3245 = vsyncpa [#allocation3], 1 }

</bundles_post_ra>
